<compile_context>
chip_gen: v7x
topology: tpu7x:2x2x1
jax: 0.10.0
libtpu: 0.0.40
codegen_flags: <defaults>
</compile_context>

<pallas_src>
import functools

import numpy as np
import jax
import jax.numpy as jnp
from jax import lax
from jax.experimental import pallas as pl
from jax.experimental.pallas import tpu as pltpu

_NEG = -1e30  # log-space "minus infinity" that stays finite in f32 arithmetic


def _viterbi_loss_kernel(
    feat_ref,      # (B, TS, T, T) f32  VMEM  features chunk
    trans_ref,     # (T, T)        f32  VMEM  transitions
    cur_ref,       # (B, TS)       i32  VMEM  gold tag at step t        (chunk)
    prev_ref,      # (B, TS)       i32  VMEM  gold tag at step t-1      (chunk)
    lens_ref,      # (B, 1)        i32  VMEM  sentence lengths
    last_ref,      # (B, 1)        i32  VMEM  last gold tag per sentence
    out_ref,       # (1, 1)        f32  VMEM  summed loss
    scores_ref,    # (B, T)        f32  scratch: scores_upto_t
    gold_ref,      # (1, 1)        f32  scratch: gold-path score accumulator
    *, start_tag, stop_tag,
):
    c = pl.program_id(0)
    n_chunks = pl.num_programs(0)
    B, TS, T, _ = feat_ref.shape

    # ---- init on first chunk: log-space one-hot of <START>, zero gold score ----
    @pl.when(c == 0)
    def _init():
        lane = lax.broadcasted_iota(jnp.int32, (B, T), 1)
        scores_ref[...] = jnp.where(lane == start_tag, 0.0, _NEG).astype(jnp.float32)
        gold_ref[...] = jnp.zeros_like(gold_ref)

    lens = lens_ref[...]            # (B, 1) int32
    cur = cur_ref[...]              # (B, TS) int32
    prev = prev_ref[...]            # (B, TS) int32

    iota_to = lax.broadcasted_iota(jnp.int32, (T, T), 0)[None]    # (1, T, T)
    iota_from = lax.broadcasted_iota(jnp.int32, (T, T), 1)[None]  # (1, T, T)
    iota_ts = lax.broadcasted_iota(jnp.int32, (B, TS), 1)         # (B, TS)
    t0 = c * TS

    def body(s, carry):
        sc, gold_acc = carry                       # (B, T) f32, (1, 1) f32
        t = t0 + s                                 # global timestep
        valid = t < lens                           # (B, 1) bool length mask

        feat_t = feat_ref[:, pl.ds(s, 1), :, :][:, 0]    # (B, T, T)

        # -- gold-path gather: features[b, t, cur[b,t], prev[b,t]] (batched one-hot) --
        sel_s = iota_ts == s                              # pick column s of the chunk
        cur_s = jnp.sum(jnp.where(sel_s, cur, 0), axis=1, keepdims=True)    # (B, 1)
        prev_s = jnp.sum(jnp.where(sel_s, prev, 0), axis=1, keepdims=True)  # (B, 1)
        hit = (iota_to == cur_s[:, :, None]) & (iota_from == prev_s[:, :, None])
        hit = hit & valid[:, :, None]                     # (B, T, T)
        gold_acc = gold_acc + jnp.sum(jnp.where(hit, feat_t, 0.0))

        # -- CRF forward recursion: scores[b,i] <- lse_j(feat[b,t,i,j] + scores[b,j]) --
        x = feat_t + sc[:, None, :]                       # (B, T, T)
        m = jnp.max(x, axis=2, keepdims=True)             # (B, T, 1)
        lse = m[:, :, 0] + jnp.log(jnp.sum(jnp.exp(x - m), axis=2))   # (B, T)
        sc = jnp.where(valid, lse, sc)                    # one coalesced masked update
        return sc, gold_acc

    sc0 = scores_ref[...]
    gold0 = jnp.zeros((1, 1), jnp.float32)
    sc_fin, gold_add = lax.fori_loop(
        0, TS, body, (sc0, gold0), unroll=True if TS <= 32 else 8)
    scores_ref[...] = sc_fin
    gold_ref[...] = gold_ref[...] + gold_add

    # ---- finalize on last chunk ----
    @pl.when(c == n_chunks - 1)
    def _final():
        trans_stop = trans_ref[stop_tag:stop_tag + 1, :]          # (1, T)

        # gold += transitions[stop_tag, last_gold_tag[b]] summed over batch
        lane_bt = lax.broadcasted_iota(jnp.int32, (B, T), 1)
        last = last_ref[...]                                      # (B, 1)
        gold_trans = jnp.sum(jnp.where(lane_bt == last, trans_stop, 0.0))
        gold_total = gold_ref[...] + gold_trans                   # (1, 1)

        final = scores_ref[...] + trans_stop                      # (B, T)
        mm = jnp.max(final, axis=1, keepdims=True)                # (B, 1)
        lse_f = mm + jnp.log(jnp.sum(jnp.exp(final - mm), axis=1, keepdims=True))
        all_paths = jnp.sum(lse_f)                                # scalar

        out_ref[...] = (all_paths - gold_total).astype(out_ref.dtype)


def viterbi_loss(features, transitions, lengths, tgt_cur, tgt_prev, last_tag,
                 start_tag, stop_tag, *, ts=None, vmem_budget_bytes=6 * 1024 * 1024):
    """Summed Viterbi loss over the batch. Requires all lengths >= 1."""
    features = jnp.asarray(features, jnp.float32)
    transitions = jnp.asarray(transitions, jnp.float32)
    B, S, T, _ = features.shape

    # ---- choose the per-grid-step time chunk (double-buffered feature slab) ----
    per_step_bytes = B * T * T * 4
    if ts is None:
        ts = max(1, vmem_budget_bytes // (2 * per_step_bytes))
        ts = int(min(ts, S, 256))
    n_chunks = -(-S // ts)
    s_pad = n_chunks * ts

    cur = jnp.asarray(tgt_cur, jnp.int32)
    prev = jnp.asarray(tgt_prev, jnp.int32)
    if s_pad != S:
        features = jnp.pad(features, ((0, 0), (0, s_pad - S), (0, 0), (0, 0)))
        cur = jnp.pad(cur, ((0, 0), (0, s_pad - S)))
        prev = jnp.pad(prev, ((0, 0), (0, s_pad - S)))
    # (B, S_pad) -> (n_chunks, B, ts) so each grid step gets a full-extent (B, ts) block
    cur = cur.reshape(B, n_chunks, ts).transpose(1, 0, 2)
    prev = prev.reshape(B, n_chunks, ts).transpose(1, 0, 2)

    lens2d = jnp.asarray(lengths, jnp.int32).reshape(B, 1)
    last2d = jnp.asarray(last_tag, jnp.int32).reshape(B, 1)

    kernel = functools.partial(
        _viterbi_loss_kernel, start_tag=int(start_tag), stop_tag=int(stop_tag))

    # TODO(synk): for large B on v7x, add a leading "parallel" batch grid axis with a
    # per-chunk output summed in the wrapper to use both TensorCores.
    grid_spec = pltpu.PrefetchScalarGridSpec(
        num_scalar_prefetch=0,
        grid=(n_chunks,),
        in_specs=[
            pl.BlockSpec((B, ts, T, T), lambda c: (0, c, 0, 0)),      # features chunk
            pl.BlockSpec((T, T), lambda c: (0, 0)),                   # transitions
            pl.BlockSpec((pl.Squeezed(), B, ts), lambda c: (c, 0, 0)),  # tgt_cur chunk
            pl.BlockSpec((pl.Squeezed(), B, ts), lambda c: (c, 0, 0)),  # tgt_prev chunk
            pl.BlockSpec((B, 1), lambda c: (0, 0)),                   # lengths
            pl.BlockSpec((B, 1), lambda c: (0, 0)),                   # last gold tag
        ],
        out_specs=pl.BlockSpec((1, 1), lambda c: (0, 0)),
        scratch_shapes=[
            pltpu.VMEM((B, T), jnp.float32),   # scores_upto_t
            pltpu.VMEM((1, 1), jnp.float32),   # gold-path accumulator
        ],
    )

    out = pl.pallas_call(
        kernel,
        out_shape=jax.ShapeDtypeStruct((1, 1), jnp.float32),
        grid_spec=grid_spec,
        compiler_params=pltpu.CompilerParams(
            dimension_semantics=("arbitrary",),        # sequential CRF recursion
            vmem_limit_bytes=32 * 1024 * 1024,         # safe on v5e/v6e/v7x
        ),
    )(features, transitions, cur, prev, lens2d, last2d)
    return out[0, 0]


if __name__ == "__main__":
    key = jax.random.PRNGKey(0)
    B, S = 2, 8
    n_real_tags = 10
    T = n_real_tags + 2                      # tag dictionary includes <START>, <STOP>
    START_TAG_IDX, STOP_TAG_IDX = n_real_tags, n_real_tags + 1

    lengths = np.array([8, 6], dtype=np.int32)   # sorted descending (pack_padded_sequence)

    k_feat, k_trans, k_tgt = jax.random.split(key, 3)
    features = jax.random.normal(k_feat, (B, S, T, T), dtype=jnp.float32)
    transitions = jax.random.normal(k_trans, (T, T), dtype=jnp.float32)
    flat_targets = jax.random.randint(
        k_tgt, (int(lengths.sum()),), 0, n_real_tags, dtype=jnp.int32)

    # ---- host-side glue reproducing ViterbiLoss._format_targets ----
    # TODO(synk): ragged split / pack_padded_sequence is pure host-side index prep,
    # done here in numpy (no Pallas equivalent needed).
    flat = np.asarray(flat_targets)
    targets_per_sentence, off = [], 0
    for L in lengths:
        targets_per_sentence.append([int(v) for v in flat[off:off + int(L)]])
        off += int(L)
    max_len = int(lengths.max())
    padded = [t + [STOP_TAG_IDX] * (max_len - len(t)) for t in targets_per_sentence]
    tgt_cur = np.array(padded, dtype=np.int32)                         # (B, S)
    tgt_prev = np.concatenate(
        [np.full((B, 1), START_TAG_IDX, np.int32), tgt_cur[:, :-1]], axis=1)
    last_tag = np.array([padded[b][int(lengths[b]) - 1] for b in range(B)],
                        dtype=np.int32)

    loss = viterbi_loss(features, transitions, lengths, tgt_cur, tgt_prev,
                        last_tag, START_TAG_IDX, STOP_TAG_IDX)
    loss = jax.block_until_ready(loss)

    # ---- pure numpy reference (mirrors the PyTorch module) ----
    f = np.asarray(features, np.float64)
    tr = np.asarray(transitions, np.float64)
    gold_ref = 0.0
    for b in range(B):
        s = padded[b]
        L = int(lengths[b])
        prev = START_TAG_IDX
        for p in range(L):
            gold_ref += f[b, p, s[p], prev]
            prev = s[p]
        gold_ref += tr[STOP_TAG_IDX, s[L - 1]]
    scores_ref = np.zeros((B, T), dtype=np.float64)
    for t_ in range(max_len):
        for b in range(B):
            if int(lengths[b]) > t_:
                if t_ == 0:
                    scores_ref[b] = f[b, 0, :, START_TAG_IDX]
                else:
                    x = f[b, t_] + scores_ref[b][None, :]
                    mx = x.max(axis=1)
                    scores_ref[b] = mx + np.log(np.exp(x - mx[:, None]).sum(axis=1))
    final = scores_ref + tr[STOP_TAG_IDX][None, :]
    mx = final.max(axis=1)
    all_paths_ref = (mx + np.log(np.exp(final - mx[:, None]).sum(axis=1))).sum()
    ref = all_paths_ref - gold_ref

    assert np.allclose(float(loss), ref, rtol=1e-4, atol=1e-3), (float(loss), ref)
    print("KERNEL_OK")
</pallas_src>

<mosaic_0001>
module attributes {stable_mosaic.version = 11 : i64} {
  func.func @_viterbi_loss_kernel(%arg0: i32, %arg1: memref<2x8x12x12xf32, #tpu.memory_space<vmem>>, %arg2: memref<12x12xf32, #tpu.memory_space<vmem>>, %arg3: memref<1x2x8xi32, #tpu.memory_space<vmem>>, %arg4: memref<1x2x8xi32, #tpu.memory_space<vmem>>, %arg5: memref<2x1xi32, #tpu.memory_space<vmem>>, %arg6: memref<2x1xi32, #tpu.memory_space<vmem>>, %arg7: memref<1x1xf32, #tpu.memory_space<vmem>>, %arg8: memref<2x12xf32, #tpu.memory_space<vmem>>, %arg9: memref<1x1xf32, #tpu.memory_space<vmem>>) attributes {dimension_semantics = [#tpu.dimension_semantics<arbitrary>], iteration_bounds = array<i64: 1>, scalar_prefetch = 0 : i64, scratch_operands = 2 : i64, tpu.core_type = #tpu.core_type<tc>, window_params = [{transform_indices = @transform_0, window_bounds = array<i64: 2, 8, 12, 12>}, {pipeline_mode = #tpu.pipeline_mode<synchronous>, transform_indices = @transform_1, window_bounds = array<i64: 12, 12>}, {transform_indices = @transform_2, window_bounds = array<i64: 1, 2, 8>}, {transform_indices = @transform_3, window_bounds = array<i64: 1, 2, 8>}, {pipeline_mode = #tpu.pipeline_mode<synchronous>, transform_indices = @transform_4, window_bounds = array<i64: 2, 1>}, {pipeline_mode = #tpu.pipeline_mode<synchronous>, transform_indices = @transform_5, window_bounds = array<i64: 2, 1>}, {pipeline_mode = #tpu.pipeline_mode<synchronous>, transform_indices = @transform_6, window_bounds = array<i64: 1, 1>}]} {
    %c0_i32 = arith.constant 0 : i32
    %0 = arith.cmpi eq, %arg0, %c0_i32 : i32
    %1 = arith.extui %0 : i1 to i32
    %c0_i32_0 = arith.constant 0 : i32
    %2 = arith.cmpi ne, %1, %c0_i32_0 : i32
    scf.if %2 {
      %431 = tpu.iota {dimensions = array<i32: 1>} : vector<2x12xi32>
      %c10_i32 = arith.constant 10 : i32
      %432 = vector.broadcast %c10_i32 : i32 to vector<2x12xi32>
      %433 = arith.cmpi eq, %431, %432 : vector<2x12xi32>
      %cst_108 = arith.constant 0.000000e+00 : f32
      %cst_109 = arith.constant -1.000000e+30 : f32
      %434 = vector.broadcast %cst_108 : f32 to vector<2x12xf32>
      %435 = vector.broadcast %cst_109 : f32 to vector<2x12xf32>
      %436 = arith.select %433, %434, %435 : vector<2x12xi1>, vector<2x12xf32>
      %c0_110 = arith.constant 0 : index
      %c0_111 = arith.constant 0 : index
      %437 = vector.load %arg8[%c0_110, %c0_111] : memref<2x12xf32, #tpu.memory_space<vmem>>, vector<2x12xf32>
      tpu.vector_store %arg8[%c0_110, %c0_111], %436 {strides = array<i32>} : memref<2x12xf32, #tpu.memory_space<vmem>>, vector<2x12xf32>,
      %cst_112 = arith.constant 0.000000e+00 : f32
      %438 = vector.broadcast %cst_112 : f32 to vector<1x1xf32>
      %c0_113 = arith.constant 0 : index
      %c0_114 = arith.constant 0 : index
      %439 = vector.load %arg9[%c0_113, %c0_114] : memref<1x1xf32, #tpu.memory_space<vmem>>, vector<1x1xf32>
      tpu.vector_store %arg9[%c0_113, %c0_114], %438 {strides = array<i32>} : memref<1x1xf32, #tpu.memory_space<vmem>>, vector<1x1xf32>,
    } else {
    }
    %c0 = arith.constant 0 : index
    %c0_1 = arith.constant 0 : index
    %3 = vector.load %arg5[%c0, %c0_1] : memref<2x1xi32, #tpu.memory_space<vmem>>, vector<2x1xi32>
    %c0_2 = arith.constant 0 : index
    %c0_3 = arith.constant 0 : index
    %c0_4 = arith.constant 0 : index
    %4 = vector.load %arg3[%c0_2, %c0_3, %c0_4] : memref<1x2x8xi32, #tpu.memory_space<vmem>>, vector<1x2x8xi32>
    %5 = vector.shape_cast %4 : vector<1x2x8xi32> to vector<2x8xi32>
    %c0_5 = arith.constant 0 : index
    %c0_6 = arith.constant 0 : index
    %c0_7 = arith.constant 0 : index
    %6 = vector.load %arg4[%c0_5, %c0_6, %c0_7] : memref<1x2x8xi32, #tpu.memory_space<vmem>>, vector<1x2x8xi32>
    %7 = vector.shape_cast %6 : vector<1x2x8xi32> to vector<2x8xi32>
    %8 = tpu.iota {dimensions = array<i32: 0>} : vector<12x12xi32>
    %9 = vector.shape_cast %8 : vector<12x12xi32> to vector<1x12x12xi32>
    %10 = tpu.iota {dimensions = array<i32: 1>} : vector<12x12xi32>
    %11 = vector.shape_cast %10 : vector<12x12xi32> to vector<1x12x12xi32>
    %12 = tpu.iota {dimensions = array<i32: 1>} : vector<2x8xi32>
    %c8_i32 = arith.constant 8 : i32
    %13 = arith.muli %arg0, %c8_i32 : i32
    %c0_8 = arith.constant 0 : index
    %c0_9 = arith.constant 0 : index
    %14 = vector.load %arg8[%c0_8, %c0_9] : memref<2x12xf32, #tpu.memory_space<vmem>>, vector<2x12xf32>
    %cst = arith.constant 0.000000e+00 : f32
    %15 = vector.broadcast %cst : f32 to vector<1x1xf32>
    %c0_i32_10 = arith.constant 0 : i32
    %16 = arith.addi %13, %c0_i32_10 : i32
    %17 = vector.broadcast %16 : i32 to vector<2x1xi32>
    %18 = arith.cmpi slt, %17, %3 : vector<2x1xi32>
    %c0_11 = arith.constant 0 : index
    %19 = arith.index_cast %c0_i32_10 : i32 to index
    %c0_12 = arith.constant 0 : index
    %c0_13 = arith.constant 0 : index
    %20 = vector.load %arg1[%c0_11, %19, %c0_12, %c0_13] : memref<2x8x12x12xf32, #tpu.memory_space<vmem>>, vector<2x1x12x12xf32>
    %21 = vector.shape_cast %20 : vector<2x1x12x12xf32> to vector<2x12x12xf32>
    %22 = vector.broadcast %c0_i32_10 : i32 to vector<2x8xi32>
    %23 = arith.cmpi eq, %12, %22 : vector<2x8xi32>
    %c0_i32_14 = arith.constant 0 : i32
    %24 = vector.broadcast %c0_i32_14 : i32 to vector<2x8xi32>
    %25 = arith.select %23, %5, %24 : vector<2x8xi1>, vector<2x8xi32>
    %cst_15 = arith.constant dense<0> : vector<2xi32>
    %26 = vector.multi_reduction <add>, %25, %cst_15 [1] : vector<2x8xi32> to vector<2xi32>
    %27 = vector.shape_cast %26 : vector<2xi32> to vector<2x1xi32>
    %c0_i32_16 = arith.constant 0 : i32
    %28 = vector.broadcast %c0_i32_16 : i32 to vector<2x8xi32>
    %29 = arith.select %23, %7, %28 : vector<2x8xi1>, vector<2x8xi32>
    %cst_17 = arith.constant dense<0> : vector<2xi32>
    %30 = vector.multi_reduction <add>, %29, %cst_17 [1] : vector<2x8xi32> to vector<2xi32>
    %31 = vector.shape_cast %30 : vector<2xi32> to vector<2x1xi32>
    %32 = vector.shape_cast %27 : vector<2x1xi32> to vector<2x1x1xi32>
    %33 = vector.broadcast %9 : vector<1x12x12xi32> to vector<2x12x12xi32>
    %34 = vector.broadcast %32 : vector<2x1x1xi32> to vector<2x12x12xi32>
    %35 = arith.cmpi eq, %33, %34 : vector<2x12x12xi32>
    %36 = vector.shape_cast %31 : vector<2x1xi32> to vector<2x1x1xi32>
    %37 = vector.broadcast %11 : vector<1x12x12xi32> to vector<2x12x12xi32>
    %38 = vector.broadcast %36 : vector<2x1x1xi32> to vector<2x12x12xi32>
    %39 = arith.cmpi eq, %37, %38 : vector<2x12x12xi32>
    %40 = arith.andi %35, %39 : vector<2x12x12xi1>
    %41 = vector.shape_cast %18 : vector<2x1xi1> to vector<2x1x1xi1>
    %42 = vector.broadcast %41 : vector<2x1x1xi1> to vector<2x12x12xi1>
    %43 = arith.andi %40, %42 : vector<2x12x12xi1>
    %cst_18 = arith.constant 0.000000e+00 : f32
    %44 = vector.broadcast %cst_18 : f32 to vector<2x12x12xf32>
    %45 = arith.select %43, %21, %44 : vector<2x12x12xi1>, vector<2x12x12xf32>
    %46 = vector.shape_cast %45 : vector<2x12x12xf32> to vector<1x2x12x12xf32>
    %cst_19 = arith.constant dense<0.000000e+00> : vector<1xf32>
    %47 = vector.multi_reduction <add>, %46, %cst_19 [1, 2, 3] : vector<1x2x12x12xf32> to vector<1xf32>
    %48 = vector.shape_cast %47 : vector<1xf32> to vector<1x1x1x1xf32>
    %49 = vector.extract %48[0, 0, 0, 0] : f32 from vector<1x1x1x1xf32>
    %50 = vector.broadcast %49 : f32 to vector<1x1xf32>
    %51 = arith.addf %15, %50 : vector<1x1xf32>
    %52 = vector.shape_cast %14 : vector<2x12xf32> to vector<2x1x12xf32>
    %53 = vector.broadcast %52 : vector<2x1x12xf32> to vector<2x12x12xf32>
    %54 = arith.addf %21, %53 : vector<2x12x12xf32>
    %cst_20 = arith.constant dense<0xFF800000> : vector<2x12xf32>
    %55 = vector.multi_reduction <maximumf>, %54, %cst_20 [2] : vector<2x12x12xf32> to vector<2x12xf32>
    %56 = vector.shape_cast %55 : vector<2x12xf32> to vector<2x12x1xf32>
    %57 = vector.shape_cast %56 : vector<2x12x1xf32> to vector<2x12xf32>
    %58 = vector.broadcast %56 : vector<2x12x1xf32> to vector<2x12x12xf32>
    %59 = arith.subf %54, %58 : vector<2x12x12xf32>
    %60 = math.exp %59 : vector<2x12x12xf32>
    %cst_21 = arith.constant dense<0.000000e+00> : vector<2x12xf32>
    %61 = vector.multi_reduction <add>, %60, %cst_21 [2] : vector<2x12x12xf32> to vector<2x12xf32>
    %62 = math.log %61 : vector<2x12xf32>
    %63 = arith.addf %57, %62 : vector<2x12xf32>
    %64 = vector.shape_cast %18 : vector<2x1xi1> to vector<2x1xi1>
    %65 = vector.broadcast %64 : vector<2x1xi1> to vector<2x12xi1>
    %66 = arith.select %65, %63, %14 : vector<2x12xi1>, vector<2x12xf32>
    %c1_i32 = arith.constant 1 : i32
    %67 = arith.addi %13, %c1_i32 : i32
    %68 = vector.broadcast %67 : i32 to vector<2x1xi32>
    %69 = arith.cmpi slt, %68, %3 : vector<2x1xi32>
    %c0_22 = arith.constant 0 : index
    %70 = arith.index_cast %c1_i32 : i32 to index
    %c0_23 = arith.constant 0 : index
    %c0_24 = arith.constant 0 : index
    %71 = vector.load %arg1[%c0_22, %70, %c0_23, %c0_24] : memref<2x8x12x12xf32, #tpu.memory_space<vmem>>, vector<2x1x12x12xf32>
    %72 = vector.shape_cast %71 : vector<2x1x12x12xf32> to vector<2x12x12xf32>
    %73 = vector.broadcast %c1_i32 : i32 to vector<2x8xi32>
    %74 = arith.cmpi eq, %12, %73 : vector<2x8xi32>
    %c0_i32_25 = arith.constant 0 : i32
    %75 = vector.broadcast %c0_i32_25 : i32 to vector<2x8xi32>
    %76 = arith.select %74, %5, %75 : vector<2x8xi1>, vector<2x8xi32>
    %cst_26 = arith.constant dense<0> : vector<2xi32>
    %77 = vector.multi_reduction <add>, %76, %cst_26 [1] : vector<2x8xi32> to vector<2xi32>
    %78 = vector.shape_cast %77 : vector<2xi32> to vector<2x1xi32>
    %c0_i32_27 = arith.constant 0 : i32
    %79 = vector.broadcast %c0_i32_27 : i32 to vector<2x8xi32>
    %80 = arith.select %74, %7, %79 : vector<2x8xi1>, vector<2x8xi32>
    %cst_28 = arith.constant dense<0> : vector<2xi32>
    %81 = vector.multi_reduction <add>, %80, %cst_28 [1] : vector<2x8xi32> to vector<2xi32>
    %82 = vector.shape_cast %81 : vector<2xi32> to vector<2x1xi32>
    %83 = vector.shape_cast %78 : vector<2x1xi32> to vector<2x1x1xi32>
    %84 = vector.broadcast %9 : vector<1x12x12xi32> to vector<2x12x12xi32>
    %85 = vector.broadcast %83 : vector<2x1x1xi32> to vector<2x12x12xi32>
    %86 = arith.cmpi eq, %84, %85 : vector<2x12x12xi32>
    %87 = vector.shape_cast %82 : vector<2x1xi32> to vector<2x1x1xi32>
    %88 = vector.broadcast %11 : vector<1x12x12xi32> to vector<2x12x12xi32>
    %89 = vector.broadcast %87 : vector<2x1x1xi32> to vector<2x12x12xi32>
    %90 = arith.cmpi eq, %88, %89 : vector<2x12x12xi32>
    %91 = arith.andi %86, %90 : vector<2x12x12xi1>
    %92 = vector.shape_cast %69 : vector<2x1xi1> to vector<2x1x1xi1>
    %93 = vector.broadcast %92 : vector<2x1x1xi1> to vector<2x12x12xi1>
    %94 = arith.andi %91, %93 : vector<2x12x12xi1>
    %cst_29 = arith.constant 0.000000e+00 : f32
    %95 = vector.broadcast %cst_29 : f32 to vector<2x12x12xf32>
    %96 = arith.select %94, %72, %95 : vector<2x12x12xi1>, vector<2x12x12xf32>
    %97 = vector.shape_cast %96 : vector<2x12x12xf32> to vector<1x2x12x12xf32>
    %cst_30 = arith.constant dense<0.000000e+00> : vector<1xf32>
    %98 = vector.multi_reduction <add>, %97, %cst_30 [1, 2, 3] : vector<1x2x12x12xf32> to vector<1xf32>
    %99 = vector.shape_cast %98 : vector<1xf32> to vector<1x1x1x1xf32>
    %100 = vector.extract %99[0, 0, 0, 0] : f32 from vector<1x1x1x1xf32>
    %101 = vector.broadcast %100 : f32 to vector<1x1xf32>
    %102 = arith.addf %51, %101 : vector<1x1xf32>
    %103 = vector.shape_cast %66 : vector<2x12xf32> to vector<2x1x12xf32>
    %104 = vector.broadcast %103 : vector<2x1x12xf32> to vector<2x12x12xf32>
    %105 = arith.addf %72, %104 : vector<2x12x12xf32>
    %cst_31 = arith.constant dense<0xFF800000> : vector<2x12xf32>
    %106 = vector.multi_reduction <maximumf>, %105, %cst_31 [2] : vector<2x12x12xf32> to vector<2x12xf32>
    %107 = vector.shape_cast %106 : vector<2x12xf32> to vector<2x12x1xf32>
    %108 = vector.shape_cast %107 : vector<2x12x1xf32> to vector<2x12xf32>
    %109 = vector.broadcast %107 : vector<2x12x1xf32> to vector<2x12x12xf32>
    %110 = arith.subf %105, %109 : vector<2x12x12xf32>
    %111 = math.exp %110 : vector<2x12x12xf32>
    %cst_32 = arith.constant dense<0.000000e+00> : vector<2x12xf32>
    %112 = vector.multi_reduction <add>, %111, %cst_32 [2] : vector<2x12x12xf32> to vector<2x12xf32>
    %113 = math.log %112 : vector<2x12xf32>
    %114 = arith.addf %108, %113 : vector<2x12xf32>
    %115 = vector.shape_cast %69 : vector<2x1xi1> to vector<2x1xi1>
    %116 = vector.broadcast %115 : vector<2x1xi1> to vector<2x12xi1>
    %117 = arith.select %116, %114, %66 : vector<2x12xi1>, vector<2x12xf32>
    %c2_i32 = arith.constant 2 : i32
    %118 = arith.addi %13, %c2_i32 : i32
    %119 = vector.broadcast %118 : i32 to vector<2x1xi32>
    %120 = arith.cmpi slt, %119, %3 : vector<2x1xi32>
    %c0_33 = arith.constant 0 : index
    %121 = arith.index_cast %c2_i32 : i32 to index
    %c0_34 = arith.constant 0 : index
    %c0_35 = arith.constant 0 : index
    %122 = vector.load %arg1[%c0_33, %121, %c0_34, %c0_35] : memref<2x8x12x12xf32, #tpu.memory_space<vmem>>, vector<2x1x12x12xf32>
    %123 = vector.shape_cast %122 : vector<2x1x12x12xf32> to vector<2x12x12xf32>
    %124 = vector.broadcast %c2_i32 : i32 to vector<2x8xi32>
    %125 = arith.cmpi eq, %12, %124 : vector<2x8xi32>
    %c0_i32_36 = arith.constant 0 : i32
    %126 = vector.broadcast %c0_i32_36 : i32 to vector<2x8xi32>
    %127 = arith.select %125, %5, %126 : vector<2x8xi1>, vector<2x8xi32>
    %cst_37 = arith.constant dense<0> : vector<2xi32>
    %128 = vector.multi_reduction <add>, %127, %cst_37 [1] : vector<2x8xi32> to vector<2xi32>
    %129 = vector.shape_cast %128 : vector<2xi32> to vector<2x1xi32>
    %c0_i32_38 = arith.constant 0 : i32
    %130 = vector.broadcast %c0_i32_38 : i32 to vector<2x8xi32>
    %131 = arith.select %125, %7, %130 : vector<2x8xi1>, vector<2x8xi32>
    %cst_39 = arith.constant dense<0> : vector<2xi32>
    %132 = vector.multi_reduction <add>, %131, %cst_39 [1] : vector<2x8xi32> to vector<2xi32>
    %133 = vector.shape_cast %132 : vector<2xi32> to vector<2x1xi32>
    %134 = vector.shape_cast %129 : vector<2x1xi32> to vector<2x1x1xi32>
    %135 = vector.broadcast %9 : vector<1x12x12xi32> to vector<2x12x12xi32>
    %136 = vector.broadcast %134 : vector<2x1x1xi32> to vector<2x12x12xi32>
    %137 = arith.cmpi eq, %135, %136 : vector<2x12x12xi32>
    %138 = vector.shape_cast %133 : vector<2x1xi32> to vector<2x1x1xi32>
    %139 = vector.broadcast %11 : vector<1x12x12xi32> to vector<2x12x12xi32>
    %140 = vector.broadcast %138 : vector<2x1x1xi32> to vector<2x12x12xi32>
    %141 = arith.cmpi eq, %139, %140 : vector<2x12x12xi32>
    %142 = arith.andi %137, %141 : vector<2x12x12xi1>
    %143 = vector.shape_cast %120 : vector<2x1xi1> to vector<2x1x1xi1>
    %144 = vector.broadcast %143 : vector<2x1x1xi1> to vector<2x12x12xi1>
    %145 = arith.andi %142, %144 : vector<2x12x12xi1>
    %cst_40 = arith.constant 0.000000e+00 : f32
    %146 = vector.broadcast %cst_40 : f32 to vector<2x12x12xf32>
    %147 = arith.select %145, %123, %146 : vector<2x12x12xi1>, vector<2x12x12xf32>
    %148 = vector.shape_cast %147 : vector<2x12x12xf32> to vector<1x2x12x12xf32>
    %cst_41 = arith.constant dense<0.000000e+00> : vector<1xf32>
    %149 = vector.multi_reduction <add>, %148, %cst_41 [1, 2, 3] : vector<1x2x12x12xf32> to vector<1xf32>
    %150 = vector.shape_cast %149 : vector<1xf32> to vector<1x1x1x1xf32>
    %151 = vector.extract %150[0, 0, 0, 0] : f32 from vector<1x1x1x1xf32>
    %152 = vector.broadcast %151 : f32 to vector<1x1xf32>
    %153 = arith.addf %102, %152 : vector<1x1xf32>
    %154 = vector.shape_cast %117 : vector<2x12xf32> to vector<2x1x12xf32>
    %155 = vector.broadcast %154 : vector<2x1x12xf32> to vector<2x12x12xf32>
    %156 = arith.addf %123, %155 : vector<2x12x12xf32>
    %cst_42 = arith.constant dense<0xFF800000> : vector<2x12xf32>
    %157 = vector.multi_reduction <maximumf>, %156, %cst_42 [2] : vector<2x12x12xf32> to vector<2x12xf32>
    %158 = vector.shape_cast %157 : vector<2x12xf32> to vector<2x12x1xf32>
    %159 = vector.shape_cast %158 : vector<2x12x1xf32> to vector<2x12xf32>
    %160 = vector.broadcast %158 : vector<2x12x1xf32> to vector<2x12x12xf32>
    %161 = arith.subf %156, %160 : vector<2x12x12xf32>
    %162 = math.exp %161 : vector<2x12x12xf32>
    %cst_43 = arith.constant dense<0.000000e+00> : vector<2x12xf32>
    %163 = vector.multi_reduction <add>, %162, %cst_43 [2] : vector<2x12x12xf32> to vector<2x12xf32>
    %164 = math.log %163 : vector<2x12xf32>
    %165 = arith.addf %159, %164 : vector<2x12xf32>
    %166 = vector.shape_cast %120 : vector<2x1xi1> to vector<2x1xi1>
    %167 = vector.broadcast %166 : vector<2x1xi1> to vector<2x12xi1>
    %168 = arith.select %167, %165, %117 : vector<2x12xi1>, vector<2x12xf32>
    %c3_i32 = arith.constant 3 : i32
    %169 = arith.addi %13, %c3_i32 : i32
    %170 = vector.broadcast %169 : i32 to vector<2x1xi32>
    %171 = arith.cmpi slt, %170, %3 : vector<2x1xi32>
    %c0_44 = arith.constant 0 : index
    %172 = arith.index_cast %c3_i32 : i32 to index
    %c0_45 = arith.constant 0 : index
    %c0_46 = arith.constant 0 : index
    %173 = vector.load %arg1[%c0_44, %172, %c0_45, %c0_46] : memref<2x8x12x12xf32, #tpu.memory_space<vmem>>, vector<2x1x12x12xf32>
    %174 = vector.shape_cast %173 : vector<2x1x12x12xf32> to vector<2x12x12xf32>
    %175 = vector.broadcast %c3_i32 : i32 to vector<2x8xi32>
    %176 = arith.cmpi eq, %12, %175 : vector<2x8xi32>
    %c0_i32_47 = arith.constant 0 : i32
    %177 = vector.broadcast %c0_i32_47 : i32 to vector<2x8xi32>
    %178 = arith.select %176, %5, %177 : vector<2x8xi1>, vector<2x8xi32>
    %cst_48 = arith.constant dense<0> : vector<2xi32>
    %179 = vector.multi_reduction <add>, %178, %cst_48 [1] : vector<2x8xi32> to vector<2xi32>
    %180 = vector.shape_cast %179 : vector<2xi32> to vector<2x1xi32>
    %c0_i32_49 = arith.constant 0 : i32
    %181 = vector.broadcast %c0_i32_49 : i32 to vector<2x8xi32>
    %182 = arith.select %176, %7, %181 : vector<2x8xi1>, vector<2x8xi32>
    %cst_50 = arith.constant dense<0> : vector<2xi32>
    %183 = vector.multi_reduction <add>, %182, %cst_50 [1] : vector<2x8xi32> to vector<2xi32>
    %184 = vector.shape_cast %183 : vector<2xi32> to vector<2x1xi32>
    %185 = vector.shape_cast %180 : vector<2x1xi32> to vector<2x1x1xi32>
    %186 = vector.broadcast %9 : vector<1x12x12xi32> to vector<2x12x12xi32>
    %187 = vector.broadcast %185 : vector<2x1x1xi32> to vector<2x12x12xi32>
    %188 = arith.cmpi eq, %186, %187 : vector<2x12x12xi32>
    %189 = vector.shape_cast %184 : vector<2x1xi32> to vector<2x1x1xi32>
    %190 = vector.broadcast %11 : vector<1x12x12xi32> to vector<2x12x12xi32>
    %191 = vector.broadcast %189 : vector<2x1x1xi32> to vector<2x12x12xi32>
    %192 = arith.cmpi eq, %190, %191 : vector<2x12x12xi32>
    %193 = arith.andi %188, %192 : vector<2x12x12xi1>
    %194 = vector.shape_cast %171 : vector<2x1xi1> to vector<2x1x1xi1>
    %195 = vector.broadcast %194 : vector<2x1x1xi1> to vector<2x12x12xi1>
    %196 = arith.andi %193, %195 : vector<2x12x12xi1>
    %cst_51 = arith.constant 0.000000e+00 : f32
    %197 = vector.broadcast %cst_51 : f32 to vector<2x12x12xf32>
    %198 = arith.select %196, %174, %197 : vector<2x12x12xi1>, vector<2x12x12xf32>
    %199 = vector.shape_cast %198 : vector<2x12x12xf32> to vector<1x2x12x12xf32>
    %cst_52 = arith.constant dense<0.000000e+00> : vector<1xf32>
    %200 = vector.multi_reduction <add>, %199, %cst_52 [1, 2, 3] : vector<1x2x12x12xf32> to vector<1xf32>
    %201 = vector.shape_cast %200 : vector<1xf32> to vector<1x1x1x1xf32>
    %202 = vector.extract %201[0, 0, 0, 0] : f32 from vector<1x1x1x1xf32>
    %203 = vector.broadcast %202 : f32 to vector<1x1xf32>
    %204 = arith.addf %153, %203 : vector<1x1xf32>
    %205 = vector.shape_cast %168 : vector<2x12xf32> to vector<2x1x12xf32>
    %206 = vector.broadcast %205 : vector<2x1x12xf32> to vector<2x12x12xf32>
    %207 = arith.addf %174, %206 : vector<2x12x12xf32>
    %cst_53 = arith.constant dense<0xFF800000> : vector<2x12xf32>
    %208 = vector.multi_reduction <maximumf>, %207, %cst_53 [2] : vector<2x12x12xf32> to vector<2x12xf32>
    %209 = vector.shape_cast %208 : vector<2x12xf32> to vector<2x12x1xf32>
    %210 = vector.shape_cast %209 : vector<2x12x1xf32> to vector<2x12xf32>
    %211 = vector.broadcast %209 : vector<2x12x1xf32> to vector<2x12x12xf32>
    %212 = arith.subf %207, %211 : vector<2x12x12xf32>
    %213 = math.exp %212 : vector<2x12x12xf32>
    %cst_54 = arith.constant dense<0.000000e+00> : vector<2x12xf32>
    %214 = vector.multi_reduction <add>, %213, %cst_54 [2] : vector<2x12x12xf32> to vector<2x12xf32>
    %215 = math.log %214 : vector<2x12xf32>
    %216 = arith.addf %210, %215 : vector<2x12xf32>
    %217 = vector.shape_cast %171 : vector<2x1xi1> to vector<2x1xi1>
    %218 = vector.broadcast %217 : vector<2x1xi1> to vector<2x12xi1>
    %219 = arith.select %218, %216, %168 : vector<2x12xi1>, vector<2x12xf32>
    %c4_i32 = arith.constant 4 : i32
    %220 = arith.addi %13, %c4_i32 : i32
    %221 = vector.broadcast %220 : i32 to vector<2x1xi32>
    %222 = arith.cmpi slt, %221, %3 : vector<2x1xi32>
    %c0_55 = arith.constant 0 : index
    %223 = arith.index_cast %c4_i32 : i32 to index
    %c0_56 = arith.constant 0 : index
    %c0_57 = arith.constant 0 : index
    %224 = vector.load %arg1[%c0_55, %223, %c0_56, %c0_57] : memref<2x8x12x12xf32, #tpu.memory_space<vmem>>, vector<2x1x12x12xf32>
    %225 = vector.shape_cast %224 : vector<2x1x12x12xf32> to vector<2x12x12xf32>
    %226 = vector.broadcast %c4_i32 : i32 to vector<2x8xi32>
    %227 = arith.cmpi eq, %12, %226 : vector<2x8xi32>
    %c0_i32_58 = arith.constant 0 : i32
    %228 = vector.broadcast %c0_i32_58 : i32 to vector<2x8xi32>
    %229 = arith.select %227, %5, %228 : vector<2x8xi1>, vector<2x8xi32>
    %cst_59 = arith.constant dense<0> : vector<2xi32>
    %230 = vector.multi_reduction <add>, %229, %cst_59 [1] : vector<2x8xi32> to vector<2xi32>
    %231 = vector.shape_cast %230 : vector<2xi32> to vector<2x1xi32>
    %c0_i32_60 = arith.constant 0 : i32
    %232 = vector.broadcast %c0_i32_60 : i32 to vector<2x8xi32>
    %233 = arith.select %227, %7, %232 : vector<2x8xi1>, vector<2x8xi32>
    %cst_61 = arith.constant dense<0> : vector<2xi32>
    %234 = vector.multi_reduction <add>, %233, %cst_61 [1] : vector<2x8xi32> to vector<2xi32>
    %235 = vector.shape_cast %234 : vector<2xi32> to vector<2x1xi32>
    %236 = vector.shape_cast %231 : vector<2x1xi32> to vector<2x1x1xi32>
    %237 = vector.broadcast %9 : vector<1x12x12xi32> to vector<2x12x12xi32>
    %238 = vector.broadcast %236 : vector<2x1x1xi32> to vector<2x12x12xi32>
    %239 = arith.cmpi eq, %237, %238 : vector<2x12x12xi32>
    %240 = vector.shape_cast %235 : vector<2x1xi32> to vector<2x1x1xi32>
    %241 = vector.broadcast %11 : vector<1x12x12xi32> to vector<2x12x12xi32>
    %242 = vector.broadcast %240 : vector<2x1x1xi32> to vector<2x12x12xi32>
    %243 = arith.cmpi eq, %241, %242 : vector<2x12x12xi32>
    %244 = arith.andi %239, %243 : vector<2x12x12xi1>
    %245 = vector.shape_cast %222 : vector<2x1xi1> to vector<2x1x1xi1>
    %246 = vector.broadcast %245 : vector<2x1x1xi1> to vector<2x12x12xi1>
    %247 = arith.andi %244, %246 : vector<2x12x12xi1>
    %cst_62 = arith.constant 0.000000e+00 : f32
    %248 = vector.broadcast %cst_62 : f32 to vector<2x12x12xf32>
    %249 = arith.select %247, %225, %248 : vector<2x12x12xi1>, vector<2x12x12xf32>
    %250 = vector.shape_cast %249 : vector<2x12x12xf32> to vector<1x2x12x12xf32>
    %cst_63 = arith.constant dense<0.000000e+00> : vector<1xf32>
    %251 = vector.multi_reduction <add>, %250, %cst_63 [1, 2, 3] : vector<1x2x12x12xf32> to vector<1xf32>
    %252 = vector.shape_cast %251 : vector<1xf32> to vector<1x1x1x1xf32>
    %253 = vector.extract %252[0, 0, 0, 0] : f32 from vector<1x1x1x1xf32>
    %254 = vector.broadcast %253 : f32 to vector<1x1xf32>
    %255 = arith.addf %204, %254 : vector<1x1xf32>
    %256 = vector.shape_cast %219 : vector<2x12xf32> to vector<2x1x12xf32>
    %257 = vector.broadcast %256 : vector<2x1x12xf32> to vector<2x12x12xf32>
    %258 = arith.addf %225, %257 : vector<2x12x12xf32>
    %cst_64 = arith.constant dense<0xFF800000> : vector<2x12xf32>
    %259 = vector.multi_reduction <maximumf>, %258, %cst_64 [2] : vector<2x12x12xf32> to vector<2x12xf32>
    %260 = vector.shape_cast %259 : vector<2x12xf32> to vector<2x12x1xf32>
    %261 = vector.shape_cast %260 : vector<2x12x1xf32> to vector<2x12xf32>
    %262 = vector.broadcast %260 : vector<2x12x1xf32> to vector<2x12x12xf32>
    %263 = arith.subf %258, %262 : vector<2x12x12xf32>
    %264 = math.exp %263 : vector<2x12x12xf32>
    %cst_65 = arith.constant dense<0.000000e+00> : vector<2x12xf32>
    %265 = vector.multi_reduction <add>, %264, %cst_65 [2] : vector<2x12x12xf32> to vector<2x12xf32>
    %266 = math.log %265 : vector<2x12xf32>
    %267 = arith.addf %261, %266 : vector<2x12xf32>
    %268 = vector.shape_cast %222 : vector<2x1xi1> to vector<2x1xi1>
    %269 = vector.broadcast %268 : vector<2x1xi1> to vector<2x12xi1>
    %270 = arith.select %269, %267, %219 : vector<2x12xi1>, vector<2x12xf32>
    %c5_i32 = arith.constant 5 : i32
    %271 = arith.addi %13, %c5_i32 : i32
    %272 = vector.broadcast %271 : i32 to vector<2x1xi32>
    %273 = arith.cmpi slt, %272, %3 : vector<2x1xi32>
    %c0_66 = arith.constant 0 : index
    %274 = arith.index_cast %c5_i32 : i32 to index
    %c0_67 = arith.constant 0 : index
    %c0_68 = arith.constant 0 : index
    %275 = vector.load %arg1[%c0_66, %274, %c0_67, %c0_68] : memref<2x8x12x12xf32, #tpu.memory_space<vmem>>, vector<2x1x12x12xf32>
    %276 = vector.shape_cast %275 : vector<2x1x12x12xf32> to vector<2x12x12xf32>
    %277 = vector.broadcast %c5_i32 : i32 to vector<2x8xi32>
    %278 = arith.cmpi eq, %12, %277 : vector<2x8xi32>
    %c0_i32_69 = arith.constant 0 : i32
    %279 = vector.broadcast %c0_i32_69 : i32 to vector<2x8xi32>
    %280 = arith.select %278, %5, %279 : vector<2x8xi1>, vector<2x8xi32>
    %cst_70 = arith.constant dense<0> : vector<2xi32>
    %281 = vector.multi_reduction <add>, %280, %cst_70 [1] : vector<2x8xi32> to vector<2xi32>
    %282 = vector.shape_cast %281 : vector<2xi32> to vector<2x1xi32>
    %c0_i32_71 = arith.constant 0 : i32
    %283 = vector.broadcast %c0_i32_71 : i32 to vector<2x8xi32>
    %284 = arith.select %278, %7, %283 : vector<2x8xi1>, vector<2x8xi32>
    %cst_72 = arith.constant dense<0> : vector<2xi32>
    %285 = vector.multi_reduction <add>, %284, %cst_72 [1] : vector<2x8xi32> to vector<2xi32>
    %286 = vector.shape_cast %285 : vector<2xi32> to vector<2x1xi32>
    %287 = vector.shape_cast %282 : vector<2x1xi32> to vector<2x1x1xi32>
    %288 = vector.broadcast %9 : vector<1x12x12xi32> to vector<2x12x12xi32>
    %289 = vector.broadcast %287 : vector<2x1x1xi32> to vector<2x12x12xi32>
    %290 = arith.cmpi eq, %288, %289 : vector<2x12x12xi32>
    %291 = vector.shape_cast %286 : vector<2x1xi32> to vector<2x1x1xi32>
    %292 = vector.broadcast %11 : vector<1x12x12xi32> to vector<2x12x12xi32>
    %293 = vector.broadcast %291 : vector<2x1x1xi32> to vector<2x12x12xi32>
    %294 = arith.cmpi eq, %292, %293 : vector<2x12x12xi32>
    %295 = arith.andi %290, %294 : vector<2x12x12xi1>
    %296 = vector.shape_cast %273 : vector<2x1xi1> to vector<2x1x1xi1>
    %297 = vector.broadcast %296 : vector<2x1x1xi1> to vector<2x12x12xi1>
    %298 = arith.andi %295, %297 : vector<2x12x12xi1>
    %cst_73 = arith.constant 0.000000e+00 : f32
    %299 = vector.broadcast %cst_73 : f32 to vector<2x12x12xf32>
    %300 = arith.select %298, %276, %299 : vector<2x12x12xi1>, vector<2x12x12xf32>
    %301 = vector.shape_cast %300 : vector<2x12x12xf32> to vector<1x2x12x12xf32>
    %cst_74 = arith.constant dense<0.000000e+00> : vector<1xf32>
    %302 = vector.multi_reduction <add>, %301, %cst_74 [1, 2, 3] : vector<1x2x12x12xf32> to vector<1xf32>
    %303 = vector.shape_cast %302 : vector<1xf32> to vector<1x1x1x1xf32>
    %304 = vector.extract %303[0, 0, 0, 0] : f32 from vector<1x1x1x1xf32>
    %305 = vector.broadcast %304 : f32 to vector<1x1xf32>
    %306 = arith.addf %255, %305 : vector<1x1xf32>
    %307 = vector.shape_cast %270 : vector<2x12xf32> to vector<2x1x12xf32>
    %308 = vector.broadcast %307 : vector<2x1x12xf32> to vector<2x12x12xf32>
    %309 = arith.addf %276, %308 : vector<2x12x12xf32>
    %cst_75 = arith.constant dense<0xFF800000> : vector<2x12xf32>
    %310 = vector.multi_reduction <maximumf>, %309, %cst_75 [2] : vector<2x12x12xf32> to vector<2x12xf32>
    %311 = vector.shape_cast %310 : vector<2x12xf32> to vector<2x12x1xf32>
    %312 = vector.shape_cast %311 : vector<2x12x1xf32> to vector<2x12xf32>
    %313 = vector.broadcast %311 : vector<2x12x1xf32> to vector<2x12x12xf32>
    %314 = arith.subf %309, %313 : vector<2x12x12xf32>
    %315 = math.exp %314 : vector<2x12x12xf32>
    %cst_76 = arith.constant dense<0.000000e+00> : vector<2x12xf32>
    %316 = vector.multi_reduction <add>, %315, %cst_76 [2] : vector<2x12x12xf32> to vector<2x12xf32>
    %317 = math.log %316 : vector<2x12xf32>
    %318 = arith.addf %312, %317 : vector<2x12xf32>
    %319 = vector.shape_cast %273 : vector<2x1xi1> to vector<2x1xi1>
    %320 = vector.broadcast %319 : vector<2x1xi1> to vector<2x12xi1>
    %321 = arith.select %320, %318, %270 : vector<2x12xi1>, vector<2x12xf32>
    %c6_i32 = arith.constant 6 : i32
    %322 = arith.addi %13, %c6_i32 : i32
    %323 = vector.broadcast %322 : i32 to vector<2x1xi32>
    %324 = arith.cmpi slt, %323, %3 : vector<2x1xi32>
    %c0_77 = arith.constant 0 : index
    %325 = arith.index_cast %c6_i32 : i32 to index
    %c0_78 = arith.constant 0 : index
    %c0_79 = arith.constant 0 : index
    %326 = vector.load %arg1[%c0_77, %325, %c0_78, %c0_79] : memref<2x8x12x12xf32, #tpu.memory_space<vmem>>, vector<2x1x12x12xf32>
    %327 = vector.shape_cast %326 : vector<2x1x12x12xf32> to vector<2x12x12xf32>
    %328 = vector.broadcast %c6_i32 : i32 to vector<2x8xi32>
    %329 = arith.cmpi eq, %12, %328 : vector<2x8xi32>
    %c0_i32_80 = arith.constant 0 : i32
    %330 = vector.broadcast %c0_i32_80 : i32 to vector<2x8xi32>
    %331 = arith.select %329, %5, %330 : vector<2x8xi1>, vector<2x8xi32>
    %cst_81 = arith.constant dense<0> : vector<2xi32>
    %332 = vector.multi_reduction <add>, %331, %cst_81 [1] : vector<2x8xi32> to vector<2xi32>
    %333 = vector.shape_cast %332 : vector<2xi32> to vector<2x1xi32>
    %c0_i32_82 = arith.constant 0 : i32
    %334 = vector.broadcast %c0_i32_82 : i32 to vector<2x8xi32>
    %335 = arith.select %329, %7, %334 : vector<2x8xi1>, vector<2x8xi32>
    %cst_83 = arith.constant dense<0> : vector<2xi32>
    %336 = vector.multi_reduction <add>, %335, %cst_83 [1] : vector<2x8xi32> to vector<2xi32>
    %337 = vector.shape_cast %336 : vector<2xi32> to vector<2x1xi32>
    %338 = vector.shape_cast %333 : vector<2x1xi32> to vector<2x1x1xi32>
    %339 = vector.broadcast %9 : vector<1x12x12xi32> to vector<2x12x12xi32>
    %340 = vector.broadcast %338 : vector<2x1x1xi32> to vector<2x12x12xi32>
    %341 = arith.cmpi eq, %339, %340 : vector<2x12x12xi32>
    %342 = vector.shape_cast %337 : vector<2x1xi32> to vector<2x1x1xi32>
    %343 = vector.broadcast %11 : vector<1x12x12xi32> to vector<2x12x12xi32>
    %344 = vector.broadcast %342 : vector<2x1x1xi32> to vector<2x12x12xi32>
    %345 = arith.cmpi eq, %343, %344 : vector<2x12x12xi32>
    %346 = arith.andi %341, %345 : vector<2x12x12xi1>
    %347 = vector.shape_cast %324 : vector<2x1xi1> to vector<2x1x1xi1>
    %348 = vector.broadcast %347 : vector<2x1x1xi1> to vector<2x12x12xi1>
    %349 = arith.andi %346, %348 : vector<2x12x12xi1>
    %cst_84 = arith.constant 0.000000e+00 : f32
    %350 = vector.broadcast %cst_84 : f32 to vector<2x12x12xf32>
    %351 = arith.select %349, %327, %350 : vector<2x12x12xi1>, vector<2x12x12xf32>
    %352 = vector.shape_cast %351 : vector<2x12x12xf32> to vector<1x2x12x12xf32>
    %cst_85 = arith.constant dense<0.000000e+00> : vector<1xf32>
    %353 = vector.multi_reduction <add>, %352, %cst_85 [1, 2, 3] : vector<1x2x12x12xf32> to vector<1xf32>
    %354 = vector.shape_cast %353 : vector<1xf32> to vector<1x1x1x1xf32>
    %355 = vector.extract %354[0, 0, 0, 0] : f32 from vector<1x1x1x1xf32>
    %356 = vector.broadcast %355 : f32 to vector<1x1xf32>
    %357 = arith.addf %306, %356 : vector<1x1xf32>
    %358 = vector.shape_cast %321 : vector<2x12xf32> to vector<2x1x12xf32>
    %359 = vector.broadcast %358 : vector<2x1x12xf32> to vector<2x12x12xf32>
    %360 = arith.addf %327, %359 : vector<2x12x12xf32>
    %cst_86 = arith.constant dense<0xFF800000> : vector<2x12xf32>
    %361 = vector.multi_reduction <maximumf>, %360, %cst_86 [2] : vector<2x12x12xf32> to vector<2x12xf32>
    %362 = vector.shape_cast %361 : vector<2x12xf32> to vector<2x12x1xf32>
    %363 = vector.shape_cast %362 : vector<2x12x1xf32> to vector<2x12xf32>
    %364 = vector.broadcast %362 : vector<2x12x1xf32> to vector<2x12x12xf32>
    %365 = arith.subf %360, %364 : vector<2x12x12xf32>
    %366 = math.exp %365 : vector<2x12x12xf32>
    %cst_87 = arith.constant dense<0.000000e+00> : vector<2x12xf32>
    %367 = vector.multi_reduction <add>, %366, %cst_87 [2] : vector<2x12x12xf32> to vector<2x12xf32>
    %368 = math.log %367 : vector<2x12xf32>
    %369 = arith.addf %363, %368 : vector<2x12xf32>
    %370 = vector.shape_cast %324 : vector<2x1xi1> to vector<2x1xi1>
    %371 = vector.broadcast %370 : vector<2x1xi1> to vector<2x12xi1>
    %372 = arith.select %371, %369, %321 : vector<2x12xi1>, vector<2x12xf32>
    %c7_i32 = arith.constant 7 : i32
    %373 = arith.addi %13, %c7_i32 : i32
    %374 = vector.broadcast %373 : i32 to vector<2x1xi32>
    %375 = arith.cmpi slt, %374, %3 : vector<2x1xi32>
    %c0_88 = arith.constant 0 : index
    %376 = arith.index_cast %c7_i32 : i32 to index
    %c0_89 = arith.constant 0 : index
    %c0_90 = arith.constant 0 : index
    %377 = vector.load %arg1[%c0_88, %376, %c0_89, %c0_90] : memref<2x8x12x12xf32, #tpu.memory_space<vmem>>, vector<2x1x12x12xf32>
    %378 = vector.shape_cast %377 : vector<2x1x12x12xf32> to vector<2x12x12xf32>
    %379 = vector.broadcast %c7_i32 : i32 to vector<2x8xi32>
    %380 = arith.cmpi eq, %12, %379 : vector<2x8xi32>
    %c0_i32_91 = arith.constant 0 : i32
    %381 = vector.broadcast %c0_i32_91 : i32 to vector<2x8xi32>
    %382 = arith.select %380, %5, %381 : vector<2x8xi1>, vector<2x8xi32>
    %cst_92 = arith.constant dense<0> : vector<2xi32>
    %383 = vector.multi_reduction <add>, %382, %cst_92 [1] : vector<2x8xi32> to vector<2xi32>
    %384 = vector.shape_cast %383 : vector<2xi32> to vector<2x1xi32>
    %c0_i32_93 = arith.constant 0 : i32
    %385 = vector.broadcast %c0_i32_93 : i32 to vector<2x8xi32>
    %386 = arith.select %380, %7, %385 : vector<2x8xi1>, vector<2x8xi32>
    %cst_94 = arith.constant dense<0> : vector<2xi32>
    %387 = vector.multi_reduction <add>, %386, %cst_94 [1] : vector<2x8xi32> to vector<2xi32>
    %388 = vector.shape_cast %387 : vector<2xi32> to vector<2x1xi32>
    %389 = vector.shape_cast %384 : vector<2x1xi32> to vector<2x1x1xi32>
    %390 = vector.broadcast %9 : vector<1x12x12xi32> to vector<2x12x12xi32>
    %391 = vector.broadcast %389 : vector<2x1x1xi32> to vector<2x12x12xi32>
    %392 = arith.cmpi eq, %390, %391 : vector<2x12x12xi32>
    %393 = vector.shape_cast %388 : vector<2x1xi32> to vector<2x1x1xi32>
    %394 = vector.broadcast %11 : vector<1x12x12xi32> to vector<2x12x12xi32>
    %395 = vector.broadcast %393 : vector<2x1x1xi32> to vector<2x12x12xi32>
    %396 = arith.cmpi eq, %394, %395 : vector<2x12x12xi32>
    %397 = arith.andi %392, %396 : vector<2x12x12xi1>
    %398 = vector.shape_cast %375 : vector<2x1xi1> to vector<2x1x1xi1>
    %399 = vector.broadcast %398 : vector<2x1x1xi1> to vector<2x12x12xi1>
    %400 = arith.andi %397, %399 : vector<2x12x12xi1>
    %cst_95 = arith.constant 0.000000e+00 : f32
    %401 = vector.broadcast %cst_95 : f32 to vector<2x12x12xf32>
    %402 = arith.select %400, %378, %401 : vector<2x12x12xi1>, vector<2x12x12xf32>
    %403 = vector.shape_cast %402 : vector<2x12x12xf32> to vector<1x2x12x12xf32>
    %cst_96 = arith.constant dense<0.000000e+00> : vector<1xf32>
    %404 = vector.multi_reduction <add>, %403, %cst_96 [1, 2, 3] : vector<1x2x12x12xf32> to vector<1xf32>
    %405 = vector.shape_cast %404 : vector<1xf32> to vector<1x1x1x1xf32>
    %406 = vector.extract %405[0, 0, 0, 0] : f32 from vector<1x1x1x1xf32>
    %407 = vector.broadcast %406 : f32 to vector<1x1xf32>
    %408 = arith.addf %357, %407 : vector<1x1xf32>
    %409 = vector.shape_cast %372 : vector<2x12xf32> to vector<2x1x12xf32>
    %410 = vector.broadcast %409 : vector<2x1x12xf32> to vector<2x12x12xf32>
    %411 = arith.addf %378, %410 : vector<2x12x12xf32>
    %cst_97 = arith.constant dense<0xFF800000> : vector<2x12xf32>
    %412 = vector.multi_reduction <maximumf>, %411, %cst_97 [2] : vector<2x12x12xf32> to vector<2x12xf32>
    %413 = vector.shape_cast %412 : vector<2x12xf32> to vector<2x12x1xf32>
    %414 = vector.shape_cast %413 : vector<2x12x1xf32> to vector<2x12xf32>
    %415 = vector.broadcast %413 : vector<2x12x1xf32> to vector<2x12x12xf32>
    %416 = arith.subf %411, %415 : vector<2x12x12xf32>
    %417 = math.exp %416 : vector<2x12x12xf32>
    %cst_98 = arith.constant dense<0.000000e+00> : vector<2x12xf32>
    %418 = vector.multi_reduction <add>, %417, %cst_98 [2] : vector<2x12x12xf32> to vector<2x12xf32>
    %419 = math.log %418 : vector<2x12xf32>
    %420 = arith.addf %414, %419 : vector<2x12xf32>
    %421 = vector.shape_cast %375 : vector<2x1xi1> to vector<2x1xi1>
    %422 = vector.broadcast %421 : vector<2x1xi1> to vector<2x12xi1>
    %423 = arith.select %422, %420, %372 : vector<2x12xi1>, vector<2x12xf32>
    %c8_i32_99 = arith.constant 8 : i32
    %c0_100 = arith.constant 0 : index
    %c0_101 = arith.constant 0 : index
    %424 = vector.load %arg8[%c0_100, %c0_101] : memref<2x12xf32, #tpu.memory_space<vmem>>, vector<2x12xf32>
    tpu.vector_store %arg8[%c0_100, %c0_101], %423 {strides = array<i32>} : memref<2x12xf32, #tpu.memory_space<vmem>>, vector<2x12xf32>,
    %c0_102 = arith.constant 0 : index
    %c0_103 = arith.constant 0 : index
    %425 = vector.load %arg9[%c0_102, %c0_103] : memref<1x1xf32, #tpu.memory_space<vmem>>, vector<1x1xf32>
    %426 = arith.addf %425, %408 : vector<1x1xf32>
    %c0_104 = arith.constant 0 : index
    %c0_105 = arith.constant 0 : index
    %427 = vector.load %arg9[%c0_104, %c0_105] : memref<1x1xf32, #tpu.memory_space<vmem>>, vector<1x1xf32>
    tpu.vector_store %arg9[%c0_104, %c0_105], %426 {strides = array<i32>} : memref<1x1xf32, #tpu.memory_space<vmem>>, vector<1x1xf32>,
    %c0_i32_106 = arith.constant 0 : i32
    %428 = arith.cmpi eq, %arg0, %c0_i32_106 : i32
    %429 = arith.extui %428 : i1 to i32
    %c0_i32_107 = arith.constant 0 : i32
    %430 = arith.cmpi ne, %429, %c0_i32_107 : i32
    scf.if %430 {
      %c11 = arith.constant 11 : index
      %c0_108 = arith.constant 0 : index
      %431 = vector.load %arg2[%c11, %c0_108] : memref<12x12xf32, #tpu.memory_space<vmem>>, vector<1x12xf32>
      %432 = tpu.iota {dimensions = array<i32: 1>} : vector<2x12xi32>
      %c0_109 = arith.constant 0 : index
      %c0_110 = arith.constant 0 : index
      %433 = vector.load %arg6[%c0_109, %c0_110] : memref<2x1xi32, #tpu.memory_space<vmem>>, vector<2x1xi32>
      %434 = vector.broadcast %433 : vector<2x1xi32> to vector<2x12xi32>
      %435 = arith.cmpi eq, %432, %434 : vector<2x12xi32>
      %cst_111 = arith.constant 0.000000e+00 : f32
      %436 = vector.shape_cast %431 : vector<1x12xf32> to vector<1x12xf32>
      %437 = vector.broadcast %436 : vector<1x12xf32> to vector<2x12xf32>
      %438 = vector.broadcast %cst_111 : f32 to vector<2x12xf32>
      %439 = arith.select %435, %437, %438 : vector<2x12xi1>, vector<2x12xf32>
      %440 = vector.shape_cast %439 : vector<2x12xf32> to vector<1x2x12xf32>
      %cst_112 = arith.constant dense<0.000000e+00> : vector<1xf32>
      %441 = vector.multi_reduction <add>, %440, %cst_112 [1, 2] : vector<1x2x12xf32> to vector<1xf32>
      %442 = vector.shape_cast %441 : vector<1xf32> to vector<1x1x1xf32>
      %443 = vector.extract %442[0, 0, 0] : f32 from vector<1x1x1xf32>
      %c0_113 = arith.constant 0 : index
      %c0_114 = arith.constant 0 : index
      %444 = vector.load %arg9[%c0_113, %c0_114] : memref<1x1xf32, #tpu.memory_space<vmem>>, vector<1x1xf32>
      %445 = vector.broadcast %443 : f32 to vector<1x1xf32>
      %446 = arith.addf %444, %445 : vector<1x1xf32>
      %c0_115 = arith.constant 0 : index
      %c0_116 = arith.constant 0 : index
      %447 = vector.load %arg8[%c0_115, %c0_116] : memref<2x12xf32, #tpu.memory_space<vmem>>, vector<2x12xf32>
      %448 = vector.broadcast %431 : vector<1x12xf32> to vector<2x12xf32>
      %449 = arith.addf %447, %448 : vector<2x12xf32>
      %cst_117 = arith.constant dense<0xFF800000> : vector<2xf32>
      %450 = vector.multi_reduction <maximumf>, %449, %cst_117 [1] : vector<2x12xf32> to vector<2xf32>
      %451 = vector.shape_cast %450 : vector<2xf32> to vector<2x1xf32>
      %452 = vector.broadcast %451 : vector<2x1xf32> to vector<2x12xf32>
      %453 = arith.subf %449, %452 : vector<2x12xf32>
      %454 = math.exp %453 : vector<2x12xf32>
      %cst_118 = arith.constant dense<0.000000e+00> : vector<2xf32>
      %455 = vector.multi_reduction <add>, %454, %cst_118 [1] : vector<2x12xf32> to vector<2xf32>
      %456 = vector.shape_cast %455 : vector<2xf32> to vector<2x1xf32>
      %457 = math.log %456 : vector<2x1xf32>
      %458 = arith.addf %451, %457 : vector<2x1xf32>
      %459 = vector.shape_cast %458 : vector<2x1xf32> to vector<1x2x1xf32>
      %cst_119 = arith.constant dense<0.000000e+00> : vector<1xf32>
      %460 = vector.multi_reduction <add>, %459, %cst_119 [1, 2] : vector<1x2x1xf32> to vector<1xf32>
      %461 = vector.shape_cast %460 : vector<1xf32> to vector<1x1x1xf32>
      %462 = vector.extract %461[0, 0, 0] : f32 from vector<1x1x1xf32>
      %463 = vector.broadcast %462 : f32 to vector<1x1xf32>
      %464 = arith.subf %463, %446 : vector<1x1xf32>
      %c0_120 = arith.constant 0 : index
      %c0_121 = arith.constant 0 : index
      %465 = vector.load %arg7[%c0_120, %c0_121] : memref<1x1xf32, #tpu.memory_space<vmem>>, vector<1x1xf32>
      tpu.vector_store %arg7[%c0_120, %c0_121], %464 {strides = array<i32>} : memref<1x1xf32, #tpu.memory_space<vmem>>, vector<1x1xf32>,
    } else {
    }
    return
  }
  func.func @transform_0(%arg0: i32) -> (i32, i32, i32, i32) {
    %c0_i32 = arith.constant 0 : i32
    %c0_i32_0 = arith.constant 0 : i32
    %c0_i32_1 = arith.constant 0 : i32
    %c0_i32_2 = arith.constant 0 : i32
    return %c0_i32, %arg0, %c0_i32_0, %c0_i32_1 : i32, i32, i32, i32
  }
  func.func @transform_1(%arg0: i32) -> (i32, i32) {
    %c0_i32 = arith.constant 0 : i32
    %c0_i32_0 = arith.constant 0 : i32
    %c0_i32_1 = arith.constant 0 : i32
    return %c0_i32, %c0_i32_0 : i32, i32
  }
  func.func @transform_2(%arg0: i32) -> (i32, i32, i32) {
    %c0_i32 = arith.constant 0 : i32
    %c0_i32_0 = arith.constant 0 : i32
    %c0_i32_1 = arith.constant 0 : i32
    return %arg0, %c0_i32, %c0_i32_0 : i32, i32, i32
  }
  func.func @transform_3(%arg0: i32) -> (i32, i32, i32) {
    %c0_i32 = arith.constant 0 : i32
    %c0_i32_0 = arith.constant 0 : i32
    %c0_i32_1 = arith.constant 0 : i32
    return %arg0, %c0_i32, %c0_i32_0 : i32, i32, i32
  }
  func.func @transform_4(%arg0: i32) -> (i32, i32) {
    %c0_i32 = arith.constant 0 : i32
    %c0_i32_0 = arith.constant 0 : i32
    %c0_i32_1 = arith.constant 0 : i32
    return %c0_i32, %c0_i32_0 : i32, i32
  }
  func.func @transform_5(%arg0: i32) -> (i32, i32) {
    %c0_i32 = arith.constant 0 : i32
    %c0_i32_0 = arith.constant 0 : i32
    %c0_i32_1 = arith.constant 0 : i32
    return %c0_i32, %c0_i32_0 : i32, i32
  }
  func.func @transform_6(%arg0: i32) -> (i32, i32) {
    %c0_i32 = arith.constant 0 : i32
    %c0_i32_0 = arith.constant 0 : i32
    %c0_i32_1 = arith.constant 0 : i32
    return %c0_i32, %c0_i32_0 : i32, i32
  }
}

</mosaic_0001>

<bundles_post_ra>
// kernel: tpu_custom_call.1
= control target key start
LH: loop header
LB: loop body
LE: loop exit
PB: predicated region body
PF: predicated region fallthrough
CT: control target
= control target key end

     0   :  { %v28_v0 = vlaneseq  ;;  %v2347_v2 = vmov 1966171168   ;;  %s3491_s0 = inlined_call_operand.vmem [shape: f32[2,8,12,12], index: 0, kind: input, shape index: {}]   ;;  %s3492_s1 = inlined_call_operand.vmem [shape: f32[12,12], index: 1, kind: input, shape index: {}]   ;;  %s3493_s2 = inlined_call_operand.vmem [shape: s32[1,2,8], index: 2, kind: input, shape index: {}]   ;;  %s3494_s3 = inlined_call_operand.vmem [shape: s32[1,2,8], index: 3, kind: input, shape index: {}]   ;;  %s3495_s4 = inlined_call_operand.vmem [shape: s32[2,1], index: 4, kind: input, shape index: {}]   ;;  %s3496_s5 = inlined_call_operand.vmem [shape: s32[2,1], index: 5, kind: input, shape index: {}]   ;;  %s3497_s6 = inlined_call_operand.hbm [shape: f32[1,1], index: 6, kind: output, shape index: {}]  }
   0x1   :  { %v110_v3 = vunpack.c.l.s4 %v2347_v2 }
   0x2   :  { %v2387_v1 = vand.u32 127, %v28_v0 }
   0x3   :  { %11 = vsyncpa [#allocation5], 0  ;;  %vm3499_vm0 = vcmask 91136   ;;  %v2348_v4 = vmov -1e+30   ;;  %v2391_v6 = vshrl.u32 %v28_v0, 7  ;;  %v111_v7 = vunpack.c.0.s8 %v110_v3 }
   0x4   :  { %vm30_vm1 = vcmp.eq.s32.totalorder %v2387_v1, 10  ;;  %v48_v14 = vld [vmem:[%s3491_s0] sm:$0xff]  ;;  %v49_v15 = vld [vmem:[%s3491_s0 + $0x8] sm:$0xf]  ;;  %vm3503_vm2 = vcmask 97280   ;;  %vm3502_vm3 = vcmask 93184  }
   0x5   :  { %v31_v5 = vsel %vm30_vm1, 0.0, %v2348_v4  ;;  %v2394_v8 = vsub.s32 %v111_v7, %v2391_v6  ;;  %v2399_v10 = vsub.s32 0, %v2391_v6  ;;  %v50_v18 = vld [vmem:[%s3491_s0 + $0x80] sm:$0xff]  ;;  %v51_v19 = vld [vmem:[%s3491_s0 + $0x88] sm:$0xf]  ;;  %v2349_v29 = vmov 0  }
   0x6   :  { %33 = vst.msk [vmem:[#allocation2] sm:$0x3] %vm3499_vm0, %v31_v5  ;;  %2155 = vset.pattern.permute.xlu0 %v2349_v29  ;;  %2156 = vset.pattern.permute.xlu1 %v2349_v29  ;;  %v2432_v50 = vld [vmem:[%s3495_s4] sm:$0x3]  ;;  %v276_v57 = vadd.s32 4294967288, %v2387_v1  ;;  %v2445_v3 = vsub.s32 %v2387_v1, %v2391_v6  ;;  %vm281_vm5 = vcmask 130112  }
   0x7   :  { %vm2093_vm4 = vcmp.gt.s32.totalorder %v2432_v50, 0  ;;  %vm292_vm6 = vcmask 1041409   ;;  %vm2094_vm8 = vcmp.gt.s32.totalorder %v2432_v50, 1  ;;  %vm2099_vm10 = vcmp.gt.s32.totalorder %v2432_v50, 2  ;;  %s2351_s12 = smov [#allocation4]  }
   0x8   :  { %v2436_v51 = vsel %vm2093_vm4, 1, %v2349_v29  ;;  %v2441_v63 = vsub.s32 %v276_v57, %v2391_v6  ;;  %vm2104_vm12 = vcmp.gt.s32.totalorder %v2432_v50, 3  ;;  %vm2109_vm14 = vcmp.gt.s32.totalorder %v2432_v50, 4  ;;  %s2085_s13 = sshll.u32 %s2351_s12, 4  ;;  %s2086_s13 = int_to_ptr.vmem [resolvable:$true] %s2085_s13 }
   0x9   :  { %vm2114_vm1 = vcmp.gt.s32.totalorder %v2432_v50, 5  ;;  %vm52_vm4 = vcmp.eq.s32.totalorder %v2387_v1, 0  ;;  %s2323_s15 = scalar_lea.vmem %s2086_s13, 16  ;;  %s2327_s16 = scalar_lea.vmem %s2086_s13, 32 }
   0xa   :  { %p2324_p0 = scmp.ne.s32.totalorder %s2086_s13, %s2323_s15  ;;  %p2328_p1 = scmp.lt.s32.totalorder %s2086_s13, %s2086_s13 }
   0xb   :  { %p2329_p2 = scmp.lt.s32.totalorder %s2327_s16, %s2323_s15 }
   0xd   :  { %v2396_v9 = vld [vmem:[#allocation2] sm:$0x3]  ;;  %p2330_p3 = por %p2329_p2, %p2328_p1 }
   0xe   :  { %v186_v11 = vrot.slane %v2396_v9, %v2394_v8 }
   0xf   :  { %p2331_p4 = pnand %p2330_p3, %p2324_p0 }
  0x10   :  { %v194_v12 = vrot.slane %v186_v11, %v2394_v8  ;;  %v187_v13 = vcombine.high %v186_v11, %v186_v11 }
  0x12   :  { %v205_v16 = vrot.slane %v194_v12, %v2399_v10  ;;  %v201_v17 = vrot.slane %v187_v13, %v2394_v8 }
  0x14   :  { %v212_v20 = vadd.f32 %v205_v16, %v48_v14  ;;  %v213_v21 = vadd.f32 %v205_v16, %v49_v15  ;;  %v209_v22 = vrot.slane %v201_v17, %v2399_v10 }
  0x16   :  { %v216_v23 = vsel %vm3503_vm2, %v212_v20, -inf  ;;  %v214_v24 = vadd.f32 %v209_v22, %v50_v18  ;;  %v215_v25 = vadd.f32 %v209_v22, %v51_v19  ;;  %v219_v26 = vsel %vm3502_vm3, %v213_v21, -inf }
  0x17   :  { %217 = vmax.xlane.f32.xlu0 %v216_v23 }
  0x18   :  { %v222_v27 = vsel %vm3503_vm2, %v214_v24, -inf  ;;  %v225_v28 = vsel %vm3502_vm3, %v215_v25, -inf }
  0x19   :  { %223 = vmax.xlane.f32.xlu1 %v222_v27  ;;  %v2096_v27 = vld [vmem:[%s3491_s0 + $0x18] sm:$0xf] }
  0x1b   :  { %220 = vmax.xlane.f32.xlu0 %v219_v26 }
  0x1d   :  { %226 = vmax.xlane.f32.xlu1 %v225_v28 }
  0xa4   :  { %v218_v30 = vpop.xlane.xlu0 %217 }
  0xa5   :  { %v228_v31 = vsub.f32 %v212_v20, %v218_v30 }
  0xa6   :  { %v224_v32 = vpop.xlane.xlu1 %223 }
  0xa7   :  { %v232_v33 = vmul.f32 1.442695, %v228_v31  ;;  %v230_v34 = vsub.f32 %v214_v24, %v224_v32  ;;  %v2095_v24 = vld [vmem:[%s3491_s0 + $0x10] sm:$0xff] }
  0xa8   :  { %v221_v35 = vpop.xlane.xlu0 %220 }
  0xa9   :  { %2157 = vpow2.f32 %v232_v33  ;;  %v229_v36 = vsub.f32 %v213_v21, %v221_v35  ;;  %v236_v37 = vmul.f32 1.442695, %v230_v34 }
  0xaa   :  { %v227_v38 = vpop.xlane.xlu1 %226 }
  0xab   :  { %v234_v39 = vmul.f32 1.442695, %v229_v36  ;;  %2159 = vpow2.f32 %v236_v37  ;;  %v231_v40 = vsub.f32 %v215_v25, %v227_v38 }
  0xad   :  { %2161 = vpow2.f32 %v234_v39  ;;  %v238_v41 = vmul.f32 1.442695, %v231_v40 }
  0xaf   :  { %2163 = vpow2.f32 %v238_v41 }
  0xb3   :  { %v2158_v42 = vpop.eup %2157 }
  0xb4   :  { %v240_v43 = vsel %vm3503_vm2, %v2158_v42, 0.0 }
  0xb5   :  { %v2160_v44 = vpop.eup %2159  ;;  %241 = vadd.xlane.f32.xlu0 %v240_v43 }
  0xb6   :  { %v246_v45 = vsel %vm3503_vm2, %v2160_v44, 0.0 }
  0xb7   :  { %v2162_v46 = vpop.eup %2161 }
  0xb8   :  { %v243_v47 = vsel %vm3502_vm3, %v2162_v46, 0.0 }
  0xb9   :  { %v2164_v48 = vpop.eup %2163  ;;  %244 = vadd.xlane.f32.xlu1 %v243_v47  ;;  %247 = vadd.xlane.f32.xlu0 %v246_v45 }
  0xba   :  { %v249_v49 = vsel %vm3502_vm3, %v2164_v48, 0.0 }
  0xbd   :  { %250 = vadd.xlane.f32.xlu1 %v249_v49 }
  0xcf   :  { %265 = vperm.xlu0 %2155, %v2436_v51  }
 0x142   :  { %v242_v52 = vpop.xlane.xlu0 %241 }
 0x143   :  { %2165 = vlog2.f32 %v242_v52 }
 0x146   :  { %v248_v53 = vpop.xlane.xlu0 %247  ;;  %v245_v54 = vpop.xlane.xlu1 %244 }
 0x147   :  { %2167 = vlog2.f32 %v248_v53 }
 0x148   :  { %2169 = vlog2.f32 %v245_v54 }
 0x14a   :  { %v251_v55 = vpop.xlane.xlu1 %250 }
 0x14b   :  { %2171 = vlog2.f32 %v251_v55 }
 0x14d   :  { %v2166_v56 = vpop.eup %2165 }
 0x14e   :  { %v253_v60 = vmul.f32 0.6931472, %v2166_v56  ;;  %v266_v13 = vpop.permute.xlu0 %265 }
 0x14f   :  { %vm267_vm7 = vcmp.eq.s32.totalorder %v266_v13, 1 }
 0x150   :  { %v260_v4 = vadd.f32 %v253_v60, %v218_v30 }
 0x151   :  { %v2168_v58 = vpop.eup %2167 }
 0x152   :  { %v2170_v59 = vpop.eup %2169  ;;  %v257_v61 = vmul.f32 0.6931472, %v2168_v58  ;;  %v275_v14 = vrot.slane %v260_v4, %v2445_v3 }
 0x153   :  { %v255_v62 = vmul.f32 0.6931472, %v2170_v59 }
 0x154   :  { %v262_v5 = vadd.f32 %v257_v61, %v224_v32  ;;  %v2097_v32 = vld [vmem:[%s3491_s0 + $0x90] sm:$0xff]  ;;  %v2485_v61 = vsel %vm2094_vm8, 1, %v2349_v29  ;;  %vm3501_vm8 = vcmask 58368  }
 0x155   :  { %v2172_v0 = vpop.eup %2171  ;;  %v261_v2 = vadd.f32 %v255_v62, %v221_v35  ;;  %v2098_v35 = vld [vmem:[%s3491_s0 + $0x98] sm:$0xf] }
 0x156   :  { %v259_v7 = vmul.f32 0.6931472, %v2172_v0  ;;  %v286_v15 = vrot.slane %v262_v5, %v2445_v3 }
 0x157   :  { %v280_v11 = vrot.slane %v261_v2, %v2441_v63 }
 0x158   :  { %v263_v12 = vadd.f32 %v259_v7, %v227_v38 }
 0x159   :  { %v282_v17 = vsel %vm281_vm5, %v280_v11, %v275_v14 }
 0x15a   :  { %v290_v16 = vrot.slane %v263_v12, %v2441_v63 }
 0x15c   :  { %v291_v18 = vsel %vm281_vm5, %v290_v16, %v286_v15 }
 0x15d   :  { %v293_v19 = vsel %vm292_vm6, %v291_v18, %v282_v17 }
 0x15e   :  { %v2455_v20 = vsel %vm267_vm7, %v293_v19, %v2396_v9 }
 0x15f   :  { %v435_v21 = vrot.slane %v2455_v20, %v2394_v8 }
 0x161   :  { %v436_v22 = vcombine.high %v435_v21, %v435_v21  ;;  %v443_v23 = vrot.slane %v435_v21, %v2394_v8 }
 0x163   :  { %v454_v25 = vrot.slane %v443_v23, %v2399_v10  ;;  %v450_v26 = vrot.slane %v436_v22, %v2394_v8 }
 0x165   :  { %v461_v9 = vadd.f32 %v2095_v24, %v454_v25  ;;  %v462_v30 = vadd.f32 %v2096_v27, %v454_v25  ;;  %v458_v31 = vrot.slane %v450_v26, %v2399_v10 }
 0x167   :  { %v465_v28 = vsel %vm3503_vm2, %v461_v9, -inf  ;;  %v468_v33 = vsel %vm3502_vm3, %v462_v30, -inf  ;;  %v463_v34 = vadd.f32 %v2097_v32, %v458_v31  ;;  %v464_v37 = vadd.f32 %v2098_v35, %v458_v31  ;;  %v2100_v35 = vld [vmem:[%s3491_s0 + $0x20] sm:$0xff] }
 0x168   :  { %466 = vmax.xlane.f32.xlu1 %v465_v28 }
 0x169   :  { %v471_v36 = vsel %vm3503_vm2, %v463_v34, -inf  ;;  %v474_v38 = vsel %vm3502_vm3, %v464_v37, -inf }
 0x16c   :  { %469 = vmax.xlane.f32.xlu1 %v468_v33 }
 0x170   :  { %472 = vmax.xlane.f32.xlu1 %v471_v36 }
 0x174   :  { %475 = vmax.xlane.f32.xlu1 %v474_v38 }
 0x1f5   :  { %v467_v39 = vpop.xlane.xlu1 %466 }
 0x1f6   :  { %v477_v40 = vsub.f32 %v461_v9, %v467_v39 }
 0x1f8   :  { %v481_v41 = vmul.f32 1.442695, %v477_v40 }
 0x1f9   :  { %v470_v42 = vpop.xlane.xlu1 %469 }
 0x1fa   :  { %2173 = vpow2.f32 %v481_v41  ;;  %v478_v43 = vsub.f32 %v462_v30, %v470_v42 }
 0x1fc   :  { %v483_v44 = vmul.f32 1.442695, %v478_v43 }
 0x1fd   :  { %v473_v45 = vpop.xlane.xlu1 %472 }
 0x1fe   :  { %2175 = vpow2.f32 %v483_v44  ;;  %v479_v46 = vsub.f32 %v463_v34, %v473_v45  ;;  %v2101_v34 = vld [vmem:[%s3491_s0 + $0x28] sm:$0xf] }
 0x1ff   :  { %v2103_v44 = vld [vmem:[%s3491_s0 + $0xa8] sm:$0xf] }
 0x200   :  { %v485_v47 = vmul.f32 1.442695, %v479_v46 }
 0x201   :  { %v476_v48 = vpop.xlane.xlu1 %475 }
 0x202   :  { %2177 = vpow2.f32 %v485_v47  ;;  %v480_v49 = vsub.f32 %v464_v37, %v476_v48 }
 0x204   :  { %v2174_v52 = vpop.eup %2173  ;;  %v487_v53 = vmul.f32 1.442695, %v480_v49 }
 0x205   :  { %v489_v54 = vsel %vm3503_vm2, %v2174_v52, 0.0 }
 0x206   :  { %2179 = vpow2.f32 %v487_v53  ;;  %490 = vadd.xlane.f32.xlu1 %v489_v54 }
 0x208   :  { %v2176_v55 = vpop.eup %2175 }
 0x209   :  { %v492_v56 = vsel %vm3502_vm3, %v2176_v55, 0.0 }
 0x20a   :  { %493 = vadd.xlane.f32.xlu1 %v492_v56 }
 0x20c   :  { %v2178_v57 = vpop.eup %2177 }
 0x20d   :  { %v495_v58 = vsel %vm3503_vm2, %v2178_v57, 0.0 }
 0x20e   :  { %496 = vadd.xlane.f32.xlu1 %v495_v58 }
 0x210   :  { %v2180_v59 = vpop.eup %2179 }
 0x211   :  { %v498_v60 = vsel %vm3502_vm3, %v2180_v59, 0.0 }
 0x212   :  { %499 = vadd.xlane.f32.xlu1 %v498_v60 }
 0x223   :  { %514 = vperm.xlu1 %2156, %v2485_v61  }
 0x293   :  { %v491_v62 = vpop.xlane.xlu1 %490 }
 0x297   :  { %v494_v0 = vpop.xlane.xlu1 %493 }
 0x298   :  { %2181 = vlog2.f32 %v494_v0 }
 0x299   :  { %2183 = vlog2.f32 %v491_v62 }
 0x29b   :  { %v497_v2 = vpop.xlane.xlu1 %496 }
 0x29c   :  { %2185 = vlog2.f32 %v497_v2 }
 0x29f   :  { %v500_v4 = vpop.xlane.xlu1 %499 }
 0x2a0   :  { %2187 = vlog2.f32 %v500_v4 }
 0x2a2   :  { %v2182_v5 = vpop.eup %2181 }
 0x2a3   :  { %v2184_v7 = vpop.eup %2183  ;;  %v504_v11 = vmul.f32 0.6931472, %v2182_v5  ;;  %v515_v23 = vpop.permute.xlu1 %514 }
 0x2a4   :  { %v502_v13 = vmul.f32 0.6931472, %v2184_v7  ;;  %vm516_vm9 = vcmp.eq.s32.totalorder %v515_v23, 1 }
 0x2a5   :  { %v510_v15 = vadd.f32 %v504_v11, %v470_v42 }
 0x2a6   :  { %v2186_v12 = vpop.eup %2185  ;;  %v509_v17 = vadd.f32 %v502_v13, %v467_v39 }
 0x2a7   :  { %v506_v14 = vmul.f32 0.6931472, %v2186_v12  ;;  %v528_v21 = vrot.slane %v510_v15, %v2441_v63 }
 0x2a8   :  { %v524_v24 = vrot.slane %v509_v17, %v2445_v3 }
 0x2a9   :  { %v511_v18 = vadd.f32 %v506_v14, %v473_v45  ;;  %v2526_v14 = vsel %vm2099_vm10, 1, %v2349_v29 }
 0x2aa   :  { %v2188_v16 = vpop.eup %2187  ;;  %v529_v27 = vsel %vm281_vm5, %v528_v21, %v524_v24 }
 0x2ab   :  { %v508_v19 = vmul.f32 0.6931472, %v2188_v16  ;;  %v533_v25 = vrot.slane %v511_v18, %v2445_v3 }
 0x2ad   :  { %v512_v22 = vadd.f32 %v508_v19, %v476_v48 }
 0x2af   :  { %v537_v26 = vrot.slane %v512_v22, %v2441_v63 }
 0x2b1   :  { %v538_v9 = vsel %vm281_vm5, %v537_v26, %v533_v25 }
 0x2b2   :  { %v539_v28 = vsel %vm292_vm6, %v538_v9, %v529_v27 }
 0x2b3   :  { %v2496_v30 = vsel %vm516_vm9, %v539_v28, %v2455_v20  ;;  %v2102_v20 = vld [vmem:[%s3491_s0 + $0xa0] sm:$0xff] }
 0x2b4   :  { %v681_v31 = vrot.slane %v2496_v30, %v2394_v8 }
 0x2b6   :  { %v682_v32 = vcombine.high %v681_v31, %v681_v31  ;;  %v689_v33 = vrot.slane %v681_v31, %v2394_v8 }
 0x2b8   :  { %v700_v36 = vrot.slane %v689_v33, %v2399_v10  ;;  %v696_v37 = vrot.slane %v682_v32, %v2394_v8 }
 0x2ba   :  { %v708_v38 = vadd.f32 %v2101_v34, %v700_v36  ;;  %v707_v39 = vadd.f32 %v2100_v35, %v700_v36  ;;  %v704_v40 = vrot.slane %v696_v37, %v2399_v10 }
 0x2bc   :  { %v714_v41 = vsel %vm3502_vm3, %v708_v38, -inf  ;;  %v711_v42 = vsel %vm3503_vm2, %v707_v39, -inf  ;;  %v709_v43 = vadd.f32 %v2102_v20, %v704_v40  ;;  %v710_v46 = vadd.f32 %v2103_v44, %v704_v40  ;;  %v2105_v44 = vld [vmem:[%s3491_s0 + $0x30] sm:$0xff] }
 0x2bd   :  { %715 = vmax.xlane.f32.xlu1 %v714_v41  ;;  %712 = vmax.xlane.f32.xlu0 %v711_v42 }
 0x2be   :  { %v717_v45 = vsel %vm3503_vm2, %v709_v43, -inf  ;;  %v720_v47 = vsel %vm3502_vm3, %v710_v46, -inf }
 0x2c1   :  { %718 = vmax.xlane.f32.xlu0 %v717_v45 }
 0x2c5   :  { %721 = vmax.xlane.f32.xlu0 %v720_v47  ;;  %v2106_v47 = vld [vmem:[%s3491_s0 + $0x38] sm:$0xf] }
 0x34a   :  { %v716_v48 = vpop.xlane.xlu1 %715  ;;  %v713_v49 = vpop.xlane.xlu0 %712 }
 0x34b   :  { %v724_v52 = vsub.f32 %v708_v38, %v716_v48  ;;  %v723_v53 = vsub.f32 %v707_v39, %v713_v49 }
 0x34d   :  { %v729_v54 = vmul.f32 1.442695, %v724_v52  ;;  %v727_v55 = vmul.f32 1.442695, %v723_v53  ;;  %v2107_v53 = vld [vmem:[%s3491_s0 + $0xb0] sm:$0xff] }
 0x34e   :  { %v719_v56 = vpop.xlane.xlu0 %718 }
 0x34f   :  { %2189 = vpow2.f32 %v729_v54  ;;  %v725_v57 = vsub.f32 %v709_v43, %v719_v56 }
 0x350   :  { %2191 = vpow2.f32 %v727_v55 }
 0x351   :  { %v731_v58 = vmul.f32 1.442695, %v725_v57 }
 0x352   :  { %v722_v59 = vpop.xlane.xlu0 %721 }
 0x353   :  { %2193 = vpow2.f32 %v731_v58  ;;  %v726_v60 = vsub.f32 %v710_v46, %v722_v59 }
 0x355   :  { %v733_v62 = vmul.f32 1.442695, %v726_v60 }
 0x357   :  { %2195 = vpow2.f32 %v733_v62 }
 0x359   :  { %v2190_v0 = vpop.eup %2189 }
 0x35a   :  { %v2192_v2 = vpop.eup %2191  ;;  %v738_v4 = vsel %vm3502_vm3, %v2190_v0, 0.0 }
 0x35b   :  { %739 = vadd.xlane.f32.xlu1 %v738_v4  ;;  %v735_v5 = vsel %vm3503_vm2, %v2192_v2, 0.0 }
 0x35c   :  { %736 = vadd.xlane.f32.xlu0 %v735_v5 }
 0x35d   :  { %v2194_v7 = vpop.eup %2193 }
 0x35e   :  { %v741_v11 = vsel %vm3503_vm2, %v2194_v7, 0.0 }
 0x360   :  { %742 = vadd.xlane.f32.xlu0 %v741_v11 }
 0x361   :  { %v2196_v12 = vpop.eup %2195 }
 0x362   :  { %v744_v13 = vsel %vm3502_vm3, %v2196_v12, 0.0 }
 0x363   :  { %745 = vadd.xlane.f32.xlu1 %v744_v13 }
 0x376   :  { %760 = vperm.xlu0 %2155, %v2526_v14  }
 0x3e8   :  { %v740_v15 = vpop.xlane.xlu1 %739 }
 0x3e9   :  { %2197 = vlog2.f32 %v740_v15  ;;  %v737_v16 = vpop.xlane.xlu0 %736 }
 0x3ea   :  { %2199 = vlog2.f32 %v737_v16 }
 0x3ed   :  { %v743_v17 = vpop.xlane.xlu0 %742 }
 0x3ee   :  { %2201 = vlog2.f32 %v743_v17 }
 0x3f0   :  { %v746_v18 = vpop.xlane.xlu1 %745 }
 0x3f1   :  { %2203 = vlog2.f32 %v746_v18 }
 0x3f3   :  { %v2198_v19 = vpop.eup %2197 }
 0x3f4   :  { %v2200_v21 = vpop.eup %2199  ;;  %v750_v22 = vmul.f32 0.6931472, %v2198_v19 }
 0x3f5   :  { %v748_v23 = vmul.f32 0.6931472, %v2200_v21  ;;  %v761_v37 = vpop.permute.xlu0 %760 }
 0x3f6   :  { %v756_v26 = vadd.f32 %v750_v22, %v716_v48  ;;  %vm762_vm11 = vcmp.eq.s32.totalorder %v761_v37, 1 }
 0x3f7   :  { %v755_v27 = vadd.f32 %v748_v23, %v713_v49 }
 0x3f8   :  { %v2202_v24 = vpop.eup %2201  ;;  %v774_v32 = vrot.slane %v756_v26, %v2441_v63  ;;  %v2567_v26 = vsel %vm2104_vm12, 1, %v2349_v29 }
 0x3f9   :  { %v752_v25 = vmul.f32 0.6931472, %v2202_v24  ;;  %v770_v33 = vrot.slane %v755_v27, %v2445_v3 }
 0x3fb   :  { %v2204_v9 = vpop.eup %2203  ;;  %v757_v28 = vadd.f32 %v752_v25, %v719_v56  ;;  %v775_v20 = vsel %vm281_vm5, %v774_v32, %v770_v33  ;;  %v2108_v56 = vld [vmem:[%s3491_s0 + $0xb8] sm:$0xf] }
 0x3fc   :  { %v754_v31 = vmul.f32 0.6931472, %v2204_v9 }
 0x3fd   :  { %v779_v35 = vrot.slane %v757_v28, %v2445_v3 }
 0x3fe   :  { %v758_v34 = vadd.f32 %v754_v31, %v722_v59 }
 0x400   :  { %v783_v36 = vrot.slane %v758_v34, %v2441_v63 }
 0x402   :  { %v784_v38 = vsel %vm281_vm5, %v783_v36, %v779_v35 }
 0x403   :  { %v785_v39 = vsel %vm292_vm6, %v784_v38, %v775_v20 }
 0x404   :  { %v2537_v40 = vsel %vm762_vm11, %v785_v39, %v2496_v30  ;;  %vm304_vm11 = vcmp.eq.s32.totalorder %v2387_v1, 1 }
 0x405   :  { %v927_v41 = vrot.slane %v2537_v40, %v2394_v8 }
 0x407   :  { %v928_v42 = vcombine.high %v927_v41, %v927_v41  ;;  %v935_v43 = vrot.slane %v927_v41, %v2394_v8 }
 0x409   :  { %v946_v45 = vrot.slane %v935_v43, %v2399_v10  ;;  %v942_v46 = vrot.slane %v928_v42, %v2394_v8 }
 0x40b   :  { %v953_v30 = vadd.f32 %v2105_v44, %v946_v45  ;;  %v954_v49 = vadd.f32 %v2106_v47, %v946_v45  ;;  %v950_v52 = vrot.slane %v942_v46, %v2399_v10 }
 0x40d   :  { %v957_v48 = vsel %vm3503_vm2, %v953_v30, -inf  ;;  %v960_v54 = vsel %vm3502_vm3, %v954_v49, -inf  ;;  %v955_v55 = vadd.f32 %v2107_v53, %v950_v52  ;;  %v956_v58 = vadd.f32 %v2108_v56, %v950_v52 }
 0x40e   :  { %958 = vmax.xlane.f32.xlu1 %v957_v48 }
 0x40f   :  { %v963_v57 = vsel %vm3503_vm2, %v955_v55, -inf  ;;  %v966_v59 = vsel %vm3502_vm3, %v956_v58, -inf }
 0x412   :  { %961 = vmax.xlane.f32.xlu1 %v960_v54 }
 0x416   :  { %964 = vmax.xlane.f32.xlu1 %v963_v57  ;;  %v2111_v57 = vld [vmem:[%s3491_s0 + $0x48] sm:$0xf] }
 0x41a   :  { %967 = vmax.xlane.f32.xlu1 %v966_v59 }
 0x49b   :  { %v959_v60 = vpop.xlane.xlu1 %958 }
 0x49c   :  { %v969_v62 = vsub.f32 %v953_v30, %v959_v60 }
 0x49e   :  { %v973_v0 = vmul.f32 1.442695, %v969_v62 }
 0x49f   :  { %v962_v2 = vpop.xlane.xlu1 %961 }
 0x4a0   :  { %2205 = vpow2.f32 %v973_v0  ;;  %v970_v4 = vsub.f32 %v954_v49, %v962_v2 }
 0x4a2   :  { %v975_v5 = vmul.f32 1.442695, %v970_v4 }
 0x4a3   :  { %v965_v7 = vpop.xlane.xlu1 %964 }
 0x4a4   :  { %2207 = vpow2.f32 %v975_v5  ;;  %v971_v11 = vsub.f32 %v955_v55, %v965_v7 }
 0x4a6   :  { %v977_v12 = vmul.f32 1.442695, %v971_v11  ;;  %v2113_v11 = vld [vmem:[%s3491_s0 + $0xc8] sm:$0xf] }
 0x4a7   :  { %v968_v13 = vpop.xlane.xlu1 %967 }
 0x4a8   :  { %2209 = vpow2.f32 %v977_v12  ;;  %v972_v15 = vsub.f32 %v956_v58, %v968_v13  ;;  %v2110_v58 = vld [vmem:[%s3491_s0 + $0x40] sm:$0xff] }
 0x4aa   :  { %v2206_v16 = vpop.eup %2205  ;;  %v979_v17 = vmul.f32 1.442695, %v972_v15 }
 0x4ab   :  { %v981_v18 = vsel %vm3503_vm2, %v2206_v16, 0.0 }
 0x4ac   :  { %2211 = vpow2.f32 %v979_v17  ;;  %982 = vadd.xlane.f32.xlu1 %v981_v18 }
 0x4ae   :  { %v2208_v19 = vpop.eup %2207 }
 0x4af   :  { %v984_v21 = vsel %vm3502_vm3, %v2208_v19, 0.0 }
 0x4b0   :  { %985 = vadd.xlane.f32.xlu0 %v984_v21 }
 0x4b2   :  { %v2210_v22 = vpop.eup %2209 }
 0x4b3   :  { %v987_v23 = vsel %vm3503_vm2, %v2210_v22, 0.0 }
 0x4b4   :  { %988 = vadd.xlane.f32.xlu1 %v987_v23 }
 0x4b6   :  { %v2212_v24 = vpop.eup %2211 }
 0x4b7   :  { %v990_v25 = vsel %vm3502_vm3, %v2212_v24, 0.0 }
 0x4b8   :  { %991 = vadd.xlane.f32.xlu1 %v990_v25 }
 0x4c9   :  { %1006 = vperm.xlu1 %2156, %v2567_v26  }
 0x539   :  { %v983_v27 = vpop.xlane.xlu1 %982 }
 0x53d   :  { %v986_v9 = vpop.xlane.xlu0 %985 }
 0x53e   :  { %2213 = vlog2.f32 %v986_v9 }
 0x53f   :  { %2215 = vlog2.f32 %v983_v27 }
 0x541   :  { %v989_v28 = vpop.xlane.xlu1 %988 }
 0x542   :  { %2217 = vlog2.f32 %v989_v28 }
 0x545   :  { %v992_v31 = vpop.xlane.xlu1 %991 }
 0x546   :  { %2219 = vlog2.f32 %v992_v31 }
 0x548   :  { %v2214_v32 = vpop.eup %2213 }
 0x549   :  { %v2216_v33 = vpop.eup %2215  ;;  %v996_v34 = vmul.f32 0.6931472, %v2214_v32  ;;  %v1007_v30 = vpop.permute.xlu1 %1006 }
 0x54a   :  { %v994_v36 = vmul.f32 0.6931472, %v2216_v33  ;;  %vm1008_vm13 = vcmp.eq.s32.totalorder %v1007_v30, 1 }
 0x54b   :  { %v1002_v20 = vadd.f32 %v996_v34, %v962_v2 }
 0x54c   :  { %v2218_v35 = vpop.eup %2217  ;;  %v1001_v39 = vadd.f32 %v994_v36, %v959_v60 }
 0x54d   :  { %v998_v37 = vmul.f32 0.6931472, %v2218_v35  ;;  %v1020_v43 = vrot.slane %v1002_v20, %v2441_v63 }
 0x54e   :  { %v1016_v45 = vrot.slane %v1001_v39, %v2445_v3 }
 0x54f   :  { %v1003_v41 = vadd.f32 %v998_v37, %v965_v7 }
 0x550   :  { %v2220_v38 = vpop.eup %2219  ;;  %v1021_v48 = vsel %vm281_vm5, %v1020_v43, %v1016_v45 }
 0x551   :  { %v1000_v42 = vmul.f32 0.6931472, %v2220_v38  ;;  %v1025_v46 = vrot.slane %v1003_v41, %v2445_v3  ;;  %v2608_v38 = vsel %vm2109_vm14, 1, %v2349_v29 }
 0x553   :  { %v1004_v44 = vadd.f32 %v1000_v42, %v968_v13 }
 0x555   :  { %v1029_v47 = vrot.slane %v1004_v44, %v2441_v63 }
 0x557   :  { %v1030_v49 = vsel %vm281_vm5, %v1029_v47, %v1025_v46 }
 0x558   :  { %v1031_v52 = vsel %vm292_vm6, %v1030_v49, %v1021_v48 }
 0x559   :  { %v2578_v53 = vsel %vm1008_vm13, %v1031_v52, %v2537_v40  ;;  %v2112_v40 = vld [vmem:[%s3491_s0 + $0xc0] sm:$0xff] }
 0x55a   :  { %v1173_v54 = vrot.slane %v2578_v53, %v2394_v8 }
 0x55c   :  { %v1174_v55 = vcombine.high %v1173_v54, %v1173_v54  ;;  %v1181_v56 = vrot.slane %v1173_v54, %v2394_v8 }
 0x55e   :  { %v1192_v59 = vrot.slane %v1181_v56, %v2399_v10  ;;  %v1188_v60 = vrot.slane %v1174_v55, %v2394_v8 }
 0x560   :  { %v1200_v62 = vadd.f32 %v2111_v57, %v1192_v59  ;;  %v1199_v0 = vadd.f32 %v2110_v58, %v1192_v59  ;;  %v1196_v2 = vrot.slane %v1188_v60, %v2399_v10 }
 0x562   :  { %v1206_v4 = vsel %vm3502_vm3, %v1200_v62, -inf  ;;  %v1203_v5 = vsel %vm3503_vm2, %v1199_v0, -inf  ;;  %v1201_v7 = vadd.f32 %v2112_v40, %v1196_v2  ;;  %v1202_v13 = vadd.f32 %v2113_v11, %v1196_v2 }
 0x563   :  { %1207 = vmax.xlane.f32.xlu0 %v1206_v4  ;;  %1204 = vmax.xlane.f32.xlu1 %v1203_v5 }
 0x564   :  { %v1209_v12 = vsel %vm3503_vm2, %v1201_v7, -inf  ;;  %v1212_v15 = vsel %vm3502_vm3, %v1202_v13, -inf }
 0x567   :  { %1210 = vmax.xlane.f32.xlu0 %v1209_v12 }
 0x56b   :  { %1213 = vmax.xlane.f32.xlu0 %v1212_v15 }
 0x5f0   :  { %v1208_v16 = vpop.xlane.xlu0 %1207  ;;  %v1205_v17 = vpop.xlane.xlu1 %1204 }
 0x5f1   :  { %v1216_v18 = vsub.f32 %v1200_v62, %v1208_v16  ;;  %v1215_v19 = vsub.f32 %v1199_v0, %v1205_v17 }
 0x5f3   :  { %v1219_v21 = vmul.f32 1.442695, %v1215_v19  ;;  %v1221_v22 = vmul.f32 1.442695, %v1216_v18 }
 0x5f4   :  { %v1211_v23 = vpop.xlane.xlu0 %1210 }
 0x5f5   :  { %v1217_v24 = vsub.f32 %v1201_v7, %v1211_v23  ;;  %2221 = vpow2.f32 %v1219_v21 }
 0x5f6   :  { %2223 = vpow2.f32 %v1221_v22  ;;  %v2117_v22 = vld [vmem:[%s3491_s0 + $0xd0] sm:$0xff] }
 0x5f7   :  { %v1223_v25 = vmul.f32 1.442695, %v1217_v24 }
 0x5f8   :  { %v1214_v27 = vpop.xlane.xlu0 %1213 }
 0x5f9   :  { %v1218_v9 = vsub.f32 %v1202_v13, %v1214_v27  ;;  %2225 = vpow2.f32 %v1223_v25  ;;  %v2115_v13 = vld [vmem:[%s3491_s0 + $0x50] sm:$0xff]  ;;  %v2118_v25 = vld [vmem:[%s3491_s0 + $0xd8] sm:$0xf] }
 0x5fb   :  { %v1225_v28 = vmul.f32 1.442695, %v1218_v9 }
 0x5fd   :  { %2227 = vpow2.f32 %v1225_v28 }
 0x5ff   :  { %v2222_v31 = vpop.eup %2221 }
 0x600   :  { %v1227_v32 = vsel %vm3503_vm2, %v2222_v31, 0.0  ;;  %v2224_v33 = vpop.eup %2223 }
 0x601   :  { %1228 = vadd.xlane.f32.xlu0 %v1227_v32  ;;  %v1230_v34 = vsel %vm3502_vm3, %v2224_v33, 0.0 }
 0x603   :  { %v2226_v35 = vpop.eup %2225 }
 0x604   :  { %v1233_v36 = vsel %vm3503_vm2, %v2226_v35, 0.0 }
 0x605   :  { %1231 = vadd.xlane.f32.xlu0 %v1230_v34 }
 0x607   :  { %v2228_v37 = vpop.eup %2227 }
 0x608   :  { %v1236_v20 = vsel %vm3502_vm3, %v2228_v37, 0.0 }
 0x609   :  { %1234 = vadd.xlane.f32.xlu0 %v1233_v36 }
 0x60d   :  { %1237 = vadd.xlane.f32.xlu0 %v1236_v20 }
 0x623   :  { %1252 = vperm.xlu0 %2155, %v2608_v38  }
 0x68e   :  { %v1229_v39 = vpop.xlane.xlu0 %1228 }
 0x692   :  { %v1232_v41 = vpop.xlane.xlu0 %1231 }
 0x693   :  { %2229 = vlog2.f32 %v1232_v41 }
 0x694   :  { %2231 = vlog2.f32 %v1229_v39 }
 0x696   :  { %v1235_v42 = vpop.xlane.xlu0 %1234 }
 0x697   :  { %2233 = vlog2.f32 %v1235_v42 }
 0x69a   :  { %v1238_v43 = vpop.xlane.xlu0 %1237 }
 0x69b   :  { %2235 = vlog2.f32 %v1238_v43 }
 0x69d   :  { %v2230_v44 = vpop.eup %2229 }
 0x69e   :  { %v2232_v45 = vpop.eup %2231  ;;  %v1242_v46 = vmul.f32 0.6931472, %v2230_v44 }
 0x69f   :  { %v1240_v30 = vmul.f32 0.6931472, %v2232_v45 }
 0x6a0   :  { %v1248_v49 = vadd.f32 %v1242_v46, %v1208_v16 }
 0x6a1   :  { %v2234_v47 = vpop.eup %2233  ;;  %v1247_v54 = vadd.f32 %v1240_v30, %v1205_v17  ;;  %v2116_v17 = vld [vmem:[%s3491_s0 + $0x58] sm:$0xf] }
 0x6a2   :  { %v1244_v48 = vmul.f32 0.6931472, %v2234_v47  ;;  %v1266_v57 = vrot.slane %v1248_v49, %v2441_v63  ;;  %v1253_v62 = vpop.permute.xlu0 %1252 }
 0x6a3   :  { %v1262_v59 = vrot.slane %v1247_v54, %v2445_v3  ;;  %vm1254_vm15 = vcmp.eq.s32.totalorder %v1253_v62, 1  ;;  %v2649_v54 = vsel %vm2114_vm1, 1, %v2349_v29 }
 0x6a4   :  { %v1249_v55 = vadd.f32 %v1244_v48, %v1211_v23 }
 0x6a5   :  { %v2236_v52 = vpop.eup %2235  ;;  %v1267_v0 = vsel %vm281_vm5, %v1266_v57, %v1262_v59 }
 0x6a6   :  { %v1246_v56 = vmul.f32 0.6931472, %v2236_v52  ;;  %v1271_v60 = vrot.slane %v1249_v55, %v2445_v3 }
 0x6a8   :  { %v1250_v58 = vadd.f32 %v1246_v56, %v1214_v27 }
 0x6aa   :  { %v1275_v40 = vrot.slane %v1250_v58, %v2441_v63 }
 0x6ac   :  { %v1276_v2 = vsel %vm281_vm5, %v1275_v40, %v1271_v60 }
 0x6ad   :  { %v1277_v4 = vsel %vm292_vm6, %v1276_v2, %v1267_v0 }
 0x6ae   :  { %v2619_v5 = vsel %vm1254_vm15, %v1277_v4, %v2578_v53 }
 0x6af   :  { %v1419_v7 = vrot.slane %v2619_v5, %v2394_v8 }
 0x6b1   :  { %v1420_v11 = vcombine.high %v1419_v7, %v1419_v7  ;;  %v1427_v12 = vrot.slane %v1419_v7, %v2394_v8 }
 0x6b3   :  { %v1438_v15 = vrot.slane %v1427_v12, %v2399_v10  ;;  %v1434_v16 = vrot.slane %v1420_v11, %v2394_v8 }
 0x6b5   :  { %v1445_v53 = vadd.f32 %v2115_v13, %v1438_v15  ;;  %v1446_v19 = vadd.f32 %v2116_v17, %v1438_v15  ;;  %v1442_v21 = vrot.slane %v1434_v16, %v2399_v10 }
 0x6b7   :  { %v1449_v18 = vsel %vm3503_vm2, %v1445_v53, -inf  ;;  %v1452_v23 = vsel %vm3502_vm3, %v1446_v19, -inf  ;;  %v1447_v24 = vadd.f32 %v2117_v22, %v1442_v21  ;;  %v1448_v9 = vadd.f32 %v2118_v25, %v1442_v21 }
 0x6b8   :  { %1450 = vmax.xlane.f32.xlu1 %v1449_v18 }
 0x6b9   :  { %v1455_v27 = vsel %vm3503_vm2, %v1447_v24, -inf  ;;  %v1458_v28 = vsel %vm3502_vm3, %v1448_v9, -inf }
 0x6bc   :  { %1453 = vmax.xlane.f32.xlu1 %v1452_v23 }
 0x6c0   :  { %1456 = vmax.xlane.f32.xlu1 %v1455_v27 }
 0x6c4   :  { %1459 = vmax.xlane.f32.xlu1 %v1458_v28 }
 0x745   :  { %v1451_v31 = vpop.xlane.xlu1 %1450 }
 0x746   :  { %v1461_v32 = vsub.f32 %v1445_v53, %v1451_v31 }
 0x748   :  { %v1465_v33 = vmul.f32 1.442695, %v1461_v32 }
 0x749   :  { %v1454_v34 = vpop.xlane.xlu1 %1453 }
 0x74a   :  { %2237 = vpow2.f32 %v1465_v33  ;;  %v1462_v35 = vsub.f32 %v1446_v19, %v1454_v34  ;;  %v2659_v19 = vld [vmem:[%s3493_s2] sm:$0x3] }
 0x74b   :  { %v53_v25 = vsel %vm52_vm4, %v2659_v19, 0  ;;  %v2120_v33 = vld [vmem:[%s3491_s0 + $0x60] sm:$0xff] }
 0x74c   :  { %v1467_v36 = vmul.f32 1.442695, %v1462_v35  ;;  %v2678_v32 = vsel %vm3501_vm8, %v53_v25, 0 }
 0x74d   :  { %v1457_v37 = vpop.xlane.xlu1 %1456 }
 0x74e   :  { %2239 = vpow2.f32 %v1467_v36  ;;  %v1463_v20 = vsub.f32 %v1447_v24, %v1457_v37 }
 0x750   :  { %v1469_v39 = vmul.f32 1.442695, %v1463_v20  ;;  %v2122_v20 = vld [vmem:[%s3491_s0 + $0xe0] sm:$0xff] }
 0x751   :  { %v1460_v41 = vpop.xlane.xlu1 %1459 }
 0x752   :  { %2241 = vpow2.f32 %v1469_v39  ;;  %v1464_v42 = vsub.f32 %v1448_v9, %v1460_v41  ;;  %v2674_v9 = vld [vmem:[%s3494_s3] sm:$0x3] }
 0x754   :  { %v2238_v43 = vpop.eup %2237  ;;  %v1471_v44 = vmul.f32 1.442695, %v1464_v42 }
 0x755   :  { %v1473_v45 = vsel %vm3503_vm2, %v2238_v43, 0.0 }
 0x756   :  { %2243 = vpow2.f32 %v1471_v44  ;;  %1474 = vadd.xlane.f32.xlu1 %v1473_v45 }
 0x758   :  { %v2240_v46 = vpop.eup %2239 }
 0x759   :  { %v1476_v47 = vsel %vm3502_vm3, %v2240_v46, 0.0 }
 0x75a   :  { %1477 = vadd.xlane.f32.xlu0 %v1476_v47 }
 0x75c   :  { %v2242_v30 = vpop.eup %2241 }
 0x75d   :  { %v1479_v48 = vsel %vm3503_vm2, %v2242_v30, 0.0 }
 0x75e   :  { %1480 = vadd.xlane.f32.xlu1 %v1479_v48  ;;  %v2123_v48 = vld [vmem:[%s3491_s0 + $0xe8] sm:$0xf] }
 0x760   :  { %v2244_v49 = vpop.eup %2243 }
 0x761   :  { %v1482_v52 = vsel %vm3502_vm3, %v2244_v49, 0.0 }
 0x762   :  { %1483 = vadd.xlane.f32.xlu1 %v1482_v52 }
 0x773   :  { %1498 = vperm.xlu1 %2156, %v2649_v54  }
 0x7e3   :  { %v1475_v55 = vpop.xlane.xlu1 %1474 }
 0x7e7   :  { %v1478_v56 = vpop.xlane.xlu0 %1477 }
 0x7e8   :  { %2245 = vlog2.f32 %v1478_v56 }
 0x7e9   :  { %2247 = vlog2.f32 %v1475_v55 }
 0x7eb   :  { %v1481_v57 = vpop.xlane.xlu1 %1480 }
 0x7ec   :  { %2249 = vlog2.f32 %v1481_v57 }
 0x7ef   :  { %v1484_v58 = vpop.xlane.xlu1 %1483 }
 0x7f0   :  { %2251 = vlog2.f32 %v1484_v58 }
 0x7f2   :  { %v2246_v59 = vpop.eup %2245 }
 0x7f3   :  { %v2248_v60 = vpop.eup %2247  ;;  %v1488_v40 = vmul.f32 0.6931472, %v2246_v59  ;;  %v1499_v18 = vpop.permute.xlu1 %1498  ;;  %v2704_v59 = vrot.slane %v2436_v51, %v2394_v8 }
 0x7f4   :  { %v1486_v0 = vmul.f32 0.6931472, %v2248_v60  ;;  %vm1500_vm7 = vcmp.eq.s32.totalorder %v1499_v18, 1 }
 0x7f5   :  { %v1494_v50 = vadd.f32 %v1488_v40, %v1454_v34  ;;  %v68_v34 = vsel %vm52_vm4, %v2674_v9, 0  ;;  %v123_v60 = vrot.slane %v2704_v59, %v2394_v8 }
 0x7f6   :  { %v2250_v62 = vpop.eup %2249  ;;  %v1493_v7 = vadd.f32 %v1486_v0, %v1451_v31  ;;  %v69_v43 = vsel %vm3501_vm8, %v68_v34, 0 }
 0x7f7   :  { %v1490_v2 = vmul.f32 0.6931472, %v2250_v62  ;;  %v1512_v13 = vrot.slane %v1494_v50, %v2441_v63  ;;  %v70_v30 = vand.u32 65535, %v69_v43  ;;  %v71_v56 = vshrl.u32 %v69_v43, 16 }
 0x7f8   :  { %v1508_v16 = vrot.slane %v1493_v7, %v2445_v3  ;;  %vm131_vm9 = vcmp.ne.s32.totalorder %v123_v60, 0 }
 0x7f9   :  { %v1495_v11 = vadd.f32 %v1490_v2, %v1457_v37  ;;  %v56_v37 = vand.u32 65535, %v2678_v32  ;;  %v72_v55 = vcvt.s32.f32 %v70_v30  ;;  %v73_v58 = vcvt.s32.f32 %v71_v56 }
 0x7fa   :  { %v2252_v4 = vpop.eup %2251  ;;  %v1513_v21 = vsel %vm281_vm5, %v1512_v13, %v1508_v16  ;;  %v133_v40 = vsel %vm131_vm9, 1, %v2349_v29 }
 0x7fb   :  { %v1492_v12 = vmul.f32 0.6931472, %v2252_v4  ;;  %v1517_v17 = vrot.slane %v1495_v11, %v2445_v3  ;;  %v58_v47 = vcvt.s32.f32 %v56_v37  ;;  %v138_v62 = vrot.slane %v133_v40, %v2399_v10 }
 0x7fd   :  { %v1496_v15 = vadd.f32 %v1492_v12, %v1460_v41 }
 0x7ff   :  { %v1521_v53 = vrot.slane %v1496_v15, %v2441_v63 }
 0x801   :  { %v1522_v22 = vsel %vm281_vm5, %v1521_v53, %v1517_v17 }
 0x802   :  { %v1523_v23 = vsel %vm292_vm6, %v1522_v22, %v1513_v21 }
 0x803   :  { %v2666_v24 = vsel %vm1500_vm7, %v1523_v23, %v2619_v5  ;;  %v2121_v5 = vld [vmem:[%s3491_s0 + $0x68] sm:$0xf] }
 0x804   :  { %v1665_v27 = vrot.slane %v2666_v24, %v2394_v8 }
 0x806   :  { %v1666_v28 = vcombine.high %v1665_v27, %v1665_v27  ;;  %v1673_v31 = vrot.slane %v1665_v27, %v2394_v8 }
 0x808   :  { %v1684_v35 = vrot.slane %v1673_v31, %v2399_v10  ;;  %v1680_v36 = vrot.slane %v1666_v28, %v2394_v8  ;;  %v2717_v31 = vld [vmem:[%s3495_s4] sm:$0x3] }
 0x809   :  { %vm2119_vm10 = vcmp.gt.s32.totalorder %v2717_v31, 6 }
 0x80a   :  { %v1692_v39 = vadd.f32 %v2121_v5, %v1684_v35  ;;  %v1691_v41 = vadd.f32 %v2120_v33, %v1684_v35  ;;  %v1688_v42 = vrot.slane %v1680_v36, %v2399_v10  ;;  %v2721_v5 = vsel %vm2119_vm10, 1, %v2349_v29 }
 0x80b   :  { %v57_v33 = vshrl.u32 %v2678_v32, 16  ;;  %v305_v35 = vsel %vm304_vm11, %v2659_v19, 0 }
 0x80c   :  { %v1698_v44 = vsel %vm3502_vm3, %v1692_v39, -inf  ;;  %v1695_v45 = vsel %vm3503_vm2, %v1691_v41, -inf  ;;  %v1693_v46 = vadd.f32 %v2122_v20, %v1688_v42  ;;  %v1694_v52 = vadd.f32 %v2123_v48, %v1688_v42 }
 0x80d   :  { %1699 = vmax.xlane.f32.xlu0 %v1698_v44  ;;  %1696 = vmax.xlane.f32.xlu1 %v1695_v45  ;;  %v59_v34 = vcvt.s32.f32 %v57_v33  ;;  %v306_v36 = vsel %vm3501_vm8, %v305_v35, 0 }
 0x80e   :  { %v1701_v49 = vsel %vm3503_vm2, %v1693_v46, -inf  ;;  %v1704_v57 = vsel %vm3502_vm3, %v1694_v52, -inf  ;;  %v307_v37 = vand.u32 65535, %v306_v36 }
 0x810   :  { %v309_v20 = vcvt.s32.f32 %v307_v37  ;;  %v308_v37 = vshrl.u32 %v306_v36, 16 }
 0x811   :  { %60 = vadd.xlane.f32.xlu1 %v58_v47  ;;  %1702 = vmax.xlane.f32.xlu0 %v1701_v49 }
 0x815   :  { %74 = vadd.xlane.f32.xlu1 %v72_v55  ;;  %1705 = vmax.xlane.f32.xlu0 %v1704_v57 }
 0x819   :  { %76 = vadd.xlane.f32.xlu1 %v73_v58 }
 0x82a   :  { %144 = vperm.xlu1 %2156, %v138_v62  }
 0x89a   :  { %v1700_v0 = vpop.xlane.xlu0 %1699  ;;  %v1697_v2 = vpop.xlane.xlu1 %1696 }
 0x89b   :  { %v1708_v50 = vsub.f32 %v1692_v39, %v1700_v0  ;;  %v1707_v4 = vsub.f32 %v1691_v41, %v1697_v2 }
 0x89d   :  { %v1711_v7 = vmul.f32 1.442695, %v1707_v4  ;;  %v1713_v11 = vmul.f32 1.442695, %v1708_v50 }
 0x89e   :  { %v1703_v12 = vpop.xlane.xlu0 %1702  ;;  %v61_v36 = vpop.xlane.xlu1 %60 }
 0x89f   :  { %v1709_v13 = vsub.f32 %v1693_v46, %v1703_v12  ;;  %2253 = vpow2.f32 %v1711_v7 }
 0x8a0   :  { %2255 = vpow2.f32 %v1713_v11 }
 0x8a1   :  { %v1715_v51 = vmul.f32 1.442695, %v1709_v13 }
 0x8a2   :  { %v1706_v15 = vpop.xlane.xlu0 %1705 }
 0x8a3   :  { %v1710_v16 = vsub.f32 %v1694_v52, %v1706_v15  ;;  %2257 = vpow2.f32 %v1715_v51  ;;  %v2125_v51 = vld [vmem:[%s3491_s0 + $0x70] sm:$0xff] }
 0x8a5   :  { %v1717_v17 = vmul.f32 1.442695, %v1710_v16 }
 0x8a7   :  { %2259 = vpow2.f32 %v1717_v17  ;;  %v2126_v17 = vld [vmem:[%s3491_s0 + $0x78] sm:$0xf] }
 0x8a9   :  { %v2254_v53 = vpop.eup %2253 }
 0x8aa   :  { %v1719_v18 = vsel %vm3503_vm2, %v2254_v53, 0.0  ;;  %v2256_v21 = vpop.eup %2255 }
 0x8ab   :  { %1720 = vadd.xlane.f32.xlu0 %v1719_v18  ;;  %v1722_v22 = vsel %vm3502_vm3, %v2256_v21, 0.0 }
 0x8ad   :  { %v2258_v23 = vpop.eup %2257 }
 0x8ae   :  { %v1725_v25 = vsel %vm3503_vm2, %v2258_v23, 0.0 }
 0x8af   :  { %1723 = vadd.xlane.f32.xlu0 %v1722_v22  ;;  %v2127_v22 = vld [vmem:[%s3491_s0 + $0xf0] sm:$0xff] }
 0x8b1   :  { %v2260_v27 = vpop.eup %2259 }
 0x8b2   :  { %v1728_v28 = vsel %vm3502_vm3, %v2260_v27, 0.0  ;;  %v2128_v27 = vld [vmem:[%s3491_s0 + $0xf8] sm:$0xf] }
 0x8b3   :  { %1726 = vadd.xlane.f32.xlu0 %v1725_v25 }
 0x8b7   :  { %1729 = vadd.xlane.f32.xlu0 %v1728_v28 }
 0x8cd   :  { %1744 = vperm.xlu0 %2155, %v2721_v5  }
 0x8ec   :  { %62 = vadd.xlane.f32.xlu0 %v59_v34  ;;  %v116_v34 = vcombine.high %v2704_v59, %v2704_v59 }
 0x8f0   :  { %311 = vadd.xlane.f32.xlu0 %v309_v20  ;;  %v130_v20 = vrot.slane %v116_v34, %v2394_v8  ;;  %v2291_v34 = vld [vmem:[%s3491_s0 + $0x8] sm:$0xf] }
 0x8f2   :  { %vm132_vm13 = vcmp.ne.s32.totalorder %v130_v20, 0 }
 0x938   :  { %v1721_v39 = vpop.xlane.xlu0 %1720 }
 0x93c   :  { %v1724_v41 = vpop.xlane.xlu0 %1723 }
 0x93d   :  { %2261 = vlog2.f32 %v1724_v41  ;;  %v319_v41 = vsel %vm304_vm11, %v2674_v9, 0 }
 0x93e   :  { %2263 = vlog2.f32 %v1721_v39  ;;  %v310_v39 = vcvt.s32.f32 %v308_v37 }
 0x940   :  { %v1727_v42 = vpop.xlane.xlu0 %1726  ;;  %313 = vadd.xlane.f32.xlu0 %v310_v39 }
 0x941   :  { %2265 = vlog2.f32 %v1727_v42  ;;  %v134_v42 = vsel %vm132_vm13, 1, %v2349_v29 }
 0x944   :  { %v1730_v32 = vpop.xlane.xlu0 %1729 }
 0x945   :  { %2267 = vlog2.f32 %v1730_v32  ;;  %v2773_v32 = vsel %vm3501_vm8, %v319_v41, 0 }
 0x946   :  { %v321_v59 = vand.u32 65535, %v2773_v32 }
 0x947   :  { %v2262_v43 = vpop.eup %2261 }
 0x948   :  { %v2264_v44 = vpop.eup %2263  ;;  %v1734_v45 = vmul.f32 0.6931472, %v2262_v43  ;;  %v142_v43 = vrot.slane %v134_v42, %v2399_v10 }
 0x949   :  { %v1732_v47 = vmul.f32 0.6931472, %v2264_v44  ;;  %v323_v44 = vcvt.s32.f32 %v321_v59 }
 0x94a   :  { %v1740_v48 = vadd.f32 %v1734_v45, %v1700_v0  ;;  %v75_v45 = vpop.xlane.xlu1 %74 }
 0x94b   :  { %v2266_v46 = vpop.eup %2265  ;;  %v1739_v52 = vadd.f32 %v1732_v47, %v1697_v2  ;;  %325 = vadd.xlane.f32.xlu0 %v323_v44 }
 0x94c   :  { %v1736_v30 = vmul.f32 0.6931472, %v2266_v46  ;;  %v1758_v57 = vrot.slane %v1740_v48, %v2441_v63  ;;  %v1745_v50 = vpop.permute.xlu0 %1744 }
 0x94d   :  { %v1754_v60 = vrot.slane %v1739_v52, %v2445_v3  ;;  %vm1746_vm12 = vcmp.eq.s32.totalorder %v1745_v50, 1  ;;  %v78_v52 = vcvt.f32.s32 %v75_v45  ;;  %v2780_v50 = vadd.s32 8, %v2391_v6  ;;  %v2293_v45 = vld [vmem:[%s3491_s0 + $0x88] sm:$0xf] }
 0x94e   :  { %v1741_v55 = vadd.f32 %v1736_v30, %v1703_v12  ;;  %v77_v47 = vpop.xlane.xlu1 %76 }
 0x94f   :  { %v2268_v49 = vpop.eup %2267  ;;  %v1759_v4 = vsel %vm281_vm5, %v1758_v57, %v1754_v60  ;;  %v79_v30 = vcvt.f32.s32 %v77_v47 }
 0x950   :  { %v1738_v56 = vmul.f32 0.6931472, %v2268_v49  ;;  %v1763_v40 = vrot.slane %v1741_v55, %v2445_v3  ;;  %v64_v49 = vcvt.f32.s32 %v61_v36 }
 0x951   :  { %v80_v55 = vshll.u32 %v79_v30, 16 }
 0x952   :  { %v1742_v58 = vadd.f32 %v1738_v56, %v1706_v15  ;;  %v145_v60 = vpop.permute.xlu1 %144 }
 0x953   :  { %v81_v57 = vadd.s32 %v80_v55, %v78_v52  ;;  %vm149_vm9 = vcmp.eq.s32.totalorder %v145_v60, 1 }
 0x954   :  { %v1767_v62 = vrot.slane %v1742_v58, %v2441_v63 }
 0x956   :  { %v1768_v7 = vsel %vm281_vm5, %v1767_v62, %v1763_v40  ;;  %v97_v40 = vrot.slane %v81_v57, %v2399_v10 }
 0x957   :  { %v1769_v0 = vsel %vm292_vm6, %v1768_v7, %v1759_v4 }
 0x958   :  { %v2738_v2 = vsel %vm1746_vm12, %v1769_v0, %v2666_v24  ;;  %vm102_vm14 = vcmp.eq.s32.totalorder %v2387_v1, %v97_v40  ;;  %v366_v40 = vrot.slane %v2485_v61, %v2394_v8 }
 0x959   :  { %v1911_v11 = vrot.slane %v2738_v2, %v2394_v8 }
 0x95b   :  { %v1912_v12 = vcombine.high %v1911_v11, %v1911_v11  ;;  %v1919_v13 = vrot.slane %v1911_v11, %v2394_v8  ;;  %v2788_v11 = vsub.s32 1, %v2391_v6 }
 0x95d   :  { %v1930_v15 = vrot.slane %v1919_v13, %v2399_v10  ;;  %v1926_v16 = vrot.slane %v1912_v12, %v2394_v8 }
 0x95f   :  { %v1937_v24 = vadd.f32 %v2125_v51, %v1930_v15  ;;  %v1938_v18 = vadd.f32 %v2126_v17, %v1930_v15  ;;  %v1934_v21 = vrot.slane %v1926_v16, %v2399_v10  ;;  %v101_v15 = vrot.slane %v81_v57, %v2788_v11 }
 0x961   :  { %v1941_v53 = vsel %vm3503_vm2, %v1937_v24, -inf  ;;  %v1944_v23 = vsel %vm3502_vm3, %v1938_v18, -inf  ;;  %v1939_v25 = vadd.f32 %v2127_v22, %v1934_v21  ;;  %v2761_v33 = vadd.f32 %v2128_v27, %v1934_v21  ;;  %v2290_v27 = vld [vmem:[%s3491_s0] sm:$0xff] }
 0x962   :  { %1942 = vmax.xlane.f32.xlu1 %v1941_v53  ;;  %vm2810_vm12 = vcmp.eq.s32.totalorder %v2387_v1, %v101_v15 }
 0x963   :  { %v1947_v28 = vsel %vm3503_vm2, %v1939_v25, -inf  ;;  %v1950_v35 = vsel %vm3502_vm3, %v2761_v33, -inf }
 0x966   :  { %1945 = vmax.xlane.f32.xlu1 %v1944_v23 }
 0x96a   :  { %1948 = vmax.xlane.f32.xlu1 %v1947_v28 }
 0x96e   :  { %1951 = vmax.xlane.f32.xlu1 %v1950_v35 }
 0x979   :  { %v63_v46 = vpop.xlane.xlu0 %62 }
 0x97a   :  { %v65_v48 = vcvt.f32.s32 %v63_v46 }
 0x97c   :  { %v66_v56 = vshll.u32 %v65_v48, 16 }
 0x97e   :  { %v67_v58 = vadd.s32 %v66_v56, %v64_v49  ;;  %v322_v49 = vshrl.u32 %v2773_v32, 16  ;;  %v367_v32 = vcombine.high %v366_v40, %v366_v40 }
 0x97f   :  { %147 = vperm.xlu1 %2156, %v142_v43   ;;  %v2292_v43 = vld [vmem:[%s3491_s0 + $0x80] sm:$0xff] }
 0x980   :  { %v85_v62 = vrot.slane %v67_v58, %v2399_v10  ;;  %v89_v16 = vrot.slane %v67_v58, %v2788_v11  ;;  %v324_v58 = vcvt.s32.f32 %v322_v49 }
 0x982   :  { %vm90_vm15 = vcmp.eq.s32.totalorder %v2391_v6, %v85_v62  ;;  %vm91_vm1 = vcmp.eq.s32.totalorder %v2780_v50, %v85_v62  ;;  %vm92_vm13 = vcmp.eq.s32.totalorder %v2391_v6, %v89_v16 }
 0x983   :  { %vm104_vm4 = vmand %vm90_vm15, %vm102_vm14 }
 0x984   :  { %vm105_vm7 = vmand %vm91_vm1, %vm102_vm14  ;;  %vm93_vm14 = vcmp.eq.s32.totalorder %v2780_v50, %v89_v16 }
 0x985   :  { %vm2799_vm10 = vmand %vm104_vm4, %vm149_vm9 }
 0x986   :  { %vm2803_vm11 = vmand %vm105_vm7, %vm149_vm9  ;;  %v155_v28 = vsel %vm2799_vm10, %v2290_v27, 0.0 }
 0x987   :  { %v156_v35 = vsel %vm2803_vm11, %v2291_v34, 0.0  ;;  %vm106_vm15 = vmand %vm92_vm13, %vm2810_vm12  ;;  %v160_v41 = vsel %vm3503_vm2, %v155_v28, 0.0  ;;  %vm2124_vm11 = vcmp.gt.s32.totalorder %v2717_v31, 7  ;;  %vm550_vm13 = vcmp.eq.s32.totalorder %v2387_v1, 2  ;;  %v312_v28 = vpop.xlane.xlu0 %311 }
 0x988   :  { %v162_v42 = vsel %vm3502_vm3, %v156_v35, 0.0  ;;  %vm107_vm1 = vmand %vm93_vm14, %vm2810_vm12  ;;  %v2855_v61 = vsel %vm2124_vm11, 1, %v2349_v29 }
 0x989   :  { %v163_v36 = vadd.f32 %v162_v42, %v160_v41  ;;  %v315_v41 = vcvt.f32.s32 %v312_v28 }
 0x9cd   :  { %v314_v34 = vpop.xlane.xlu0 %313 }
 0x9d8   :  { %v326_v35 = vpop.xlane.xlu0 %325 }
 0x9ef   :  { %v2782_v4 = vpop.xlane.xlu1 %1942 }
 0x9f0   :  { %v1953_v7 = vsub.f32 %v1937_v24, %v2782_v4 }
 0x9f2   :  { %v1957_v0 = vmul.f32 1.442695, %v1953_v7  ;;  %v374_v7 = vrot.slane %v366_v40, %v2394_v8 }
 0x9f3   :  { %v2791_v12 = vpop.xlane.xlu1 %1945 }
 0x9f4   :  { %2269 = vpow2.f32 %v1957_v0  ;;  %v1954_v13 = vsub.f32 %v1938_v18, %v2791_v12  ;;  %vm382_vm10 = vcmp.ne.s32.totalorder %v374_v7, 0 }
 0x9f5   :  { %v384_v0 = vsel %vm382_vm10, 1, %v2349_v29 }
 0x9f6   :  { %v1959_v51 = vmul.f32 1.442695, %v1954_v13  ;;  %v381_v13 = vrot.slane %v367_v32, %v2394_v8 }
 0x9f7   :  { %v2796_v17 = vpop.xlane.xlu1 %1948 }
 0x9f8   :  { %2271 = vpow2.f32 %v1959_v51  ;;  %v1955_v24 = vsub.f32 %v1939_v25, %v2796_v17  ;;  %v389_v51 = vrot.slane %v384_v0, %v2399_v10  ;;  %vm383_vm12 = vcmp.ne.s32.totalorder %v381_v13, 0 }
 0x9f9   :  { %v385_v15 = vsel %vm383_vm12, 1, %v2349_v29 }
 0x9fa   :  { %v1961_v18 = vmul.f32 1.442695, %v1955_v24  ;;  %v393_v16 = vrot.slane %v385_v15, %v2399_v10  ;;  %v565_v24 = vsel %vm550_vm13, %v2674_v9, 0 }
 0x9fb   :  { %v2807_v22 = vpop.xlane.xlu1 %1951  ;;  %v2865_v31 = vsel %vm3501_vm8, %v565_v24, 0 }
 0x9fc   :  { %2273 = vpow2.f32 %v1961_v18  ;;  %v1956_v25 = vsub.f32 %v2761_v33, %v2807_v22  ;;  %v567_v53 = vand.u32 65535, %v2865_v31  ;;  %v2870_v18 = vrot.slane %v2526_v14, %v2394_v8 }
 0x9fe   :  { %v2270_v37 = vpop.eup %2269  ;;  %v1963_v20 = vmul.f32 1.442695, %v1956_v25  ;;  %v569_v21 = vcvt.s32.f32 %v567_v53  ;;  %v620_v23 = vrot.slane %v2870_v18, %v2394_v8 }
 0x9ff   :  { %v148_v39 = vpop.permute.xlu1 %147  ;;  %v1965_v33 = vsel %vm3503_vm2, %v2270_v37, 0.0 }
 0xa00   :  { %2275 = vpow2.f32 %v1963_v20  ;;  %vm150_vm4 = vcmp.eq.s32.totalorder %v148_v39, 1  ;;  %1966 = vadd.xlane.f32.xlu0 %v1965_v33  ;;  %vm628_vm14 = vcmp.ne.s32.totalorder %v620_v23, 0  ;;  %v316_v39 = vcvt.f32.s32 %v314_v34  ;;  %v2294_v34 = vld [vmem:[%s3491_s0 + $0x10] sm:$0xff] }
 0xa01   :  { %vm153_vm7 = vmand %vm106_vm15, %vm150_vm4  ;;  %v630_v25 = vsel %vm628_vm14, 1, %v2349_v29 }
 0xa02   :  { %v2272_v59 = vpop.eup %2271  ;;  %vm154_vm9 = vmand %vm107_vm1, %vm150_vm4  ;;  %v157_v44 = vsel %vm153_vm7, %v2292_v43, 0.0  ;;  %v635_v27 = vrot.slane %v630_v25, %v2399_v10  ;;  %v317_v42 = vshll.u32 %v316_v39, 16 }
 0xa03   :  { %v158_v46 = vsel %vm154_vm9, %v2293_v45, 0.0  ;;  %v164_v47 = vsel %vm3503_vm2, %v157_v44, 0.0  ;;  %v1968_v30 = vsel %vm3502_vm3, %v2272_v59, 0.0 }
 0xa04   :  { %1969 = vadd.xlane.f32.xlu0 %v1968_v30  ;;  %v165_v48 = vadd.f32 %v164_v47, %v163_v36  ;;  %v166_v52 = vsel %vm3502_vm3, %v158_v46, 0.0  ;;  %v318_v45 = vadd.s32 %v317_v42, %v315_v41 }
 0xa06   :  { %v2274_v55 = vpop.eup %2273  ;;  %v167_v56 = vadd.f32 %v166_v52, %v165_v48  ;;  %v329_v48 = vcvt.f32.s32 %v326_v35 }
 0xa07   :  { %v1971_v57 = vsel %vm3503_vm2, %v2274_v55, 0.0 }
 0xa08   :  { %1972 = vadd.xlane.f32.xlu0 %v1971_v57  ;;  %168 = vadd.xlane.f32.xlu1 %v167_v56  ;;  %v336_v56 = vrot.slane %v318_v45, %v2399_v10 }
 0xa0a   :  { %v2276_v60 = vpop.eup %2275  ;;  %vm341_vm15 = vcmp.eq.s32.totalorder %v2391_v6, %v336_v56  ;;  %vm342_vm4 = vcmp.eq.s32.totalorder %v2780_v50, %v336_v56 }
 0xa0b   :  { %v1974_v62 = vsel %vm3502_vm3, %v2276_v60, 0.0 }
 0xa0c   :  { %1975 = vadd.xlane.f32.xlu0 %v1974_v62  ;;  %327 = vadd.xlane.f32.xlu1 %v324_v58 }
 0xa1d   :  { %395 = vperm.xlu1 %2156, %v389_v51  }
 0xa22   :  { %1990 = vperm.xlu0 %2155, %v2855_v61  }
 0xa26   :  { %398 = vperm.xlu0 %2155, %v393_v16   ;;  %v340_v16 = vrot.slane %v318_v45, %v2788_v11 }
 0xa41   :  { %571 = vadd.xlane.f32.xlu1 %v569_v21 }
 0xa52   :  { %641 = vperm.xlu1 %2156, %v635_v27  }
 0xa8d   :  { %v1967_v37 = vpop.xlane.xlu0 %1966 }
 0xa91   :  { %v1970_v20 = vpop.xlane.xlu0 %1969 }
 0xa92   :  { %2277 = vlog2.f32 %v1970_v20 }
 0xa93   :  { %2279 = vlog2.f32 %v1967_v37  ;;  %v2295_v37 = vld [vmem:[%s3491_s0 + $0x18] sm:$0xf] }
 0xa95   :  { %v169_v14 = vpop.xlane.xlu1 %168  ;;  %v1973_v33 = vpop.xlane.xlu0 %1972 }
 0xa96   :  { %v170_v59 = vrot.slane %v169_v14, 4  ;;  %2281 = vlog2.f32 %v1973_v33 }
 0xa98   :  { %v171_v43 = vadd.f32 %v170_v59, %v169_v14 }
 0xa99   :  { %v328_v44 = vpop.xlane.xlu1 %327  ;;  %v1976_v36 = vpop.xlane.xlu0 %1975 }
 0xa9a   :  { %v172_v46 = vrot.slane %v171_v43, 2  ;;  %v330_v47 = vcvt.f32.s32 %v328_v44  ;;  %2283 = vlog2.f32 %v1976_v36 }
 0xa9c   :  { %v2278_v30 = vpop.eup %2277  ;;  %v331_v49 = vshll.u32 %v330_v47, 16  ;;  %v173_v52 = vadd.f32 %v172_v46, %v171_v43  ;;  %v2296_v43 = vld [vmem:[%s3491_s0 + $0x90] sm:$0xff] }
 0xa9d   :  { %v2280_v55 = vpop.eup %2279  ;;  %v1980_v60 = vmul.f32 0.6931472, %v2278_v30  ;;  %v396_v51 = vpop.permute.xlu1 %395 }
 0xa9e   :  { %v332_v57 = vadd.s32 %v331_v49, %v329_v48  ;;  %v174_v58 = vrot.slane %v173_v52, 1  ;;  %v1978_v0 = vmul.f32 0.6931472, %v2280_v55  ;;  %vm400_vm10 = vcmp.eq.s32.totalorder %v396_v51, 1 }
 0xa9f   :  { %v1986_v24 = vadd.f32 %v1980_v60, %v2791_v12  ;;  %v551_v12 = vsel %vm550_vm13, %v2659_v19, 0  ;;  %v568_v60 = vshrl.u32 %v2865_v31, 16 }
 0xaa0   :  { %v2282_v40 = vpop.eup %2281  ;;  %v348_v62 = vrot.slane %v332_v57, %v2399_v10  ;;  %v352_v7 = vrot.slane %v332_v57, %v2788_v11  ;;  %v175_v32 = vadd.f32 %v174_v58, %v173_v52  ;;  %v1985_v23 = vadd.f32 %v1978_v0, %v2782_v4 }
 0xaa1   :  { %v1982_v13 = vmul.f32 0.6931472, %v2282_v40  ;;  %v1991_v15 = vpop.permute.xlu0 %1990  ;;  %v2004_v4 = vrot.slane %v1986_v24, %v2441_v63  ;;  %v552_v33 = vsel %vm3501_vm8, %v551_v12, 0  ;;  %v570_v40 = vcvt.s32.f32 %v568_v60 }
 0xaa2   :  { %vm353_vm1 = vcmp.eq.s32.totalorder %v2387_v1, %v348_v62  ;;  %2130 = vpush %v175_v32  ;;  %vm2885_vm11 = vcmp.eq.s32.totalorder %v2387_v1, %v352_v7  ;;  %v2000_v41 = vrot.slane %v1985_v23, %v2445_v3  ;;  %v553_v48 = vand.u32 65535, %v552_v33 }
 0xaa3   :  { %vm355_vm7 = vmand %vm341_vm15, %vm353_vm1  ;;  %v1987_v25 = vadd.f32 %v1982_v13, %v2796_v17  ;;  %vm343_vm15 = vcmp.eq.s32.totalorder %v2391_v6, %v340_v16  ;;  %v554_v57 = vshrl.u32 %v552_v33, 16  ;;  %v613_v62 = vcombine.high %v2870_v18, %v2870_v18 }
 0xaa4   :  { %v2284_v53 = vpop.eup %2283  ;;  %vm356_vm9 = vmand %vm342_vm4, %vm353_vm1  ;;  %vm344_vm1 = vcmp.eq.s32.totalorder %v2780_v50, %v340_v16  ;;  %v2005_v36 = vsel %vm281_vm5, %v2004_v4, %v2000_v41  ;;  %v555_v56 = vcvt.s32.f32 %v553_v48  ;;  %v2975_v33 = vrot.slane %v2721_v5, %v2394_v8 }
 0xaa5   :  { %v1984_v27 = vmul.f32 0.6931472, %v2284_v53  ;;  %vm402_vm12 = vmand %vm355_vm7, %vm400_vm10  ;;  %v399_v28 = vpop.permute.xlu0 %398  ;;  %v556_v58 = vcvt.s32.f32 %v554_v57 }
 0xaa6   :  { %vm403_vm14 = vmand %vm356_vm9, %vm400_vm10  ;;  %v406_v35 = vsel %vm402_vm12, %v2294_v34, 0.0  ;;  %vm401_vm4 = vcmp.eq.s32.totalorder %v399_v28, 1  ;;  %vm3500_vm12 = vcmp.eq.s32.totalorder %v2387_v1, 5 }
 0xaa7   :  { %v1988_v17 = vadd.f32 %v1984_v27, %v2807_v22  ;;  %v407_v20 = vsel %vm403_vm14, %v2295_v37, 0.0  ;;  %v410_v39 = vsel %vm3503_vm2, %v406_v35, 0.0  ;;  %vm357_vm13 = vmand %vm343_vm15, %vm2885_vm11  ;;  %v2009_v22 = vrot.slane %v1987_v25, %v2445_v3  ;;  %v2297_v3 = vld [vmem:[%s3491_s0 + $0x98] sm:$0xf] }
 0xaa8   :  { %v411_v14 = vsel %vm3502_vm3, %v407_v20, 0.0  ;;  %vm358_vm7 = vmand %vm344_vm1, %vm2885_vm11  ;;  %vm1992_vm11 = vcmp.eq.s32.totalorder %v1991_v15, 1  ;;  %v1303_v15 = vsel %vm3500_vm12, %v2674_v9, 0  ;;  %vm3498_vm14 = vcmp.eq.s32.totalorder %v2387_v1, 7 }
 0xaa9   :  { %v2013_v42 = vrot.slane %v1988_v17, %v2441_v63  ;;  %v412_v59 = vadd.f32 %v411_v14, %v410_v39  ;;  %vm404_vm9 = vmand %vm357_vm13, %vm401_vm4  ;;  %v2952_v53 = vsel %vm3501_vm8, %v1303_v15, 0  ;;  %v1781_v21 = vsel %vm3498_vm14, %v2659_v19, 0 }
 0xaaa   :  { %vm405_vm10 = vmand %vm358_vm7, %vm401_vm4  ;;  %v408_v44 = vsel %vm404_vm9, %v2296_v43, 0.0  ;;  %v1306_v25 = vshrl.u32 %v2952_v53, 16  ;;  %v2959_v27 = vsel %vm3501_vm8, %v1781_v21, 0  ;;  %v858_v35 = vrot.slane %v2567_v26, %v2394_v8 }
 0xaab   :  { %v2014_v45 = vsel %vm281_vm5, %v2013_v42, %v2009_v22  ;;  %v409_v46 = vsel %vm405_vm10, %v2297_v3, 0.0  ;;  %v413_v63 = vsel %vm3503_vm2, %v408_v44, 0.0  ;;  %v1783_v12 = vand.u32 65535, %v2959_v27 }
 0xaac   :  { %v2015_v47 = vsel %vm292_vm6, %v2014_v45, %v2005_v36  ;;  %v414_v30 = vadd.f32 %v413_v63, %v412_v59  ;;  %v415_v52 = vsel %vm3502_vm3, %v409_v46, 0.0  ;;  %vm796_vm6 = vcmp.eq.s32.totalorder %v2387_v1, 3 }
 0xaad   :  { %v2017_v49 = vsel %vm1992_vm11, %v2015_v47, %v2738_v2  ;;  %v627_v2 = vrot.slane %v613_v62, %v2394_v8  ;;  %v797_v0 = vsel %vm796_vm6, %v2659_v19, 0  ;;  %v811_v13 = vsel %vm796_vm6, %v2674_v9, 0 }
 0xaae   :  { %2019 = vst.msk [vmem:[#allocation2] sm:$0x3] %vm3499_vm0, %v2017_v49  ;;  %v416_v55 = vadd.f32 %v415_v52, %v414_v30  ;;  %v2938_v31 = vsel %vm3501_vm8, %v797_v0, 0  ;;  %v2944_v51 = vsel %vm3501_vm8, %v811_v13, 0  ;;  %v1308_v28 = vcvt.s32.f32 %v1306_v25  ;;  %v2028_v30 = vld [vmem:[%s3496_s5] sm:$0x3] }
 0xaaf   :  { %vm629_vm5 = vcmp.ne.s32.totalorder %v627_v2, 0  ;;  %v799_v18 = vand.u32 65535, %v2938_v31  ;;  %v813_v24 = vand.u32 65535, %v2944_v51  ;;  %v1785_v34 = vcvt.s32.f32 %v1783_v12 }
 0xab0   :  { %417 = vadd.xlane.f32.xlu0 %v416_v55  ;;  %v631_v7 = vsel %vm629_vm5, 1, %v2349_v29  ;;  %v859_v4 = vcombine.high %v858_v35, %v858_v35  ;;  %v866_v17 = vrot.slane %v858_v35, %v2394_v8  ;;  %v2968_v20 = vrot.slane %v2649_v54, %v2394_v8 }
 0xab1   :  { %v639_v32 = vrot.slane %v631_v7, %v2399_v10  ;;  %v801_v16 = vcvt.s32.f32 %v799_v18  ;;  %v815_v23 = vcvt.s32.f32 %v813_v24  ;;  %v1604_v22 = vrot.slane %v2975_v33, %v2394_v8 }
 0xab2   :  { %v873_v37 = vrot.slane %v859_v4, %v2394_v8  ;;  %vm874_vm15 = vcmp.ne.s32.totalorder %v866_v17, 0  ;;  %v1358_v14 = vrot.slane %v2968_v20, %v2394_v8  ;;  %v1842_v54 = vrot.slane %v2855_v61, %v2394_v8  ;;  %v2298_v17 = vld [vmem:[%s3491_s0 + $0x20] sm:$0xff] }
 0xab3   :  { %v876_v39 = vsel %vm874_vm15, 1, %v2349_v29  ;;  %vm1612_vm13 = vcmp.ne.s32.totalorder %v1604_v22, 0 }
 0xab4   :  { %557 = vadd.xlane.f32.xlu0 %v555_v56  ;;  %vm875_vm1 = vcmp.ne.s32.totalorder %v873_v37, 0  ;;  %v881_v26 = vrot.slane %v876_v39, %v2399_v10  ;;  %vm1366_vm4 = vcmp.ne.s32.totalorder %v1358_v14, 0  ;;  %v1843_v43 = vcombine.high %v1842_v54, %v1842_v54  ;;  %v2299_v39 = vld [vmem:[%s3491_s0 + $0xa0] sm:$0xff] }
 0xab5   :  { %v877_v41 = vsel %vm875_vm1, 1, %v2349_v29  ;;  %v1368_v59 = vsel %vm1366_vm4, 1, %v2349_v29  ;;  %v1850_v5 = vrot.slane %v1842_v54, %v2394_v8  ;;  %v1614_v36 = vsel %vm1612_vm13, 1, %v2349_v29 }
 0xab6   :  { %v885_v42 = vrot.slane %v877_v41, %v2399_v10  ;;  %v1373_v44 = vrot.slane %v1368_v59, %v2399_v10  ;;  %v1857_v45 = vrot.slane %v1843_v43, %v2394_v8  ;;  %v1619_v3 = vrot.slane %v1614_v36, %v2399_v10 }
 0xab7   :  { %vm1858_vm7 = vcmp.ne.s32.totalorder %v1850_v5, 0 }
 0xab8   :  { %559 = vadd.xlane.f32.xlu0 %v556_v58  ;;  %v1860_v61 = vsel %vm1858_vm7, 1, %v2349_v29  ;;  %vm1859_vm9 = vcmp.ne.s32.totalorder %v1857_v45, 0 }
 0xab9   :  { %v1865_v46 = vrot.slane %v1860_v61, %v2399_v10  ;;  %v1861_v63 = vsel %vm1859_vm9, 1, %v2349_v29 }
 0xaba   :  { %v1869_v47 = vrot.slane %v1861_v63, %v2399_v10 }
 0xabc   :  { %573 = vadd.xlane.f32.xlu0 %v570_v40 }
 0xad2   :  { %644 = vperm.xlu0 %2155, %v639_v32   ;;  %v572_v32 = vpop.xlane.xlu1 %571 }
 0xad3   :  { %v575_v13 = vcvt.f32.s32 %v572_v32 }
 0xaf1   :  { %803 = vadd.xlane.f32.xlu0 %v801_v16 }
 0xaf5   :  { %817 = vadd.xlane.f32.xlu0 %v815_v23 }
 0xaf9   :  { %1311 = vadd.xlane.f32.xlu0 %v1308_v28 }
 0xafd   :  { %1787 = vadd.xlane.f32.xlu0 %v1785_v34  ;;  %v642_v34 = vpop.permute.xlu1 %641 }
 0xafe   :  { %vm646_vm12 = vcmp.eq.s32.totalorder %v642_v34, 1 }
 0xb13   :  { %887 = vperm.xlu0 %2155, %v881_v26   ;;  %v2300_v26 = vld [vmem:[%s3491_s0 + $0x28] sm:$0xf] }
 0xb17   :  { %890 = vperm.xlu0 %2155, %v885_v42   ;;  %v2301_v42 = vld [vmem:[%s3491_s0 + $0xa8] sm:$0xf] }
 0xb1b   :  { %1379 = vperm.xlu0 %2155, %v1373_v44   ;;  %v800_v44 = vshrl.u32 %v2938_v31, 16 }
 0xb1d   :  { %v802_v63 = vcvt.s32.f32 %v800_v44 }
 0xb1f   :  { %1625 = vperm.xlu0 %2155, %v1619_v3  }
 0xb23   :  { %1871 = vperm.xlu0 %2155, %v1865_v46   ;;  %v814_v46 = vshrl.u32 %v2944_v51, 16 }
 0xb27   :  { %1874 = vperm.xlu0 %2155, %v1869_v47  }
 0xb2b   :  { %2030 = vperm.xlu0 %2155, %v2028_v30  }
 0xb3d   :  { %v418_v48 = vpop.xlane.xlu0 %417 }
 0xb3e   :  { %v419_v49 = vrot.slane %v418_v48, 4 }
 0xb40   :  { %v420_v52 = vadd.f32 %v419_v49, %v418_v48  ;;  %v816_v48 = vcvt.s32.f32 %v814_v46  ;;  %v1597_v46 = vcombine.high %v2975_v33, %v2975_v33 }
 0xb41   :  { %v558_v55 = vpop.xlane.xlu0 %557 }
 0xb42   :  { %v421_v56 = vrot.slane %v420_v52, 2  ;;  %v561_v62 = vcvt.f32.s32 %v558_v55 }
 0xb44   :  { %v422_v57 = vadd.f32 %v421_v56, %v420_v52 }
 0xb45   :  { %v560_v58 = vpop.xlane.xlu0 %559 }
 0xb46   :  { %v562_v60 = vcvt.f32.s32 %v560_v58  ;;  %v423_v40 = vrot.slane %v422_v57, 1 }
 0xb48   :  { %v563_v2 = vshll.u32 %v562_v60, 16  ;;  %v424_v7 = vadd.f32 %v423_v40, %v422_v57 }
 0xb49   :  { %v574_v0 = vpop.xlane.xlu0 %573 }
 0xb4a   :  { %v564_v18 = vadd.s32 %v563_v2, %v561_v62  ;;  %v576_v15 = vcvt.f32.s32 %v574_v0  ;;  %2132 = vpush %v424_v7 }
 0xb4c   :  { %v577_v16 = vshll.u32 %v576_v15, 16  ;;  %v582_v24 = vrot.slane %v564_v18, %v2399_v10  ;;  %v586_v23 = vrot.slane %v564_v18, %v2788_v11 }
 0xb4e   :  { %v578_v21 = vadd.s32 %v577_v16, %v575_v13  ;;  %vm587_vm10 = vcmp.eq.s32.totalorder %v2391_v6, %v582_v24  ;;  %vm588_vm6 = vcmp.eq.s32.totalorder %v2780_v50, %v582_v24  ;;  %vm589_vm4 = vcmp.eq.s32.totalorder %v2391_v6, %v586_v23 }
 0xb4f   :  { %vm590_vm7 = vcmp.eq.s32.totalorder %v2780_v50, %v586_v23  ;;  %v1305_v13 = vand.u32 65535, %v2952_v53 }
 0xb50   :  { %v594_v25 = vrot.slane %v578_v21, %v2399_v10  ;;  %v598_v28 = vrot.slane %v578_v21, %v2788_v11 }
 0xb51   :  { %v645_v12 = vpop.permute.xlu0 %644  ;;  %v1307_v16 = vcvt.s32.f32 %v1305_v13 }
 0xb52   :  { %vm599_vm11 = vcmp.eq.s32.totalorder %v2387_v1, %v594_v25  ;;  %vm600_vm5 = vcmp.eq.s32.totalorder %v2387_v1, %v598_v28  ;;  %vm647_vm13 = vcmp.eq.s32.totalorder %v645_v12, 1  ;;  %v3054_v25 = vld [vmem:[%s3492_s1 + $0xb] ss:$0 sm:$0xff]  ;;  %v2051_v28 = vld [vmem:[#allocation2] sm:$0x3] }
 0xb53   :  { %vm601_vm15 = vmand %vm587_vm10, %vm599_vm11  ;;  %v3058_v53 = vadd.f32 %v3054_v25, %v2051_v28 }
 0xb54   :  { %vm602_vm1 = vmand %vm588_vm6, %vm599_vm11  ;;  %vm3521_vm11 = vcmp.eq.s32.totalorder %v2387_v1, 5  ;;  %vm1534_vm6 = vcmp.eq.s32.totalorder %v2387_v1, 6 }
 0xb55   :  { %vm603_vm9 = vmand %vm589_vm4, %vm600_vm5  ;;  %v1289_v51 = vsel %vm3521_vm11, %v2659_v19, 0  ;;  %v1535_v0 = vsel %vm1534_vm6, %v2659_v19, 0  ;;  %v1549_v21 = vsel %vm1534_vm6, %v2674_v9, 0  ;;  %vm3525_vm4 = vcmask 91136  }
 0xb56   :  { %vm604_vm14 = vmand %vm590_vm7, %vm600_vm5  ;;  %v2053_v34 = vsel %vm3525_vm4, %v3058_v53, -inf }
 0xb57   :  { %vm3007_vm0 = vmand %vm603_vm9, %vm647_vm13 }
 0xb58   :  { %vm3011_vm8 = vmand %vm604_vm14, %vm647_vm13  ;;  %v654_v14 = vsel %vm3007_vm0, %v2299_v39, 0.0  ;;  %vm1042_vm0 = vcmp.eq.s32.totalorder %v2387_v1, 4  ;;  %vm3519_vm14 = vcmask 58368   ;;  %vm3526_vm13 = vcmp.eq.s32.totalorder %v2387_v1, 7 }
 0xb59   :  { %vm648_vm3 = vmand %vm601_vm15, %vm646_vm12  ;;  %v655_v59 = vsel %vm3011_vm8, %v2301_v42, 0.0  ;;  %v659_v5 = vsel %vm3503_vm2, %v654_v14, 0.0  ;;  %v1043_v61 = vsel %vm1042_vm0, %v2659_v19, 0  ;;  %v1057_v30 = vsel %vm1042_vm0, %v2674_v9, 0 }
 0xb5a   :  { %vm649_vm10 = vmand %vm602_vm1, %vm646_vm12  ;;  %v652_v37 = vsel %vm648_vm3, %v2298_v17, 0.0  ;;  %vm3517_vm12 = vcmask 93184   ;;  %v1044_v47 = vsel %vm3519_vm14, %v1043_v61, 0  ;;  %v1784_v14 = vshrl.u32 %v2959_v27, 16 }
 0xb5b   :  { %v653_v41 = vsel %vm649_vm10, %v2300_v26, 0.0  ;;  %v656_v22 = vsel %vm3503_vm2, %v652_v37, 0.0  ;;  %vm3518_vm3 = vmmov %vm3517_vm12  ;;  %v1046_v49 = vshrl.u32 %v1044_v47, 16  ;;  %v1045_v57 = vand.u32 65535, %v1044_v47  ;;  %v2302_v37 = vld [vmem:[%s3494_s3] sm:$0x3] }
 0xb5c   :  { %v657_v54 = vsel %vm3517_vm12, %v653_v41, 0.0  ;;  %v661_v45 = vsel %vm3518_vm3, %v655_v59, 0.0  ;;  %vm3520_vm8 = vmmov %vm3519_vm14  ;;  %v1795_v39 = vsel %vm3526_vm13, %v2302_v37, 0  ;;  %v1611_v47 = vrot.slane %v1597_v46, %v2394_v8  ;;  %v2303_v37 = vld [vmem:[%s3491_s0 + $0x30] sm:$0xff] }
 0xb5d   :  { %v658_v43 = vadd.f32 %v657_v54, %v656_v22  ;;  %v1058_v52 = vsel %vm3520_vm8, %v1057_v30, 0  ;;  %v1048_v31 = vcvt.s32.f32 %v1046_v49  ;;  %v1047_v58 = vcvt.s32.f32 %v1045_v57  ;;  %vm3522_vm5 = vmmov %vm3520_vm8 }
 0xb5e   :  { %v1060_v55 = vshrl.u32 %v1058_v52, 16  ;;  %v1059_v60 = vand.u32 65535, %v1058_v52  ;;  %v1290_v40 = vsel %vm3522_vm5, %v1289_v51, 0  ;;  %vm3523_vm15 = vmmov %vm3522_vm5  ;;  %v1786_v22 = vcvt.s32.f32 %v1784_v14 }
 0xb5f   :  { %v660_v36 = vadd.f32 %v659_v5, %v658_v43  ;;  %v1292_v2 = vshrl.u32 %v1290_v40, 16  ;;  %v1291_v32 = vand.u32 65535, %v1290_v40  ;;  %v1536_v15 = vsel %vm3523_vm15, %v1535_v0, 0  ;;  %vm3524_vm1 = vmmov %vm3522_vm5 }
 0xb60   :  { %v1062_v56 = vcvt.s32.f32 %v1060_v55  ;;  %v1061_v62 = vcvt.s32.f32 %v1059_v60  ;;  %v1538_v24 = vshrl.u32 %v1536_v15, 16  ;;  %v1550_v19 = vsel %vm3524_vm1, %v1549_v21, 0  ;;  %vm3527_vm7 = vmmov %vm3524_vm1 }
 0xb61   :  { %v662_v3 = vadd.f32 %v661_v45, %v660_v36  ;;  %v1294_v7 = vcvt.s32.f32 %v1292_v2  ;;  %v1293_v18 = vcvt.s32.f32 %v1291_v32  ;;  %v1552_v12 = vshrl.u32 %v1550_v19, 16 }
 0xb62   :  { %v1540_v23 = vcvt.s32.f32 %v1538_v24  ;;  %v1537_v35 = vand.u32 65535, %v1536_v15  ;;  %v1551_v17 = vand.u32 65535, %v1550_v19  ;;  %v1796_v41 = vsel %vm3527_vm7, %v1795_v39, 0 }
 0xb63   :  { %663 = vadd.xlane.f32.xlu1 %v662_v3  ;;  %v1554_v9 = vcvt.s32.f32 %v1552_v12  ;;  %v1798_v54 = vshrl.u32 %v1796_v41, 16  ;;  %v1797_v59 = vand.u32 65535, %v1796_v41  ;;  %v1104_v5 = vrot.slane %v2608_v38, %v2394_v8 }
 0xb64   :  { %v1539_v4 = vcvt.s32.f32 %v1537_v35  ;;  %v1553_v26 = vcvt.s32.f32 %v1551_v17  ;;  %v1351_v45 = vcombine.high %v2968_v20, %v2968_v20  ;;  %vm1613_vm0 = vcmp.ne.s32.totalorder %v1611_v47, 0 }
 0xb65   :  { %v1800_v42 = vcvt.s32.f32 %v1798_v54  ;;  %v1799_v43 = vcvt.s32.f32 %v1797_v59  ;;  %v1105_v44 = vcombine.high %v1104_v5, %v1104_v5  ;;  %v1112_v36 = vrot.slane %v1104_v5, %v2394_v8  ;;  %v2306_v5 = vld [vmem:[%s3491_s0 + $0xb8] sm:$0xf] }
 0xb66   :  { %v1365_v61 = vrot.slane %v1351_v45, %v2394_v8  ;;  %v1615_v49 = vsel %vm1613_vm0, 1, %v2349_v29 }
 0xb67   :  { %805 = vadd.xlane.f32.xlu1 %v802_v63  ;;  %v1119_v27 = vrot.slane %v1105_v44, %v2394_v8  ;;  %vm1120_vm9 = vcmp.ne.s32.totalorder %v1112_v36, 0  ;;  %v1623_v33 = vrot.slane %v1615_v49, %v2399_v10 }
 0xb68   :  { %v1122_v3 = vsel %vm1120_vm9, 1, %v2349_v29  ;;  %vm1367_vm12 = vcmp.ne.s32.totalorder %v1365_v61, 0 }
 0xb69   :  { %vm1121_vm10 = vcmp.ne.s32.totalorder %v1119_v27, 0  ;;  %v1127_v38 = vrot.slane %v1122_v3, %v2399_v10  ;;  %v1369_v20 = vsel %vm1367_vm12, 1, %v2349_v29 }
 0xb6a   :  { %v1123_v63 = vsel %vm1121_vm10, 1, %v2349_v29 }
 0xb6b   :  { %819 = vadd.xlane.f32.xlu1 %v816_v48  ;;  %v1131_v30 = vrot.slane %v1123_v63, %v2399_v10  ;;  %v1377_v48 = vrot.slane %v1369_v20, %v2399_v10 }
 0xb6f   :  { %1051 = vadd.xlane.f32.xlu1 %v1048_v31 }
 0xb73   :  { %1065 = vadd.xlane.f32.xlu1 %v1062_v56 }
 0xb77   :  { %1049 = vadd.xlane.f32.xlu1 %v1047_v58 }
 0xb7b   :  { %1063 = vadd.xlane.f32.xlu1 %v1061_v62 }
 0xb7e   :  { %v804_v52 = vpop.xlane.xlu0 %803 }
 0xb7f   :  { %1297 = vadd.xlane.f32.xlu1 %v1294_v7  ;;  %v807_v40 = vcvt.f32.s32 %v804_v52 }
 0xb82   :  { %v818_v31 = vpop.xlane.xlu0 %817 }
 0xb83   :  { %1295 = vadd.xlane.f32.xlu1 %v1293_v18  ;;  %v821_v13 = vcvt.f32.s32 %v818_v31 }
 0xb86   :  { %v3087_v8 = vpop.xlane.xlu0 %1311 }
 0xb87   :  { %1309 = vadd.xlane.f32.xlu1 %v1307_v16  ;;  %v1314_v20 = vcvt.f32.s32 %v3087_v8 }
 0xb8a   :  { %v3089_v32 = vpop.xlane.xlu0 %1787 }
 0xb8b   :  { %1543 = vadd.xlane.f32.xlu1 %v1540_v23 }
 0xb8f   :  { %2054 = vmax.xlane.f32.xlu1 %v2053_v34 }
 0xb92   :  { %v888_v28 = vpop.permute.xlu0 %887 }
 0xb93   :  { %1557 = vadd.xlane.f32.xlu1 %v1554_v9  ;;  %vm892_vm1 = vcmp.eq.s32.totalorder %v888_v28, 1 }
 0xb96   :  { %v891_v17 = vpop.permute.xlu0 %890 }
 0xb97   :  { %1541 = vadd.xlane.f32.xlu1 %v1539_v4  ;;  %vm893_vm10 = vcmp.eq.s32.totalorder %v891_v17, 1 }
 0xb9a   :  { %v1380_v35 = vpop.permute.xlu0 %1379 }
 0xb9b   :  { %1555 = vadd.xlane.f32.xlu1 %v1553_v26  ;;  %v2304_v26 = vld [vmem:[%s3491_s0 + $0x38] sm:$0xf] }
 0xb9f   :  { %1789 = vadd.xlane.f32.xlu1 %v1786_v22 }
 0xba3   :  { %1803 = vadd.xlane.f32.xlu1 %v1800_v42  ;;  %v2305_v42 = vld [vmem:[%s3491_s0 + $0xb0] sm:$0xff] }
 0xba7   :  { %1801 = vadd.xlane.f32.xlu1 %v1799_v43 }
 0xbb8   :  { %1133 = vperm.xlu1 %2156, %v1127_v38  }
 0xbbc   :  { %1136 = vperm.xlu1 %2156, %v1131_v30  }
 0xbc0   :  { %1382 = vperm.xlu1 %2156, %v1377_v48  }
 0xbc4   :  { %1628 = vperm.xlu1 %2156, %v1623_v33  }
 0xbf0   :  { %v664_v55 = vpop.xlane.xlu1 %663 }
 0xbf1   :  { %v665_v56 = vrot.slane %v664_v55, 4 }
 0xbf3   :  { %v666_v57 = vadd.f32 %v665_v56, %v664_v55  ;;  %v1315_v55 = vshll.u32 %v1314_v20, 16 }
 0xbf4   :  { %v806_v51 = vpop.xlane.xlu1 %805 }
 0xbf5   :  { %v667_v58 = vrot.slane %v666_v57, 2  ;;  %v808_v60 = vcvt.f32.s32 %v806_v51 }
 0xbf7   :  { %v809_v62 = vshll.u32 %v808_v60, 16  ;;  %v668_v2 = vadd.f32 %v667_v58, %v666_v57 }
 0xbf8   :  { %v820_v7 = vpop.xlane.xlu1 %819 }
 0xbf9   :  { %v822_v29 = vcvt.f32.s32 %v820_v7  ;;  %v669_v0 = vrot.slane %v668_v2, 1  ;;  %v810_v18 = vadd.s32 %v809_v62, %v807_v40 }
 0xbfb   :  { %v823_v15 = vshll.u32 %v822_v29, 16  ;;  %v670_v16 = vadd.f32 %v669_v0, %v668_v2  ;;  %v828_v21 = vrot.slane %v810_v18, %v2399_v10  ;;  %v832_v19 = vrot.slane %v810_v18, %v2788_v11 }
 0xbfc   :  { %v3091_v24 = vpop.xlane.xlu1 %1051 }
 0xbfd   :  { %2134 = vpush %v670_v16  ;;  %v824_v23 = vadd.s32 %v823_v15, %v821_v13  ;;  %vm833_vm3 = vcmp.eq.s32.totalorder %v2391_v6, %v828_v21  ;;  %vm834_vm11 = vcmp.eq.s32.totalorder %v2780_v50, %v828_v21  ;;  %vm835_vm6 = vcmp.eq.s32.totalorder %v2391_v6, %v832_v19 }
 0xbfe   :  { %vm836_vm7 = vcmp.eq.s32.totalorder %v2780_v50, %v832_v19  ;;  %v1054_v52 = vcvt.f32.s32 %v3091_v24 }
 0xbff   :  { %v840_v12 = vrot.slane %v824_v23, %v2399_v10  ;;  %v844_v34 = vrot.slane %v824_v23, %v2788_v11 }
 0xc00   :  { %v1066_v9 = vpop.xlane.xlu1 %1065  ;;  %v1055_v2 = vshll.u32 %v1054_v52, 16 }
 0xc01   :  { %vm845_vm14 = vcmp.eq.s32.totalorder %v2387_v1, %v840_v12  ;;  %vm3100_vm8 = vcmp.eq.s32.totalorder %v2387_v1, %v844_v34  ;;  %v1068_v49 = vcvt.f32.s32 %v1066_v9 }
 0xc02   :  { %vm847_vm5 = vmand %vm833_vm3, %vm845_vm14  ;;  %vm3530_vm3 = vcmask 93184  }
 0xc03   :  { %vm848_vm15 = vmand %vm834_vm11, %vm845_vm14  ;;  %v1069_v58 = vshll.u32 %v1068_v49, 16  ;;  %vm3532_vm11 = vcmask 91136  }
 0xc04   :  { %v1050_v4 = vpop.xlane.xlu1 %1049  ;;  %vm849_vm4 = vmand %vm835_vm6, %vm3100_vm8 }
 0xc05   :  { %vm894_vm13 = vmand %vm847_vm5, %vm892_vm1  ;;  %v1053_v40 = vcvt.f32.s32 %v1050_v4 }
 0xc06   :  { %vm895_vm9 = vmand %vm848_vm15, %vm892_vm1  ;;  %v898_v39 = vsel %vm894_vm13, %v2303_v37, 0.0 }
 0xc07   :  { %vm850_vm12 = vmand %vm836_vm7, %vm3100_vm8  ;;  %v899_v41 = vsel %vm895_vm9, %v2304_v26, 0.0  ;;  %v902_v22 = vsel %vm3503_vm2, %v898_v39, 0.0  ;;  %v1056_v18 = vadd.s32 %v1055_v2, %v1053_v40  ;;  %v3553_v40 = vmov 0 }
 0xc08   :  { %v1064_v14 = vpop.xlane.xlu1 %1063  ;;  %vm896_vm0 = vmand %vm849_vm4, %vm893_vm10  ;;  %v903_v54 = vsel %vm3530_vm3, %v899_v41, 0.0 }
 0xc09   :  { %vm897_vm14 = vmand %vm850_vm12, %vm893_vm10  ;;  %v900_v59 = vsel %vm896_vm0, %v2305_v42, 0.0  ;;  %v904_v43 = vadd.f32 %v903_v54, %v902_v22  ;;  %v1067_v31 = vcvt.f32.s32 %v1064_v14  ;;  %v1074_v4 = vrot.slane %v1056_v18, %v2399_v10 }
 0xc0a   :  { %v901_v44 = vsel %vm897_vm14, %v2306_v5, 0.0  ;;  %v905_v36 = vsel %vm3503_vm2, %v900_v59, 0.0  ;;  %vm3531_vm8 = vmmov %vm3530_vm3  ;;  %v1791_v14 = vcvt.f32.s32 %v3089_v32  ;;  %vm1384_vm0 = vcmp.eq.s32.totalorder %v1380_v35, 1  ;;  %v2309_v35 = vld [vmem:[%s3491_s0 + $0x50] sm:$0xff] }
 0xc0b   :  { %v906_v45 = vadd.f32 %v905_v36, %v904_v43  ;;  %v907_v3 = vsel %vm3531_vm8, %v901_v44, 0.0  ;;  %v3133_v7 = vadd.s32 %v1069_v58, %v1067_v31  ;;  %vm1079_vm1 = vcmp.eq.s32.totalorder %v2391_v6, %v1074_v4  ;;  %v1626_v44 = vpop.permute.xlu0 %1625 }
 0xc0c   :  { %v1298_v27 = vpop.xlane.xlu1 %1297  ;;  %vm1080_vm13 = vcmp.eq.s32.totalorder %v2780_v50, %v1074_v4 }
 0xc0d   :  { %v908_v61 = vadd.f32 %v907_v3, %v906_v45  ;;  %v1300_v56 = vcvt.f32.s32 %v1298_v27  ;;  %v1086_v23 = vrot.slane %v3133_v7, %v2399_v10  ;;  %v1090_v45 = vrot.slane %v3133_v7, %v2788_v11 }
 0xc0f   :  { %909 = vadd.xlane.f32.xlu0 %v908_v61  ;;  %vm1091_vm6 = vcmp.eq.s32.totalorder %v2387_v1, %v1086_v23  ;;  %v2307_v23 = vld [vmem:[%s3491_s0 + $0x40] sm:$0xff] }
 0xc10   :  { %v1296_v46 = vpop.xlane.xlu1 %1295  ;;  %vm3165_vm7 = vmand %vm1079_vm1, %vm1091_vm6 }
 0xc11   :  { %v1299_v62 = vcvt.f32.s32 %v1296_v46  ;;  %vm3175_vm12 = vmand %vm1080_vm13, %vm1091_vm6  ;;  %v1078_v46 = vrot.slane %v1056_v18, %v2788_v11  ;;  %vm1630_vm6 = vcmp.eq.s32.totalorder %v1626_v44, 1  ;;  %v3570_v18 = vmov 0  ;;  %v2314_v44 = vld [vmem:[%s3491_s0 + $0x78] sm:$0xf] }
 0xc14   :  { %v1310_v38 = vpop.xlane.xlu1 %1309 }
 0xc15   :  { %v1313_v57 = vcvt.f32.s32 %v1310_v38 }
 0xc17   :  { %v3135_v8 = vadd.s32 %v1315_v55, %v1313_v57  ;;  %v1872_v57 = vpop.permute.xlu0 %1871 }
 0xc18   :  { %v1544_v63 = vpop.xlane.xlu1 %1543 }
 0xc19   :  { %v1546_v29 = vcvt.f32.s32 %v1544_v63  ;;  %v1332_v28 = vrot.slane %v3135_v8, %v2399_v10  ;;  %v1336_v38 = vrot.slane %v3135_v8, %v2788_v11  ;;  %v3563_v8 = vmov 0 }
 0xc1b   :  { %v1547_v19 = vshll.u32 %v1546_v29, 16  ;;  %vm3148_vm5 = vcmp.eq.s32.totalorder %v2387_v1, %v1332_v28 }
 0xc1c   :  { %v3127_v47 = vpop.xlane.xlu1 %2054 }
 0xc1d   :  { %v2056_v30 = vsub.f32 %v3058_v53, %v3127_v47  ;;  %v1301_v53 = vshll.u32 %v1300_v56, 16 }
 0xc1f   :  { %v2057_v48 = vmul.f32 1.442695, %v2056_v30  ;;  %v1302_v15 = vadd.s32 %v1301_v53, %v1299_v62  ;;  %v3557_v53 = vmov 0 }
 0xc20   :  { %v1558_v33 = vpop.xlane.xlu1 %1557 }
 0xc21   :  { %2285 = vpow2.f32 %v2057_v48  ;;  %v1560_v51 = vcvt.f32.s32 %v1558_v33  ;;  %v1320_v17 = vrot.slane %v1302_v15, %v2399_v10  ;;  %v1324_v48 = vrot.slane %v1302_v15, %v2788_v11 }
 0xc23   :  { %v1561_v0 = vshll.u32 %v1560_v51, 16  ;;  %vm1325_vm15 = vcmp.eq.s32.totalorder %v2391_v6, %v1320_v17  ;;  %vm1326_vm9 = vcmp.eq.s32.totalorder %v2780_v50, %v1320_v17  ;;  %v3549_v51 = vmov 0 }
 0xc24   :  { %v1542_v60 = vpop.xlane.xlu1 %1541  ;;  %vm3160_vm4 = vmand %vm1325_vm15, %vm3148_vm5  ;;  %vm1327_vm2 = vcmp.eq.s32.totalorder %v2391_v6, %v1324_v48 }
 0xc25   :  { %v1545_v16 = vcvt.f32.s32 %v1542_v60  ;;  %vm1340_vm3 = vmand %vm1326_vm9, %vm3148_vm5 }
 0xc26   :  { %vm3189_vm14 = vmand %vm3160_vm4, %vm1384_vm0  ;;  %vm3210_vm4 = vcmp.eq.s32.totalorder %v2387_v1, %v1090_v45 }
 0xc27   :  { %v1548_v37 = vadd.s32 %v1547_v19, %v1545_v16  ;;  %vm3202_vm1 = vmand %vm1340_vm3, %vm1384_vm0  ;;  %vm3221_vm0 = vcmp.eq.s32.totalorder %v2387_v1, %v1336_v38  ;;  %v2308_v19 = vld [vmem:[%s3491_s0 + $0x48] sm:$0xf]  ;;  %v1390_v4 = vsel %vm3189_vm14, %v2309_v35, 0.0  ;;  %v2322_v35 = vld [vmem:[%s3491_s0 + $0xf8] sm:$0xf] }
 0xc28   :  { %v1556_v13 = vpop.xlane.xlu1 %1555  ;;  %v2321_v16 = vld [vmem:[%s3491_s0 + $0xe8] sm:$0xf] }
 0xc29   :  { %v1559_v24 = vcvt.f32.s32 %v1556_v13  ;;  %v1566_v42 = vrot.slane %v1548_v37, %v2399_v10  ;;  %v1570_v60 = vrot.slane %v1548_v37, %v2788_v11  ;;  %v2310_v37 = vld [vmem:[%s3491_s0 + $0x58] sm:$0xf] }
 0xc2b   :  { %v2286_v21 = vpop.eup %2285  ;;  %v3141_v12 = vadd.s32 %v1561_v0, %v1559_v24  ;;  %vm1571_vm8 = vcmp.eq.s32.totalorder %v2391_v6, %v1566_v42  ;;  %v3302_v24 = vpop.permute.xlu0 %1874 }
 0xc2c   :  { %v1790_v34 = vpop.xlane.xlu1 %1789  ;;  %v2059_v9 = vsel %vm3532_vm11, %v2286_v21, 0.0  ;;  %vm1572_vm11 = vcmp.eq.s32.totalorder %v2780_v50, %v1566_v42 }
 0xc2d   :  { %v1792_v39 = vcvt.f32.s32 %v1790_v34  ;;  %2060 = vadd.xlane.f32.xlu1 %v2059_v9  ;;  %v1578_v41 = vrot.slane %v3141_v12, %v2399_v10  ;;  %v1582_v33 = vrot.slane %v3141_v12, %v2788_v11 }
 0xc2f   :  { %v1793_v22 = vshll.u32 %v1792_v39, 16  ;;  %vm3171_vm10 = vcmp.eq.s32.totalorder %v2387_v1, %v1578_v41  ;;  %v1391_v39 = vsel %vm3202_vm1, %v2310_v37, 0.0  ;;  %v2312_v41 = vld [vmem:[%s3491_s0 + $0x68] sm:$0xf] }
 0xc30   :  { %v1804_v54 = vpop.xlane.xlu1 %1803  ;;  %vm1585_vm5 = vmand %vm1571_vm8, %vm3171_vm10  ;;  %vm3271_vm8 = vcmp.eq.s32.totalorder %v2387_v1, %v1582_v33 }
 0xc31   :  { %v1806_v59 = vcvt.f32.s32 %v1804_v54  ;;  %v1794_v43 = vadd.s32 %v1793_v22, %v1791_v14  ;;  %vm1586_vm15 = vmand %vm1572_vm11, %vm3171_vm10  ;;  %vm1081_vm10 = vcmp.eq.s32.totalorder %v2391_v6, %v1078_v46  ;;  %v2311_v14 = vld [vmem:[%s3491_s0 + $0x60] sm:$0xff] }
 0xc32   :  { %vm3215_vm13 = vmand %vm1585_vm5, %vm1630_vm6 }
 0xc33   :  { %v1807_v3 = vshll.u32 %v1806_v59, 16  ;;  %v1812_v30 = vrot.slane %v1794_v43, %v2399_v10  ;;  %v1816_v52 = vrot.slane %v1794_v43, %v2788_v11  ;;  %v3550_v51 = vsel %vm3215_vm13, 4294967295, %v3549_v51  ;;  %vm3227_vm3 = vmand %vm1586_vm15, %vm1630_vm6  ;;  %v2313_v43 = vld [vmem:[%s3491_s0 + $0x70] sm:$0xff] }
 0xc34   :  { %v1802_v61 = vpop.xlane.xlu1 %1801  ;;  %v3554_v40 = vsel %vm3227_vm3, 4294967295, %v3553_v40  ;;  %vm1082_vm6 = vcmp.eq.s32.totalorder %v2780_v50, %v1078_v46  ;;  %vm3245_vm15 = vmand %vm1081_vm10, %vm3210_vm4  ;;  %vm3589_vm14 = vnez %v3550_v51 }
 0xc35   :  { %v1805_v20 = vcvt.f32.s32 %v1802_v61  ;;  %v3558_v53 = vsel %vm3245_vm15, 4294967295, %v3557_v53  ;;  %vm3266_vm10 = vmand %vm1082_vm6, %vm3210_vm4  ;;  %vm3567_vm13 = vcmp.eq.s32.totalorder %v2391_v6, %v1812_v30  ;;  %vm3572_vm6 = vcmp.eq.s32.totalorder %v2780_v50, %v1812_v30  ;;  %v2315_v30 = vld [vmem:[%s3491_s0 + $0xc0] sm:$0xff] }
 0xc36   :  { %v3564_v8 = vsel %vm3266_vm10, 4294967295, %v3563_v8  ;;  %vm3285_vm4 = vmand %vm1327_vm2, %vm3221_vm0  ;;  %vm1573_vm15 = vcmp.eq.s32.totalorder %v2391_v6, %v1570_v60  ;;  %vm3577_vm2 = vcmp.eq.s32.totalorder %v2391_v6, %v1816_v52  ;;  %v1636_v26 = vsel %vm3589_vm14, %v2311_v14, 0.0 }
 0xc37   :  { %v1808_v31 = vadd.s32 %v1807_v3, %v1805_v20  ;;  %v3571_v18 = vsel %vm3285_vm4, 4294967295, %v3570_v18  ;;  %v2350_v14 = vmov 0.0  }
 0xc38   :  { %v1134_v55 = vpop.permute.xlu1 %1133 }
 0xc39   :  { %vm1138_vm9 = vcmp.eq.s32.totalorder %v1134_v55, 1  ;;  %v1824_v62 = vrot.slane %v1808_v31, %v2399_v10  ;;  %v1828_v2 = vrot.slane %v1808_v31, %v2788_v11  ;;  %v2031_v11 = vpop.permute.xlu0 %2030 }
 0xc3a   :  { %vm3238_vm5 = vmand %vm3165_vm7, %vm1138_vm9 }
 0xc3b   :  { %vm1829_vm11 = vcmp.eq.s32.totalorder %v2387_v1, %v1824_v62  ;;  %vm3253_vm3 = vcmp.eq.s32.totalorder %v2387_v1, %v1828_v2  ;;  %vm3260_vm7 = vmand %vm3175_vm12, %vm1138_vm9  ;;  %vm1328_vm9 = vcmp.eq.s32.totalorder %v2780_v50, %v1324_v48  ;;  %v1144_v28 = vsel %vm3238_vm5, %v2307_v23, 0.0  ;;  %v2316_v48 = vld [vmem:[%s3491_s0 + $0xc8] sm:$0xf]  ;;  %v2318_v62 = vld [vmem:[%s3491_s0 + $0xd8] sm:$0xf] }
 0xc3c   :  { %v1137_v29 = vpop.permute.xlu1 %1136  ;;  %vm3278_vm12 = vmand %vm3567_vm13, %vm1829_vm11  ;;  %v1145_v12 = vsel %vm3260_vm7, %v2308_v19, 0.0  ;;  %vm3582_vm5 = vcmp.eq.s32.totalorder %v2780_v50, %v1816_v52 }
 0xc3d   :  { %vm3291_vm10 = vmand %vm3572_vm6, %vm1829_vm11  ;;  %vm1139_vm7 = vcmp.eq.s32.totalorder %v1137_v29, 1  ;;  %v2320_v29 = vld [vmem:[%s3491_s0 + $0xe0] sm:$0xff] }
 0xc3e   :  { %vm3297_vm13 = vmand %vm1328_vm9, %vm3221_vm0  ;;  %vm1574_vm0 = vcmp.eq.s32.totalorder %v2780_v50, %v1570_v60  ;;  %vm1876_vm9 = vcmp.eq.s32.totalorder %v1872_v57, 1  ;;  %v2317_v57 = vld [vmem:[%s3491_s0 + $0xd0] sm:$0xff] }
 0xc3f   :  { %vm3308_vm4 = vmand %vm3577_vm2, %vm3253_vm3  ;;  %vm3593_vm2 = vcmask 97280  }
 0xc40   :  { %vm3325_vm11 = vmand %vm1573_vm15, %vm3271_vm8  ;;  %v1383_v9 = vpop.permute.xlu1 %1382  ;;  %v1148_v42 = vsel %vm3593_vm2, %v1144_v28, 0.0  ;;  %v1640_v61 = vsel %vm3593_vm2, %v1636_v26, 0.0 }
 0xc41   :  { %vm3333_vm6 = vmand %vm3582_vm5, %vm3253_vm3 }
 0xc42   :  { %vm3344_vm15 = vmand %vm1574_vm0, %vm3271_vm8  ;;  %vm3590_vm8 = vnez %v3554_v40  ;;  %vm3594_vm0 = vcmask 93184  }
 0xc43   :  { %vm3351_vm3 = vmand %vm3278_vm12, %vm1876_vm9  ;;  %v1637_v22 = vsel %vm3590_vm8, %v2312_v41, 0.0  ;;  %vm3504_vm12 = vcmp.eq.s32.totalorder %v3302_v24, 1  ;;  %v1149_v59 = vsel %vm3594_vm0, %v1145_v12, 0.0 }
 0xc44   :  { %vm3374_vm1 = vmand %vm3291_vm10, %vm1876_vm9  ;;  %v1882_v5 = vsel %vm3351_vm3, %v2313_v43, 0.0  ;;  %vm1385_vm10 = vcmp.eq.s32.totalorder %v1383_v9, 1  ;;  %v1629_v3 = vpop.permute.xlu1 %1628  ;;  %v1150_v38 = vadd.f32 %v1149_v59, %v1148_v42 }
 0xc45   :  { %vm3384_vm5 = vmand %vm3308_vm4, %vm3504_vm12  ;;  %v1883_v36 = vsel %vm3374_vm1, %v2314_v44, 0.0  ;;  %vm3597_vm4 = vnez %v3558_v53  ;;  %vm1631_vm1 = vcmp.eq.s32.totalorder %v1629_v3, 1  ;;  %v2319_v53 = vld [vmem:[%s3491_s0 + $0xf0] sm:$0xff]  ;;  %s2131_s0 = spop %2130 }
 0xc46   :  { %vm1142_vm9 = vmand %vm3597_vm4, %vm1139_vm7  ;;  %v1884_v10 = vsel %vm3384_vm5, %v2319_v53, 0.0  ;;  %s2133_s30 = spop %2132 }
 0xc47   :  { %vm3598_vm14 = vmmov %vm3593_vm2  ;;  %v1146_v20 = vsel %vm1142_vm9, %v2315_v30, 0.0  ;;  %s2135_s7 = spop %2134 }
 0xc48   :  { %v1394_v27 = vsel %vm3598_vm14, %v1390_v4, 0.0  ;;  %vm3599_vm8 = vmmov %vm3594_vm0 }
 0xc49   :  { %v1395_v45 = vsel %vm3599_vm8, %v1391_v39, 0.0  ;;  %vm3600_vm3 = vmmov %vm3594_vm0  ;;  %vm3601_vm0 = vnez %v3564_v8 }
 0xc4a   :  { %v1641_v46 = vsel %vm3600_vm3, %v1637_v22, 0.0  ;;  %vm3408_vm12 = vmand %vm3601_vm0, %vm1139_vm7  ;;  %vm3605_vm7 = vnez %v3571_v18  ;;  %v1396_v58 = vadd.f32 %v1395_v45, %v1394_v27  ;;  %vm3614_vm0 = vcmp.eq.s32.totalorder %v3302_v24, 1 }
 0xc4b   :  { %v1147_v49 = vsel %vm3408_vm12, %v2316_v48, 0.0  ;;  %vm3604_vm4 = vmmov %vm3593_vm2  ;;  %v1642_v60 = vadd.f32 %v1641_v46, %v1640_v61 }
 0xc4c   :  { %v1151_v33 = vsel %vm3604_vm4, %v1146_v20, 0.0  ;;  %vm1388_vm14 = vmand %vm3605_vm7, %vm1385_vm10 }
 0xc4d   :  { %vm3606_vm8 = vmmov %vm3593_vm2  ;;  %v1152_v55 = vadd.f32 %v1151_v33, %v1150_v38  ;;  %v1392_v51 = vsel %vm1388_vm14, %v2317_v57, 0.0  ;;  %vm3618_vm14 = vcmask 91136  }
 0xc4e   :  { %v1886_v52 = vsel %vm3606_vm8, %v1882_v5, 0.0  ;;  %vm3607_vm2 = vmmov %vm3600_vm3  ;;  %vm34_vm8 = vcmask 0  }
 0xc4f   :  { %v1887_v31 = vsel %vm3607_vm2, %v1883_v36, 0.0  ;;  %vm3429_vm9 = vmand %vm3297_vm13, %vm1385_vm10  ;;  %35 = vst.msk [vmem:[#allocation3] sm:$0x1] %vm34_vm8, %v2350_v14 }
 0xc50   :  { %vm3610_vm12 = vmmov %vm3607_vm2  ;;  %v1393_v2 = vsel %vm3429_vm9, %v2318_v62, 0.0  ;;  %v1888_v18 = vadd.f32 %v1887_v31, %v1886_v52 }
 0xc51   :  { %v1153_v40 = vsel %vm3610_vm12, %v1147_v49, 0.0  ;;  %vm3611_vm13 = vmmov %vm3604_vm4 }
 0xc52   :  { %v1397_v7 = vsel %vm3611_vm13, %v1392_v51, 0.0  ;;  %vm1634_vm10 = vmand %vm3325_vm11, %vm1631_vm1  ;;  %v1154_v13 = vadd.f32 %v1153_v40, %v1152_v55 }
 0xc53   :  { %v1398_v8 = vadd.f32 %v1397_v7, %v1396_v58  ;;  %vm1635_vm3 = vmand %vm3344_vm15, %vm1631_vm1  ;;  %v1638_v0 = vsel %vm1634_vm10, %v2320_v29, 0.0  ;;  %vm2032_vm1 = vcmp.eq.s32.totalorder %v2387_v1, %v2031_v11 }
 0xc54   :  { %vm3612_vm11 = vmmov %vm3607_vm2  ;;  %v1639_v21 = vsel %vm1635_vm3, %v2321_v16, 0.0  ;;  %1155 = vadd.xlane.f32.xlu1 %v1154_v13  ;;  %v2037_v24 = vsel %vm2032_vm1, %v3054_v25, 0.0  ;;  %v177_v16 = vstv %s2131_s0 }
 0xc55   :  { %v1399_v15 = vsel %vm3612_vm11, %v1393_v2, 0.0  ;;  %vm3613_vm5 = vmmov %vm3604_vm4  ;;  %v2038_v1 = vsel %vm3618_vm14, %v2037_v24, 0.0 }
 0xc56   :  { %v1643_v23 = vsel %vm3613_vm5, %v1638_v0, 0.0  ;;  %vm1881_vm15 = vmand %vm3333_vm6, %vm3614_vm0  ;;  %v1400_v19 = vadd.f32 %v1399_v15, %v1398_v8  ;;  %v426_v15 = vstv %s2133_s30 }
 0xc57   :  { %v1644_v28 = vadd.f32 %v1643_v23, %v1642_v60  ;;  %vm3615_vm4 = vmmov %vm3607_vm2  ;;  %v1885_v4 = vsel %vm1881_vm15, %v2322_v35, 0.0  ;;  %v427_v23 = vadd.f32 %v426_v15, %v177_v16 }
 0xc58   :  { %v1645_v12 = vsel %vm3615_vm4, %v1639_v21, 0.0  ;;  %vm3616_vm7 = vmmov %vm3613_vm5  ;;  %1401 = vadd.xlane.f32.xlu1 %v1400_v19  ;;  %v672_v21 = vstv %s2135_s7 }
 0xc59   :  { %v1889_v6 = vsel %vm3616_vm7, %v1884_v10, 0.0  ;;  %v1646_v9 = vadd.f32 %v1645_v12, %v1644_v28  ;;  %vm3617_vm6 = vmmov %vm3607_vm2  ;;  %vm2065_vm2 = vcmask 1024   ;;  %v673_v19 = vadd.f32 %v672_v21, %v427_v23 }
 0xc5a   :  { %v1890_v17 = vadd.f32 %v1889_v6, %v1888_v18  ;;  %v1891_v34 = vsel %vm3617_vm6, %v1885_v4, 0.0 }
 0xc5b   :  { %1647 = vadd.xlane.f32.xlu0 %v1646_v9 }
 0xc5c   :  { %v1892_v50 = vadd.f32 %v1891_v34, %v1890_v17 }
 0xc5e   :  { %1893 = vadd.xlane.f32.xlu1 %v1892_v50  ;;  %v2020_v50 = vld [vmem:[#allocation3] sm:$0x1] }
 0xc5f   :  { %2039 = vadd.xlane.f32.xlu0 %v2038_v1 }
 0xc9c   :  { %v910_v37 = vpop.xlane.xlu0 %909 }
 0xc9d   :  { %v911_v39 = vrot.slane %v910_v37, 4 }
 0xc9f   :  { %v912_v26 = vadd.f32 %v911_v39, %v910_v37 }
 0xca1   :  { %v913_v41 = vrot.slane %v912_v26, 2 }
 0xca3   :  { %v914_v22 = vadd.f32 %v913_v41, %v912_v26 }
 0xca5   :  { %v915_v54 = vrot.slane %v914_v22, 1 }
 0xca7   :  { %v916_v25 = vadd.f32 %v915_v54, %v914_v22 }
 0xca9   :  { %2136 = vpush %v916_v25 }
 0xcba   :  { %v2061_v42 = vpop.xlane.xlu1 %2060 }
 0xcbb   :  { %2287 = vlog2.f32 %v2061_v42 }
 0xcc5   :  { %v2288_v59 = vpop.eup %2287 }
 0xcc6   :  { %v2063_v32 = vmul.f32 0.6931472, %v2288_v59 }
 0xcc8   :  { %v2064_v43 = vadd.f32 %v2063_v32, %v3127_v47 }
 0xcca   :  { %v2066_v5 = vsel %vm2065_vm2, %v2064_v43, 0.0 }
 0xccb   :  { %2067 = vadd.xlane.f32.xlu1 %v2066_v5 }
 0xcda   :  { %s2137_s8 = spop %2136 }
 0xcdb   :  { %v918_v28 = vstv %s2137_s8 }
 0xcdc   :  { %v919_v12 = vadd.f32 %v918_v28, %v673_v19 }
 0xce1   :  { %v1156_v44 = vpop.xlane.xlu1 %1155 }
 0xce2   :  { %v1157_v36 = vrot.slane %v1156_v44, 4 }
 0xce4   :  { %v1158_v27 = vadd.f32 %v1157_v36, %v1156_v44 }
 0xce5   :  { %v1402_v45 = vpop.xlane.xlu1 %1401 }
 0xce6   :  { %v1159_v61 = vrot.slane %v1158_v27, 2  ;;  %v1403_v46 = vrot.slane %v1402_v45, 4 }
 0xce8   :  { %v1648_v3 = vpop.xlane.xlu0 %1647  ;;  %v1404_v63 = vadd.f32 %v1403_v46, %v1402_v45  ;;  %v1160_v20 = vadd.f32 %v1159_v61, %v1158_v27 }
 0xce9   :  { %v1649_v38 = vrot.slane %v1648_v3, 4 }
 0xcea   :  { %v1405_v33 = vrot.slane %v1404_v63, 2  ;;  %v1161_v47 = vrot.slane %v1160_v20, 1 }
 0xceb   :  { %v1650_v30 = vadd.f32 %v1649_v38, %v1648_v3  ;;  %v1894_v48 = vpop.xlane.xlu1 %1893 }
 0xcec   :  { %v2040_v49 = vpop.xlane.xlu0 %2039  ;;  %v1895_v52 = vrot.slane %v1894_v48, 4  ;;  %v1406_v51 = vadd.f32 %v1405_v33, %v1404_v63  ;;  %v1162_v60 = vadd.f32 %v1161_v47, %v1160_v20 }
 0xced   :  { %v1651_v31 = vrot.slane %v1650_v30, 2  ;;  %v2041_v55 = vrot.slane %v2040_v49, 4 }
 0xcee   :  { %v1896_v56 = vadd.f32 %v1895_v52, %v1894_v48  ;;  %v1407_v2 = vrot.slane %v1406_v51, 1  ;;  %2138 = vpush %v1162_v60 }
 0xcef   :  { %v2042_v57 = vadd.f32 %v2041_v55, %v2040_v49  ;;  %v1652_v58 = vadd.f32 %v1651_v31, %v1650_v30 }
 0xcf0   :  { %v1897_v40 = vrot.slane %v1896_v56, 2  ;;  %v1408_v10 = vadd.f32 %v1407_v2, %v1406_v51 }
 0xcf1   :  { %v2043_v62 = vrot.slane %v2042_v57, 2  ;;  %v1653_v7 = vrot.slane %v1652_v58, 1 }
 0xcf2   :  { %v1898_v8 = vadd.f32 %v1897_v40, %v1896_v56  ;;  %2140 = vpush %v1408_v10 }
 0xcf3   :  { %v2044_v53 = vadd.f32 %v2043_v62, %v2042_v57  ;;  %v1654_v11 = vadd.f32 %v1653_v7, %v1652_v58 }
 0xcf4   :  { %v1899_v29 = vrot.slane %v1898_v8, 1 }
 0xcf5   :  { %v2045_v0 = vrot.slane %v2044_v53, 1  ;;  %2142 = vpush %v1654_v11 }
 0xcf6   :  { %v1900_v13 = vadd.f32 %v1899_v29, %v1898_v8 }
 0xcf7   :  { %v2046_v18 = vadd.f32 %v2045_v0, %v2044_v53 }
 0xcf8   :  { %2144 = vpush %v1900_v13 }
 0xcf9   :  { %2146 = vpush %v2046_v18 }
 0xd1f   :  { %s2139_s9 = spop %2138 }
 0xd20   :  { %v1164_v6 = vstv %s2139_s9 }
 0xd21   :  { %v1165_v9 = vadd.f32 %v1164_v6, %v919_v12 }
 0xd23   :  { %s2141_s10 = spop %2140 }
 0xd24   :  { %v1410_v35 = vstv %s2141_s10 }
 0xd25   :  { %v1411_v4 = vadd.f32 %v1410_v35, %v1165_v9 }
 0xd26   :  { %s2143_s11 = spop %2142 }
 0xd27   :  { %v1656_v17 = vstv %s2143_s11 }
 0xd28   :  { %v1657_v24 = vadd.f32 %v1656_v17, %v1411_v4 }
 0xd29   :  { %s2145_s5 = spop %2144 }
 0xd2a   :  { %v1902_v34 = vstv %s2145_s5  ;;  %s2147_s4 = spop %2146 }
 0xd2b   :  { %v1903_v1 = vadd.f32 %v1902_v34, %v1657_v24  ;;  %v2049_v59 = vstv %s2147_s4 }
 0xd2d   :  { %v2021_v37 = vadd.f32 %v2020_v50, %v1903_v1 }
 0xd2f   :  { %2023 = vst.msk [vmem:[#allocation3] sm:$0x1] %vm34_vm8, %v2021_v37 }
 0xd36   :  { %v2048_v42 = vld [vmem:[#allocation3] sm:$0x1] }
 0xd37   :  { %v2050_v32 = vadd.f32 %v2049_v59, %v2048_v42 }
 0xd58   :  { %v2068_v39 = vpop.xlane.xlu1 %2067 }
 0xd59   :  { %v2069_v14 = vrot.slane %v2068_v39, 4 }
 0xd5b   :  { %v2070_v26 = vadd.f32 %v2069_v14, %v2068_v39 }
 0xd5d   :  { %v2071_v41 = vrot.slane %v2070_v26, 2 }
 0xd5f   :  { %v2072_v22 = vadd.f32 %v2071_v41, %v2070_v26 }
 0xd61   :  { %v2073_v54 = vrot.slane %v2072_v22, 1 }
 0xd63   :  { %v2074_v25 = vadd.f32 %v2073_v54, %v2072_v22 }
 0xd65   :  { %2148 = vpush %v2074_v25 }
 0xd96   :  { %s2149_s14 = spop %2148 }
 0xd97   :  { %v2076_v43 = vstv %s2149_s14 }
 0xd98   :  { %v2077_v5 = vsub.f32 %v2076_v43, %v2050_v32 }
 0xd9a   :  { %2078 = vst.msk [vmem:[#allocation4] sm:$0x1] %vm34_vm8, %v2077_v5 }
 0xd9b   :  { %2334 = shalt.err (!%p2331_p4)
}
 0xd9c   :  { %s2335_s19 = scalar_lea.hbm %s3497_s6, 16 }
 0xd9d   :  { %p2336_p5 = scmp.ne.s32.totalorder %s3497_s6, %s2335_s19  ;;  %p2339_p6 = scmp.lt.u32.totalorder %s2335_s19, %s3497_s6 }
 0xd9f   :  { %p2341_p7 = pnand %p2339_p6, %p2336_p5 }
 0xda1   :  { %2344 = shalt.err (!%p2341_p7)
}
 0xda2   :  { %2088 = dma.vmem_to_hbm [thread:$0]  %s2086_s13, 16, %s3497_s6, [#allocation5]  }
 0xda3   :  { %2345 = dma.done.wait [#allocation5], 16  }
 0xda4   :  { %2346 = vsyncadd [#allocation5], 4294967280 }
 0xda5   :  { %2092 = vsyncpa [#allocation5], 1 }

</bundles_post_ra>
